<compile_context>
chip_gen: v7x
topology: tpu7x:2x2x1
jax: 0.10.0
libtpu: 0.0.40
codegen_flags: <defaults>
</compile_context>

<pallas_src>
import functools

import jax
import jax.numpy as jnp
from jax import lax
from jax.experimental import pallas as pl
from jax.experimental.pallas import tpu as pltpu


# --------------------------- banded conv weights ----------------------------- #
def make_band_weights(w, width, rep):
    """Fold the kw taps (and an optional x`rep` nearest-neighbour upsample along W) of a
    3x3x3 'same' conv into per-(kd, kh) banded matrices.

    w: (3, 3, 3, Cin, Cout). Returns (9, width*Cin, width*rep*Cout) where
      band[kd*3+kh, wi*Cin+ci, (wo*rep+r)*Cout+co] = w[kd, kh, wi-wo+1, ci, co]
    when 0 <= wi-wo+1 < 3 and 0 otherwise (zero padding along W is implicit).
    """
    Cin, Cout = w.shape[3], w.shape[4]
    wi = jnp.arange(width)[:, None]
    wo = jnp.arange(width)[None, :]
    kw = wi - wo + 1                                    # tap index for unpadded input rows
    valid = (kw >= 0) & (kw < 3)
    kw_c = jnp.clip(kw, 0, 2)
    w9 = w.reshape(9, 3, Cin, Cout)                     # (kd*3+kh, kw, Cin, Cout)
    band = w9[:, kw_c]                                  # (9, wi, wo, Cin, Cout)
    band = jnp.where(valid[None, :, :, None, None], band, 0.0)
    band = jnp.broadcast_to(band[:, :, :, None, :, :], (9, width, width, rep, Cin, Cout))
    band = jnp.transpose(band, (0, 1, 4, 2, 3, 5))      # (9, wi, Cin, wo, rep, Cout)
    return band.reshape(9, width * Cin, width * rep * Cout)


# ------------------------------ Pallas kernel -------------------------------- #
def _band_conv_silu_kernel(x_ref, w_ref, b_ref, o_ref, xpad_ref, acc_ref, *, dup_out):
    """3x3x3 conv + bias + SiLU on a (D, H, W*C) lane-dense slab.

    x_ref:    (1, Din, Hin, Win*Cin)            input voxels (lanes = (w, cin))
    w_ref:    (9, Win*Cin, Nout)                banded taps per (kd, kh), bf16
    b_ref:    (1, Nout)                         bias tiled over the output lane axis, f32
    o_ref:    dup_out: (1, Din, 2, Hin, 2*Nout) fused subdivide output (bf16)
              else:    (1, Din, Hin, Nout)
    xpad_ref: VMEM (Din+2, Hin+2, Win*Cin) f32  zero halo along D and H only
    acc_ref:  VMEM (Din*Hin, Nout) f32          accumulator (bias-initialised)
    """
    _, Din, Hin, KC = x_ref.shape
    Nout = acc_ref.shape[-1]

    # Build the D/H zero halo once in VMEM (the W halo is folded into the band weights).
    xpad_ref[...] = jnp.zeros(xpad_ref.shape, xpad_ref.dtype)
    xpad_ref[1:Din + 1, 1:Hin + 1, :] = x_ref[0].astype(xpad_ref.dtype)

    # Bias-initialised f32 accumulator; 9 banded matmuls with K = Win*Cin, bf16 on the MXU.
    acc_ref[...] = jnp.broadcast_to(b_ref[...], (Din * Hin, Nout))
    for kd in range(3):
        for kh in range(3):
            xs = xpad_ref[kd:kd + Din, kh:kh + Hin, :]
            xs = xs.reshape(Din * Hin, KC).astype(jnp.bfloat16)
            acc_ref[...] += jnp.dot(xs, w_ref[kd * 3 + kh],
                                    preferred_element_type=jnp.float32)

    a = acc_ref[...]
    # SiLU; exp goes to the EUP (approx=True would move the divide there too).
    y = a * pl.reciprocal(1.0 + jnp.exp(-a), approx=False)
    y = y.reshape(Din, Hin, Nout)

    if dup_out:
        # Fused 2x2x2 subdivide: W-duplication is already in the band weights (rep=2);
        # duplicate along H into the lane axis (order b, w, r, c) and along D via a
        # dedicated broadcast axis.  The wrapper reshape back to (2D, 2H, 2W*C) is a
        # pure row-major regroup (free).
        y = jnp.concatenate([y, y], axis=-1)                       # (Din, Hin, 2*Nout)
        y = jnp.broadcast_to(y[:, None], (Din, 2, Hin, 2 * Nout))  # (Din, 2, Hin, 2*Nout)
        o_ref[0] = y.astype(o_ref.dtype)
    else:
        o_ref[0] = y.astype(o_ref.dtype)


# -------------------------------- wrappers ----------------------------------- #
def conv_silu_subdivide(x, w, b):
    """act_layers + subdivide: x (N,D,H,W,Cin) f32 -> (N,2D,2H,2W*Cout) bf16 (lane-dense)."""
    N, D, H, W, Cin = x.shape
    Cout = w.shape[-1]
    nout = 2 * W * Cout
    xf = x.reshape(N, D, H, W * Cin)                       # fold (W, Cin) onto lanes (free)
    band = make_band_weights(w, W, rep=2).astype(jnp.bfloat16)     # (9, W*Cin, 2W*Cout)
    bias = jnp.tile(b.astype(jnp.float32), 2 * W).reshape(1, nout)

    out = pl.pallas_call(
        functools.partial(_band_conv_silu_kernel, dup_out=True),
        out_shape=jax.ShapeDtypeStruct((N, D, 2, H, 2 * nout), jnp.bfloat16),
        grid=(N,),
        in_specs=[
            pl.BlockSpec((1, D, H, W * Cin), lambda n: (n, 0, 0, 0)),
            pl.BlockSpec((9, W * Cin, nout), lambda n: (0, 0, 0)),
            pl.BlockSpec((1, nout), lambda n: (0, 0)),
        ],
        out_specs=pl.BlockSpec((1, D, 2, H, 2 * nout), lambda n: (n, 0, 0, 0, 0)),
        scratch_shapes=[
            pltpu.VMEM((D + 2, H + 2, W * Cin), jnp.float32),
            pltpu.VMEM((D * H, nout), jnp.float32),
        ],
        compiler_params=pltpu.CompilerParams(dimension_semantics=("parallel",)),
    )(xf, band, bias)
    # (N, D, 2, H, 2*(2W*Cout)) -> (N, 2D, 2H, 2W*Cout): element order preserved -> free.
    return out.reshape(N, 2 * D, 2 * H, 2 * W * Cout)


def conv_silu(hf, w, b):
    """out_layers: hf (N, D2, H2, W2*C) bf16 -> (N, D2, H2, W2, C) f32."""
    N, D2, H2, W2C = hf.shape
    C = w.shape[-1]
    W2 = W2C // C
    band = make_band_weights(w, W2, rep=1).astype(jnp.bfloat16)    # (9, W2*C, W2*C)
    bias = jnp.tile(b.astype(jnp.float32), W2).reshape(1, W2 * C)

    out = pl.pallas_call(
        functools.partial(_band_conv_silu_kernel, dup_out=False),
        out_shape=jax.ShapeDtypeStruct((N, D2, H2, W2 * C), jnp.float32),
        grid=(N,),
        in_specs=[
            pl.BlockSpec((1, D2, H2, W2C), lambda n: (n, 0, 0, 0)),
            pl.BlockSpec((9, W2 * C, W2 * C), lambda n: (0, 0, 0)),
            pl.BlockSpec((1, W2 * C), lambda n: (0, 0)),
        ],
        out_specs=pl.BlockSpec((1, D2, H2, W2 * C), lambda n: (n, 0, 0, 0)),
        scratch_shapes=[
            pltpu.VMEM((D2 + 2, H2 + 2, W2C), jnp.float32),
            pltpu.VMEM((D2 * H2, W2 * C), jnp.float32),
        ],
        compiler_params=pltpu.CompilerParams(dimension_semantics=("parallel",)),
    )(hf, band, bias)
    return out.reshape(N, D2, H2, W2, C)


def sparse_subdivide_block3d(x, params):
    h = conv_silu_subdivide(x, params["w1"], params["b1"])   # act_layers + sub (fused)
    return conv_silu(h, params["w2"], params["b2"])          # out_layers


def init_params(key, channels, out_channels):
    k1, k2, k3, k4 = jax.random.split(key, 4)
    scale = 0.1
    return {
        "w1": scale * jax.random.normal(k1, (3, 3, 3, channels, out_channels), jnp.float32),
        "b1": scale * jax.random.normal(k2, (out_channels,), jnp.float32),
        "w2": scale * jax.random.normal(k3, (3, 3, 3, out_channels, out_channels), jnp.float32),
        "b2": scale * jax.random.normal(k4, (out_channels,), jnp.float32),
    }


# ---------------------------- pure-JAX reference ------------------------------ #
def _conv3d_silu_ref(x, w, b):
    y = lax.conv_general_dilated(
        x, w, window_strides=(1, 1, 1), padding="SAME",
        dimension_numbers=("NDHWC", "DHWIO", "NDHWC"))
    y = y + b[None, None, None, None, :]
    return y * jax.nn.sigmoid(y)


def _subdivide_ref(x):
    x = jnp.repeat(x, 2, axis=1)
    x = jnp.repeat(x, 2, axis=2)
    x = jnp.repeat(x, 2, axis=3)
    return x


def _block_ref(x, params):
    h = _conv3d_silu_ref(x, params["w1"], params["b1"])
    h = _subdivide_ref(h)
    return _conv3d_silu_ref(h, params["w2"], params["b2"])


# ----------------------------------- main ------------------------------------- #
if __name__ == "__main__":
    key = jax.random.PRNGKey(0)
    k_x, k_p = jax.random.split(key)

    N, C_in, C_out = 2, 4, 8
    D = H = W = 8                       # output resolution = 16

    x = jax.random.normal(k_x, (N, D, H, W, C_in), jnp.float32)
    params = init_params(k_p, C_in, C_out)

    fwd = jax.jit(sparse_subdivide_block3d)
    out = jax.block_until_ready(fwd(x, params))
    assert out.shape == (N, 2 * D, 2 * H, 2 * W, C_out), out.shape

    ref = jax.block_until_ready(_block_ref(x, params))
    max_err = float(jnp.max(jnp.abs(out - ref)))
    # bf16 MXU operands (f32 accumulation) give ~1e-2-level max abs error at these scales.
    assert max_err < 2e-2, f"max abs error {max_err}"

    print("KERNEL_OK")
</pallas_src>

<mosaic_0001>
module attributes {stable_mosaic.version = 11 : i64} {
  func.func @_band_conv_silu_kernel(%arg0: i32, %arg1: memref<1x8x8x32xf32, #tpu.memory_space<vmem>>, %arg2: memref<9x32x128xbf16, #tpu.memory_space<vmem>>, %arg3: memref<1x128xf32, #tpu.memory_space<vmem>>, %arg4: memref<1x8x2x8x256xbf16, #tpu.memory_space<vmem>>, %arg5: memref<10x10x32xf32, #tpu.memory_space<vmem>>, %arg6: memref<64x128xf32, #tpu.memory_space<vmem>>) attributes {dimension_semantics = [#tpu.dimension_semantics<parallel>], iteration_bounds = array<i64: 2>, scalar_prefetch = 0 : i64, scratch_operands = 2 : i64, tpu.core_type = #tpu.core_type<tc>, window_params = [{transform_indices = @transform_0, window_bounds = array<i64: 1, 8, 8, 32>}, {pipeline_mode = #tpu.pipeline_mode<synchronous>, transform_indices = @transform_1, window_bounds = array<i64: 9, 32, 128>}, {pipeline_mode = #tpu.pipeline_mode<synchronous>, transform_indices = @transform_2, window_bounds = array<i64: 1, 128>}, {transform_indices = @transform_3, window_bounds = array<i64: 1, 8, 2, 8, 256>}]} {
    %cst = arith.constant 0.000000e+00 : f32
    %0 = vector.broadcast %cst : f32 to vector<10x10x32xf32>
    %c0 = arith.constant 0 : index
    %c0_0 = arith.constant 0 : index
    %c0_1 = arith.constant 0 : index
    %1 = vector.load %arg5[%c0, %c0_0, %c0_1] : memref<10x10x32xf32, #tpu.memory_space<vmem>>, vector<10x10x32xf32>
    tpu.vector_store %arg5[%c0, %c0_0, %c0_1], %0 {strides = array<i32>} : memref<10x10x32xf32, #tpu.memory_space<vmem>>, vector<10x10x32xf32>,
    %c0_2 = arith.constant 0 : index
    %c0_3 = arith.constant 0 : index
    %c0_4 = arith.constant 0 : index
    %c0_5 = arith.constant 0 : index
    %2 = vector.load %arg1[%c0_2, %c0_3, %c0_4, %c0_5] : memref<1x8x8x32xf32, #tpu.memory_space<vmem>>, vector<1x8x8x32xf32>
    %3 = vector.shape_cast %2 : vector<1x8x8x32xf32> to vector<8x8x32xf32>
    %c1 = arith.constant 1 : index
    %c1_6 = arith.constant 1 : index
    %c0_7 = arith.constant 0 : index
    %4 = vector.load %arg5[%c1, %c1_6, %c0_7] : memref<10x10x32xf32, #tpu.memory_space<vmem>>, vector<8x8x32xf32>
    tpu.vector_store %arg5[%c1, %c1_6, %c0_7], %3 {strides = array<i32>} : memref<10x10x32xf32, #tpu.memory_space<vmem>>, vector<8x8x32xf32>,
    %c0_8 = arith.constant 0 : index
    %c0_9 = arith.constant 0 : index
    %5 = vector.load %arg3[%c0_8, %c0_9] : memref<1x128xf32, #tpu.memory_space<vmem>>, vector<1x128xf32>
    %6 = vector.shape_cast %5 : vector<1x128xf32> to vector<1x128xf32>
    %7 = vector.broadcast %6 : vector<1x128xf32> to vector<64x128xf32>
    %c0_10 = arith.constant 0 : index
    %c0_11 = arith.constant 0 : index
    %8 = vector.load %arg6[%c0_10, %c0_11] : memref<64x128xf32, #tpu.memory_space<vmem>>, vector<64x128xf32>
    tpu.vector_store %arg6[%c0_10, %c0_11], %7 {strides = array<i32>} : memref<64x128xf32, #tpu.memory_space<vmem>>, vector<64x128xf32>,
    %c0_12 = arith.constant 0 : index
    %c0_13 = arith.constant 0 : index
    %c0_14 = arith.constant 0 : index
    %9 = vector.load %arg5[%c0_12, %c0_13, %c0_14] : memref<10x10x32xf32, #tpu.memory_space<vmem>>, vector<8x8x32xf32>
    %10 = vector.shape_cast %9 : vector<8x8x32xf32> to vector<64x32xf32>
    %11 = arith.truncf %10 : vector<64x32xf32> to vector<64x32xbf16>
    %c0_15 = arith.constant 0 : index
    %c0_16 = arith.constant 0 : index
    %12 = vector.load %arg6[%c0_15, %c0_16] : memref<64x128xf32, #tpu.memory_space<vmem>>, vector<64x128xf32>
    %c0_17 = arith.constant 0 : index
    %c0_18 = arith.constant 0 : index
    %c0_19 = arith.constant 0 : index
    %13 = vector.load %arg2[%c0_17, %c0_18, %c0_19] : memref<9x32x128xbf16, #tpu.memory_space<vmem>>, vector<1x32x128xbf16>
    %14 = vector.shape_cast %13 : vector<1x32x128xbf16> to vector<32x128xbf16>
    %cst_20 = arith.constant dense<0.000000e+00> : vector<64x128xf32>
    %15 = tpu.matmul %11, %14, %cst_20 {dimension_numbers = #tpu.dot_dimension_numbers<[1], [0], [0], [1], [0, 0, 1, 1], [], []>} : vector<64x32xbf16>, vector<32x128xbf16>, vector<64x128xf32> -> vector<64x128xf32>
    %16 = arith.addf %12, %15 : vector<64x128xf32>
    %c0_21 = arith.constant 0 : index
    %c0_22 = arith.constant 0 : index
    %17 = vector.load %arg6[%c0_21, %c0_22] : memref<64x128xf32, #tpu.memory_space<vmem>>, vector<64x128xf32>
    tpu.vector_store %arg6[%c0_21, %c0_22], %16 {strides = array<i32>} : memref<64x128xf32, #tpu.memory_space<vmem>>, vector<64x128xf32>,
    %c0_23 = arith.constant 0 : index
    %c1_24 = arith.constant 1 : index
    %c0_25 = arith.constant 0 : index
    %18 = vector.load %arg5[%c0_23, %c1_24, %c0_25] : memref<10x10x32xf32, #tpu.memory_space<vmem>>, vector<8x8x32xf32>
    %19 = vector.shape_cast %18 : vector<8x8x32xf32> to vector<64x32xf32>
    %20 = arith.truncf %19 : vector<64x32xf32> to vector<64x32xbf16>
    %c0_26 = arith.constant 0 : index
    %c0_27 = arith.constant 0 : index
    %21 = vector.load %arg6[%c0_26, %c0_27] : memref<64x128xf32, #tpu.memory_space<vmem>>, vector<64x128xf32>
    %c1_28 = arith.constant 1 : index
    %c0_29 = arith.constant 0 : index
    %c0_30 = arith.constant 0 : index
    %22 = vector.load %arg2[%c1_28, %c0_29, %c0_30] : memref<9x32x128xbf16, #tpu.memory_space<vmem>>, vector<1x32x128xbf16>
    %23 = vector.shape_cast %22 : vector<1x32x128xbf16> to vector<32x128xbf16>
    %cst_31 = arith.constant dense<0.000000e+00> : vector<64x128xf32>
    %24 = tpu.matmul %20, %23, %cst_31 {dimension_numbers = #tpu.dot_dimension_numbers<[1], [0], [0], [1], [0, 0, 1, 1], [], []>} : vector<64x32xbf16>, vector<32x128xbf16>, vector<64x128xf32> -> vector<64x128xf32>
    %25 = arith.addf %21, %24 : vector<64x128xf32>
    %c0_32 = arith.constant 0 : index
    %c0_33 = arith.constant 0 : index
    %26 = vector.load %arg6[%c0_32, %c0_33] : memref<64x128xf32, #tpu.memory_space<vmem>>, vector<64x128xf32>
    tpu.vector_store %arg6[%c0_32, %c0_33], %25 {strides = array<i32>} : memref<64x128xf32, #tpu.memory_space<vmem>>, vector<64x128xf32>,
    %c0_34 = arith.constant 0 : index
    %c2 = arith.constant 2 : index
    %c0_35 = arith.constant 0 : index
    %27 = vector.load %arg5[%c0_34, %c2, %c0_35] : memref<10x10x32xf32, #tpu.memory_space<vmem>>, vector<8x8x32xf32>
    %28 = vector.shape_cast %27 : vector<8x8x32xf32> to vector<64x32xf32>
    %29 = arith.truncf %28 : vector<64x32xf32> to vector<64x32xbf16>
    %c0_36 = arith.constant 0 : index
    %c0_37 = arith.constant 0 : index
    %30 = vector.load %arg6[%c0_36, %c0_37] : memref<64x128xf32, #tpu.memory_space<vmem>>, vector<64x128xf32>
    %c2_38 = arith.constant 2 : index
    %c0_39 = arith.constant 0 : index
    %c0_40 = arith.constant 0 : index
    %31 = vector.load %arg2[%c2_38, %c0_39, %c0_40] : memref<9x32x128xbf16, #tpu.memory_space<vmem>>, vector<1x32x128xbf16>
    %32 = vector.shape_cast %31 : vector<1x32x128xbf16> to vector<32x128xbf16>
    %cst_41 = arith.constant dense<0.000000e+00> : vector<64x128xf32>
    %33 = tpu.matmul %29, %32, %cst_41 {dimension_numbers = #tpu.dot_dimension_numbers<[1], [0], [0], [1], [0, 0, 1, 1], [], []>} : vector<64x32xbf16>, vector<32x128xbf16>, vector<64x128xf32> -> vector<64x128xf32>
    %34 = arith.addf %30, %33 : vector<64x128xf32>
    %c0_42 = arith.constant 0 : index
    %c0_43 = arith.constant 0 : index
    %35 = vector.load %arg6[%c0_42, %c0_43] : memref<64x128xf32, #tpu.memory_space<vmem>>, vector<64x128xf32>
    tpu.vector_store %arg6[%c0_42, %c0_43], %34 {strides = array<i32>} : memref<64x128xf32, #tpu.memory_space<vmem>>, vector<64x128xf32>,
    %c1_44 = arith.constant 1 : index
    %c0_45 = arith.constant 0 : index
    %c0_46 = arith.constant 0 : index
    %36 = vector.load %arg5[%c1_44, %c0_45, %c0_46] : memref<10x10x32xf32, #tpu.memory_space<vmem>>, vector<8x8x32xf32>
    %37 = vector.shape_cast %36 : vector<8x8x32xf32> to vector<64x32xf32>
    %38 = arith.truncf %37 : vector<64x32xf32> to vector<64x32xbf16>
    %c0_47 = arith.constant 0 : index
    %c0_48 = arith.constant 0 : index
    %39 = vector.load %arg6[%c0_47, %c0_48] : memref<64x128xf32, #tpu.memory_space<vmem>>, vector<64x128xf32>
    %c3 = arith.constant 3 : index
    %c0_49 = arith.constant 0 : index
    %c0_50 = arith.constant 0 : index
    %40 = vector.load %arg2[%c3, %c0_49, %c0_50] : memref<9x32x128xbf16, #tpu.memory_space<vmem>>, vector<1x32x128xbf16>
    %41 = vector.shape_cast %40 : vector<1x32x128xbf16> to vector<32x128xbf16>
    %cst_51 = arith.constant dense<0.000000e+00> : vector<64x128xf32>
    %42 = tpu.matmul %38, %41, %cst_51 {dimension_numbers = #tpu.dot_dimension_numbers<[1], [0], [0], [1], [0, 0, 1, 1], [], []>} : vector<64x32xbf16>, vector<32x128xbf16>, vector<64x128xf32> -> vector<64x128xf32>
    %43 = arith.addf %39, %42 : vector<64x128xf32>
    %c0_52 = arith.constant 0 : index
    %c0_53 = arith.constant 0 : index
    %44 = vector.load %arg6[%c0_52, %c0_53] : memref<64x128xf32, #tpu.memory_space<vmem>>, vector<64x128xf32>
    tpu.vector_store %arg6[%c0_52, %c0_53], %43 {strides = array<i32>} : memref<64x128xf32, #tpu.memory_space<vmem>>, vector<64x128xf32>,
    %c1_54 = arith.constant 1 : index
    %c1_55 = arith.constant 1 : index
    %c0_56 = arith.constant 0 : index
    %45 = vector.load %arg5[%c1_54, %c1_55, %c0_56] : memref<10x10x32xf32, #tpu.memory_space<vmem>>, vector<8x8x32xf32>
    %46 = vector.shape_cast %45 : vector<8x8x32xf32> to vector<64x32xf32>
    %47 = arith.truncf %46 : vector<64x32xf32> to vector<64x32xbf16>
    %c0_57 = arith.constant 0 : index
    %c0_58 = arith.constant 0 : index
    %48 = vector.load %arg6[%c0_57, %c0_58] : memref<64x128xf32, #tpu.memory_space<vmem>>, vector<64x128xf32>
    %c4 = arith.constant 4 : index
    %c0_59 = arith.constant 0 : index
    %c0_60 = arith.constant 0 : index
    %49 = vector.load %arg2[%c4, %c0_59, %c0_60] : memref<9x32x128xbf16, #tpu.memory_space<vmem>>, vector<1x32x128xbf16>
    %50 = vector.shape_cast %49 : vector<1x32x128xbf16> to vector<32x128xbf16>
    %cst_61 = arith.constant dense<0.000000e+00> : vector<64x128xf32>
    %51 = tpu.matmul %47, %50, %cst_61 {dimension_numbers = #tpu.dot_dimension_numbers<[1], [0], [0], [1], [0, 0, 1, 1], [], []>} : vector<64x32xbf16>, vector<32x128xbf16>, vector<64x128xf32> -> vector<64x128xf32>
    %52 = arith.addf %48, %51 : vector<64x128xf32>
    %c0_62 = arith.constant 0 : index
    %c0_63 = arith.constant 0 : index
    %53 = vector.load %arg6[%c0_62, %c0_63] : memref<64x128xf32, #tpu.memory_space<vmem>>, vector<64x128xf32>
    tpu.vector_store %arg6[%c0_62, %c0_63], %52 {strides = array<i32>} : memref<64x128xf32, #tpu.memory_space<vmem>>, vector<64x128xf32>,
    %c1_64 = arith.constant 1 : index
    %c2_65 = arith.constant 2 : index
    %c0_66 = arith.constant 0 : index
    %54 = vector.load %arg5[%c1_64, %c2_65, %c0_66] : memref<10x10x32xf32, #tpu.memory_space<vmem>>, vector<8x8x32xf32>
    %55 = vector.shape_cast %54 : vector<8x8x32xf32> to vector<64x32xf32>
    %56 = arith.truncf %55 : vector<64x32xf32> to vector<64x32xbf16>
    %c0_67 = arith.constant 0 : index
    %c0_68 = arith.constant 0 : index
    %57 = vector.load %arg6[%c0_67, %c0_68] : memref<64x128xf32, #tpu.memory_space<vmem>>, vector<64x128xf32>
    %c5 = arith.constant 5 : index
    %c0_69 = arith.constant 0 : index
    %c0_70 = arith.constant 0 : index
    %58 = vector.load %arg2[%c5, %c0_69, %c0_70] : memref<9x32x128xbf16, #tpu.memory_space<vmem>>, vector<1x32x128xbf16>
    %59 = vector.shape_cast %58 : vector<1x32x128xbf16> to vector<32x128xbf16>
    %cst_71 = arith.constant dense<0.000000e+00> : vector<64x128xf32>
    %60 = tpu.matmul %56, %59, %cst_71 {dimension_numbers = #tpu.dot_dimension_numbers<[1], [0], [0], [1], [0, 0, 1, 1], [], []>} : vector<64x32xbf16>, vector<32x128xbf16>, vector<64x128xf32> -> vector<64x128xf32>
    %61 = arith.addf %57, %60 : vector<64x128xf32>
    %c0_72 = arith.constant 0 : index
    %c0_73 = arith.constant 0 : index
    %62 = vector.load %arg6[%c0_72, %c0_73] : memref<64x128xf32, #tpu.memory_space<vmem>>, vector<64x128xf32>
    tpu.vector_store %arg6[%c0_72, %c0_73], %61 {strides = array<i32>} : memref<64x128xf32, #tpu.memory_space<vmem>>, vector<64x128xf32>,
    %c2_74 = arith.constant 2 : index
    %c0_75 = arith.constant 0 : index
    %c0_76 = arith.constant 0 : index
    %63 = vector.load %arg5[%c2_74, %c0_75, %c0_76] : memref<10x10x32xf32, #tpu.memory_space<vmem>>, vector<8x8x32xf32>
    %64 = vector.shape_cast %63 : vector<8x8x32xf32> to vector<64x32xf32>
    %65 = arith.truncf %64 : vector<64x32xf32> to vector<64x32xbf16>
    %c0_77 = arith.constant 0 : index
    %c0_78 = arith.constant 0 : index
    %66 = vector.load %arg6[%c0_77, %c0_78] : memref<64x128xf32, #tpu.memory_space<vmem>>, vector<64x128xf32>
    %c6 = arith.constant 6 : index
    %c0_79 = arith.constant 0 : index
    %c0_80 = arith.constant 0 : index
    %67 = vector.load %arg2[%c6, %c0_79, %c0_80] : memref<9x32x128xbf16, #tpu.memory_space<vmem>>, vector<1x32x128xbf16>
    %68 = vector.shape_cast %67 : vector<1x32x128xbf16> to vector<32x128xbf16>
    %cst_81 = arith.constant dense<0.000000e+00> : vector<64x128xf32>
    %69 = tpu.matmul %65, %68, %cst_81 {dimension_numbers = #tpu.dot_dimension_numbers<[1], [0], [0], [1], [0, 0, 1, 1], [], []>} : vector<64x32xbf16>, vector<32x128xbf16>, vector<64x128xf32> -> vector<64x128xf32>
    %70 = arith.addf %66, %69 : vector<64x128xf32>
    %c0_82 = arith.constant 0 : index
    %c0_83 = arith.constant 0 : index
    %71 = vector.load %arg6[%c0_82, %c0_83] : memref<64x128xf32, #tpu.memory_space<vmem>>, vector<64x128xf32>
    tpu.vector_store %arg6[%c0_82, %c0_83], %70 {strides = array<i32>} : memref<64x128xf32, #tpu.memory_space<vmem>>, vector<64x128xf32>,
    %c2_84 = arith.constant 2 : index
    %c1_85 = arith.constant 1 : index
    %c0_86 = arith.constant 0 : index
    %72 = vector.load %arg5[%c2_84, %c1_85, %c0_86] : memref<10x10x32xf32, #tpu.memory_space<vmem>>, vector<8x8x32xf32>
    %73 = vector.shape_cast %72 : vector<8x8x32xf32> to vector<64x32xf32>
    %74 = arith.truncf %73 : vector<64x32xf32> to vector<64x32xbf16>
    %c0_87 = arith.constant 0 : index
    %c0_88 = arith.constant 0 : index
    %75 = vector.load %arg6[%c0_87, %c0_88] : memref<64x128xf32, #tpu.memory_space<vmem>>, vector<64x128xf32>
    %c7 = arith.constant 7 : index
    %c0_89 = arith.constant 0 : index
    %c0_90 = arith.constant 0 : index
    %76 = vector.load %arg2[%c7, %c0_89, %c0_90] : memref<9x32x128xbf16, #tpu.memory_space<vmem>>, vector<1x32x128xbf16>
    %77 = vector.shape_cast %76 : vector<1x32x128xbf16> to vector<32x128xbf16>
    %cst_91 = arith.constant dense<0.000000e+00> : vector<64x128xf32>
    %78 = tpu.matmul %74, %77, %cst_91 {dimension_numbers = #tpu.dot_dimension_numbers<[1], [0], [0], [1], [0, 0, 1, 1], [], []>} : vector<64x32xbf16>, vector<32x128xbf16>, vector<64x128xf32> -> vector<64x128xf32>
    %79 = arith.addf %75, %78 : vector<64x128xf32>
    %c0_92 = arith.constant 0 : index
    %c0_93 = arith.constant 0 : index
    %80 = vector.load %arg6[%c0_92, %c0_93] : memref<64x128xf32, #tpu.memory_space<vmem>>, vector<64x128xf32>
    tpu.vector_store %arg6[%c0_92, %c0_93], %79 {strides = array<i32>} : memref<64x128xf32, #tpu.memory_space<vmem>>, vector<64x128xf32>,
    %c2_94 = arith.constant 2 : index
    %c2_95 = arith.constant 2 : index
    %c0_96 = arith.constant 0 : index
    %81 = vector.load %arg5[%c2_94, %c2_95, %c0_96] : memref<10x10x32xf32, #tpu.memory_space<vmem>>, vector<8x8x32xf32>
    %82 = vector.shape_cast %81 : vector<8x8x32xf32> to vector<64x32xf32>
    %83 = arith.truncf %82 : vector<64x32xf32> to vector<64x32xbf16>
    %c0_97 = arith.constant 0 : index
    %c0_98 = arith.constant 0 : index
    %84 = vector.load %arg6[%c0_97, %c0_98] : memref<64x128xf32, #tpu.memory_space<vmem>>, vector<64x128xf32>
    %c8 = arith.constant 8 : index
    %c0_99 = arith.constant 0 : index
    %c0_100 = arith.constant 0 : index
    %85 = vector.load %arg2[%c8, %c0_99, %c0_100] : memref<9x32x128xbf16, #tpu.memory_space<vmem>>, vector<1x32x128xbf16>
    %86 = vector.shape_cast %85 : vector<1x32x128xbf16> to vector<32x128xbf16>
    %cst_101 = arith.constant dense<0.000000e+00> : vector<64x128xf32>
    %87 = tpu.matmul %83, %86, %cst_101 {dimension_numbers = #tpu.dot_dimension_numbers<[1], [0], [0], [1], [0, 0, 1, 1], [], []>} : vector<64x32xbf16>, vector<32x128xbf16>, vector<64x128xf32> -> vector<64x128xf32>
    %88 = arith.addf %84, %87 : vector<64x128xf32>
    %c0_102 = arith.constant 0 : index
    %c0_103 = arith.constant 0 : index
    %89 = vector.load %arg6[%c0_102, %c0_103] : memref<64x128xf32, #tpu.memory_space<vmem>>, vector<64x128xf32>
    tpu.vector_store %arg6[%c0_102, %c0_103], %88 {strides = array<i32>} : memref<64x128xf32, #tpu.memory_space<vmem>>, vector<64x128xf32>,
    %c0_104 = arith.constant 0 : index
    %c0_105 = arith.constant 0 : index
    %90 = vector.load %arg6[%c0_104, %c0_105] : memref<64x128xf32, #tpu.memory_space<vmem>>, vector<64x128xf32>
    %cst_106 = arith.constant 0.000000e+00 : f32
    %91 = vector.broadcast %cst_106 : f32 to vector<64x128xf32>
    %92 = arith.subf %91, %90 : vector<64x128xf32>
    %93 = math.exp %92 : vector<64x128xf32>
    %cst_107 = arith.constant 1.000000e+00 : f32
    %94 = vector.broadcast %cst_107 : f32 to vector<64x128xf32>
    %95 = arith.addf %94, %93 : vector<64x128xf32>
    %96 = tpu.reciprocal %95 : vector<64x128xf32> -> vector<64x128xf32>
    %97 = arith.mulf %90, %96 : vector<64x128xf32>
    %98 = vector.shape_cast %97 : vector<64x128xf32> to vector<8x8x128xf32>
    %99 = tpu.concatenate %98, %98 in 2 : vector<8x8x128xf32>, vector<8x8x128xf32> -> vector<8x8x256xf32>
    %100 = vector.shape_cast %99 : vector<8x8x256xf32> to vector<8x1x8x256xf32>
    %101 = vector.shape_cast %100 : vector<8x1x8x256xf32> to vector<8x1x8x256xf32>
    %102 = vector.broadcast %101 : vector<8x1x8x256xf32> to vector<8x2x8x256xf32>
    %103 = arith.truncf %102 : vector<8x2x8x256xf32> to vector<8x2x8x256xbf16>
    %c0_108 = arith.constant 0 : index
    %c0_109 = arith.constant 0 : index
    %c0_110 = arith.constant 0 : index
    %c0_111 = arith.constant 0 : index
    %c0_112 = arith.constant 0 : index
    %104 = vector.load %arg4[%c0_108, %c0_109, %c0_110, %c0_111, %c0_112] : memref<1x8x2x8x256xbf16, #tpu.memory_space<vmem>>, vector<1x8x2x8x256xbf16>
    %105 = vector.shape_cast %104 : vector<1x8x2x8x256xbf16> to vector<8x2x8x256xbf16>
    %106 = vector.shape_cast %103 : vector<8x2x8x256xbf16> to vector<1x8x2x8x256xbf16>
    tpu.vector_store %arg4[%c0_108, %c0_109, %c0_110, %c0_111, %c0_112], %106 {strides = array<i32>} : memref<1x8x2x8x256xbf16, #tpu.memory_space<vmem>>, vector<1x8x2x8x256xbf16>,
    return
  }
  func.func @transform_0(%arg0: i32) -> (i32, i32, i32, i32) {
    %c0_i32 = arith.constant 0 : i32
    %c0_i32_0 = arith.constant 0 : i32
    %c0_i32_1 = arith.constant 0 : i32
    %c0_i32_2 = arith.constant 0 : i32
    return %arg0, %c0_i32, %c0_i32_0, %c0_i32_1 : i32, i32, i32, i32
  }
  func.func @transform_1(%arg0: i32) -> (i32, i32, i32) {
    %c0_i32 = arith.constant 0 : i32
    %c0_i32_0 = arith.constant 0 : i32
    %c0_i32_1 = arith.constant 0 : i32
    %c0_i32_2 = arith.constant 0 : i32
    return %c0_i32, %c0_i32_0, %c0_i32_1 : i32, i32, i32
  }
  func.func @transform_2(%arg0: i32) -> (i32, i32) {
    %c0_i32 = arith.constant 0 : i32
    %c0_i32_0 = arith.constant 0 : i32
    %c0_i32_1 = arith.constant 0 : i32
    return %c0_i32, %c0_i32_0 : i32, i32
  }
  func.func @transform_3(%arg0: i32) -> (i32, i32, i32, i32, i32) {
    %c0_i32 = arith.constant 0 : i32
    %c0_i32_0 = arith.constant 0 : i32
    %c0_i32_1 = arith.constant 0 : i32
    %c0_i32_2 = arith.constant 0 : i32
    %c0_i32_3 = arith.constant 0 : i32
    return %arg0, %c0_i32, %c0_i32_0, %c0_i32_1, %c0_i32_2 : i32, i32, i32, i32, i32
  }
}

module attributes {stable_mosaic.version = 11 : i64} {
  func.func @_band_conv_silu_kernel(%arg0: i32, %arg1: memref<1x16x16x128xbf16, #tpu.memory_space<vmem>>, %arg2: memref<9x128x128xbf16, #tpu.memory_space<vmem>>, %arg3: memref<1x128xf32, #tpu.memory_space<vmem>>, %arg4: memref<1x16x16x128xf32, #tpu.memory_space<vmem>>, %arg5: memref<18x18x128xf32, #tpu.memory_space<vmem>>, %arg6: memref<256x128xf32, #tpu.memory_space<vmem>>) attributes {dimension_semantics = [#tpu.dimension_semantics<parallel>], iteration_bounds = array<i64: 2>, scalar_prefetch = 0 : i64, scratch_operands = 2 : i64, tpu.core_type = #tpu.core_type<tc>, window_params = [{transform_indices = @transform_0, window_bounds = array<i64: 1, 16, 16, 128>}, {pipeline_mode = #tpu.pipeline_mode<synchronous>, transform_indices = @transform_1, window_bounds = array<i64: 9, 128, 128>}, {pipeline_mode = #tpu.pipeline_mode<synchronous>, transform_indices = @transform_2, window_bounds = array<i64: 1, 128>}, {transform_indices = @transform_3, window_bounds = array<i64: 1, 16, 16, 128>}]} {
    %cst = arith.constant 0.000000e+00 : f32
    %0 = vector.broadcast %cst : f32 to vector<18x18x128xf32>
    %c0 = arith.constant 0 : index
    %c0_0 = arith.constant 0 : index
    %c0_1 = arith.constant 0 : index
    %1 = vector.load %arg5[%c0, %c0_0, %c0_1] : memref<18x18x128xf32, #tpu.memory_space<vmem>>, vector<18x18x128xf32>
    tpu.vector_store %arg5[%c0, %c0_0, %c0_1], %0 {strides = array<i32>} : memref<18x18x128xf32, #tpu.memory_space<vmem>>, vector<18x18x128xf32>,
    %c0_2 = arith.constant 0 : index
    %c0_3 = arith.constant 0 : index
    %c0_4 = arith.constant 0 : index
    %c0_5 = arith.constant 0 : index
    %2 = vector.load %arg1[%c0_2, %c0_3, %c0_4, %c0_5] : memref<1x16x16x128xbf16, #tpu.memory_space<vmem>>, vector<1x16x16x128xbf16>
    %3 = vector.shape_cast %2 : vector<1x16x16x128xbf16> to vector<16x16x128xbf16>
    %4 = arith.extf %3 : vector<16x16x128xbf16> to vector<16x16x128xf32>
    %c1 = arith.constant 1 : index
    %c1_6 = arith.constant 1 : index
    %c0_7 = arith.constant 0 : index
    %5 = vector.load %arg5[%c1, %c1_6, %c0_7] : memref<18x18x128xf32, #tpu.memory_space<vmem>>, vector<16x16x128xf32>
    tpu.vector_store %arg5[%c1, %c1_6, %c0_7], %4 {strides = array<i32>} : memref<18x18x128xf32, #tpu.memory_space<vmem>>, vector<16x16x128xf32>,
    %c0_8 = arith.constant 0 : index
    %c0_9 = arith.constant 0 : index
    %6 = vector.load %arg3[%c0_8, %c0_9] : memref<1x128xf32, #tpu.memory_space<vmem>>, vector<1x128xf32>
    %7 = vector.shape_cast %6 : vector<1x128xf32> to vector<1x128xf32>
    %8 = vector.broadcast %7 : vector<1x128xf32> to vector<256x128xf32>
    %c0_10 = arith.constant 0 : index
    %c0_11 = arith.constant 0 : index
    %9 = vector.load %arg6[%c0_10, %c0_11] : memref<256x128xf32, #tpu.memory_space<vmem>>, vector<256x128xf32>
    tpu.vector_store %arg6[%c0_10, %c0_11], %8 {strides = array<i32>} : memref<256x128xf32, #tpu.memory_space<vmem>>, vector<256x128xf32>,
    %c0_12 = arith.constant 0 : index
    %c0_13 = arith.constant 0 : index
    %c0_14 = arith.constant 0 : index
    %10 = vector.load %arg5[%c0_12, %c0_13, %c0_14] : memref<18x18x128xf32, #tpu.memory_space<vmem>>, vector<16x16x128xf32>
    %11 = vector.shape_cast %10 : vector<16x16x128xf32> to vector<256x128xf32>
    %12 = arith.truncf %11 : vector<256x128xf32> to vector<256x128xbf16>
    %c0_15 = arith.constant 0 : index
    %c0_16 = arith.constant 0 : index
    %13 = vector.load %arg6[%c0_15, %c0_16] : memref<256x128xf32, #tpu.memory_space<vmem>>, vector<256x128xf32>
    %c0_17 = arith.constant 0 : index
    %c0_18 = arith.constant 0 : index
    %c0_19 = arith.constant 0 : index
    %14 = vector.load %arg2[%c0_17, %c0_18, %c0_19] : memref<9x128x128xbf16, #tpu.memory_space<vmem>>, vector<1x128x128xbf16>
    %15 = vector.shape_cast %14 : vector<1x128x128xbf16> to vector<128x128xbf16>
    %cst_20 = arith.constant dense<0.000000e+00> : vector<256x128xf32>
    %16 = tpu.matmul %12, %15, %cst_20 {dimension_numbers = #tpu.dot_dimension_numbers<[1], [0], [0], [1], [0, 0, 1, 1], [], []>} : vector<256x128xbf16>, vector<128x128xbf16>, vector<256x128xf32> -> vector<256x128xf32>
    %17 = arith.addf %13, %16 : vector<256x128xf32>
    %c0_21 = arith.constant 0 : index
    %c0_22 = arith.constant 0 : index
    %18 = vector.load %arg6[%c0_21, %c0_22] : memref<256x128xf32, #tpu.memory_space<vmem>>, vector<256x128xf32>
    tpu.vector_store %arg6[%c0_21, %c0_22], %17 {strides = array<i32>} : memref<256x128xf32, #tpu.memory_space<vmem>>, vector<256x128xf32>,
    %c0_23 = arith.constant 0 : index
    %c1_24 = arith.constant 1 : index
    %c0_25 = arith.constant 0 : index
    %19 = vector.load %arg5[%c0_23, %c1_24, %c0_25] : memref<18x18x128xf32, #tpu.memory_space<vmem>>, vector<16x16x128xf32>
    %20 = vector.shape_cast %19 : vector<16x16x128xf32> to vector<256x128xf32>
    %21 = arith.truncf %20 : vector<256x128xf32> to vector<256x128xbf16>
    %c0_26 = arith.constant 0 : index
    %c0_27 = arith.constant 0 : index
    %22 = vector.load %arg6[%c0_26, %c0_27] : memref<256x128xf32, #tpu.memory_space<vmem>>, vector<256x128xf32>
    %c1_28 = arith.constant 1 : index
    %c0_29 = arith.constant 0 : index
    %c0_30 = arith.constant 0 : index
    %23 = vector.load %arg2[%c1_28, %c0_29, %c0_30] : memref<9x128x128xbf16, #tpu.memory_space<vmem>>, vector<1x128x128xbf16>
    %24 = vector.shape_cast %23 : vector<1x128x128xbf16> to vector<128x128xbf16>
    %cst_31 = arith.constant dense<0.000000e+00> : vector<256x128xf32>
    %25 = tpu.matmul %21, %24, %cst_31 {dimension_numbers = #tpu.dot_dimension_numbers<[1], [0], [0], [1], [0, 0, 1, 1], [], []>} : vector<256x128xbf16>, vector<128x128xbf16>, vector<256x128xf32> -> vector<256x128xf32>
    %26 = arith.addf %22, %25 : vector<256x128xf32>
    %c0_32 = arith.constant 0 : index
    %c0_33 = arith.constant 0 : index
    %27 = vector.load %arg6[%c0_32, %c0_33] : memref<256x128xf32, #tpu.memory_space<vmem>>, vector<256x128xf32>
    tpu.vector_store %arg6[%c0_32, %c0_33], %26 {strides = array<i32>} : memref<256x128xf32, #tpu.memory_space<vmem>>, vector<256x128xf32>,
    %c0_34 = arith.constant 0 : index
    %c2 = arith.constant 2 : index
    %c0_35 = arith.constant 0 : index
    %28 = vector.load %arg5[%c0_34, %c2, %c0_35] : memref<18x18x128xf32, #tpu.memory_space<vmem>>, vector<16x16x128xf32>
    %29 = vector.shape_cast %28 : vector<16x16x128xf32> to vector<256x128xf32>
    %30 = arith.truncf %29 : vector<256x128xf32> to vector<256x128xbf16>
    %c0_36 = arith.constant 0 : index
    %c0_37 = arith.constant 0 : index
    %31 = vector.load %arg6[%c0_36, %c0_37] : memref<256x128xf32, #tpu.memory_space<vmem>>, vector<256x128xf32>
    %c2_38 = arith.constant 2 : index
    %c0_39 = arith.constant 0 : index
    %c0_40 = arith.constant 0 : index
    %32 = vector.load %arg2[%c2_38, %c0_39, %c0_40] : memref<9x128x128xbf16, #tpu.memory_space<vmem>>, vector<1x128x128xbf16>
    %33 = vector.shape_cast %32 : vector<1x128x128xbf16> to vector<128x128xbf16>
    %cst_41 = arith.constant dense<0.000000e+00> : vector<256x128xf32>
    %34 = tpu.matmul %30, %33, %cst_41 {dimension_numbers = #tpu.dot_dimension_numbers<[1], [0], [0], [1], [0, 0, 1, 1], [], []>} : vector<256x128xbf16>, vector<128x128xbf16>, vector<256x128xf32> -> vector<256x128xf32>
    %35 = arith.addf %31, %34 : vector<256x128xf32>
    %c0_42 = arith.constant 0 : index
    %c0_43 = arith.constant 0 : index
    %36 = vector.load %arg6[%c0_42, %c0_43] : memref<256x128xf32, #tpu.memory_space<vmem>>, vector<256x128xf32>
    tpu.vector_store %arg6[%c0_42, %c0_43], %35 {strides = array<i32>} : memref<256x128xf32, #tpu.memory_space<vmem>>, vector<256x128xf32>,
    %c1_44 = arith.constant 1 : index
    %c0_45 = arith.constant 0 : index
    %c0_46 = arith.constant 0 : index
    %37 = vector.load %arg5[%c1_44, %c0_45, %c0_46] : memref<18x18x128xf32, #tpu.memory_space<vmem>>, vector<16x16x128xf32>
    %38 = vector.shape_cast %37 : vector<16x16x128xf32> to vector<256x128xf32>
    %39 = arith.truncf %38 : vector<256x128xf32> to vector<256x128xbf16>
    %c0_47 = arith.constant 0 : index
    %c0_48 = arith.constant 0 : index
    %40 = vector.load %arg6[%c0_47, %c0_48] : memref<256x128xf32, #tpu.memory_space<vmem>>, vector<256x128xf32>
    %c3 = arith.constant 3 : index
    %c0_49 = arith.constant 0 : index
    %c0_50 = arith.constant 0 : index
    %41 = vector.load %arg2[%c3, %c0_49, %c0_50] : memref<9x128x128xbf16, #tpu.memory_space<vmem>>, vector<1x128x128xbf16>
    %42 = vector.shape_cast %41 : vector<1x128x128xbf16> to vector<128x128xbf16>
    %cst_51 = arith.constant dense<0.000000e+00> : vector<256x128xf32>
    %43 = tpu.matmul %39, %42, %cst_51 {dimension_numbers = #tpu.dot_dimension_numbers<[1], [0], [0], [1], [0, 0, 1, 1], [], []>} : vector<256x128xbf16>, vector<128x128xbf16>, vector<256x128xf32> -> vector<256x128xf32>
    %44 = arith.addf %40, %43 : vector<256x128xf32>
    %c0_52 = arith.constant 0 : index
    %c0_53 = arith.constant 0 : index
    %45 = vector.load %arg6[%c0_52, %c0_53] : memref<256x128xf32, #tpu.memory_space<vmem>>, vector<256x128xf32>
    tpu.vector_store %arg6[%c0_52, %c0_53], %44 {strides = array<i32>} : memref<256x128xf32, #tpu.memory_space<vmem>>, vector<256x128xf32>,
    %c1_54 = arith.constant 1 : index
    %c1_55 = arith.constant 1 : index
    %c0_56 = arith.constant 0 : index
    %46 = vector.load %arg5[%c1_54, %c1_55, %c0_56] : memref<18x18x128xf32, #tpu.memory_space<vmem>>, vector<16x16x128xf32>
    %47 = vector.shape_cast %46 : vector<16x16x128xf32> to vector<256x128xf32>
    %48 = arith.truncf %47 : vector<256x128xf32> to vector<256x128xbf16>
    %c0_57 = arith.constant 0 : index
    %c0_58 = arith.constant 0 : index
    %49 = vector.load %arg6[%c0_57, %c0_58] : memref<256x128xf32, #tpu.memory_space<vmem>>, vector<256x128xf32>
    %c4 = arith.constant 4 : index
    %c0_59 = arith.constant 0 : index
    %c0_60 = arith.constant 0 : index
    %50 = vector.load %arg2[%c4, %c0_59, %c0_60] : memref<9x128x128xbf16, #tpu.memory_space<vmem>>, vector<1x128x128xbf16>
    %51 = vector.shape_cast %50 : vector<1x128x128xbf16> to vector<128x128xbf16>
    %cst_61 = arith.constant dense<0.000000e+00> : vector<256x128xf32>
    %52 = tpu.matmul %48, %51, %cst_61 {dimension_numbers = #tpu.dot_dimension_numbers<[1], [0], [0], [1], [0, 0, 1, 1], [], []>} : vector<256x128xbf16>, vector<128x128xbf16>, vector<256x128xf32> -> vector<256x128xf32>
    %53 = arith.addf %49, %52 : vector<256x128xf32>
    %c0_62 = arith.constant 0 : index
    %c0_63 = arith.constant 0 : index
    %54 = vector.load %arg6[%c0_62, %c0_63] : memref<256x128xf32, #tpu.memory_space<vmem>>, vector<256x128xf32>
    tpu.vector_store %arg6[%c0_62, %c0_63], %53 {strides = array<i32>} : memref<256x128xf32, #tpu.memory_space<vmem>>, vector<256x128xf32>,
    %c1_64 = arith.constant 1 : index
    %c2_65 = arith.constant 2 : index
    %c0_66 = arith.constant 0 : index
    %55 = vector.load %arg5[%c1_64, %c2_65, %c0_66] : memref<18x18x128xf32, #tpu.memory_space<vmem>>, vector<16x16x128xf32>
    %56 = vector.shape_cast %55 : vector<16x16x128xf32> to vector<256x128xf32>
    %57 = arith.truncf %56 : vector<256x128xf32> to vector<256x128xbf16>
    %c0_67 = arith.constant 0 : index
    %c0_68 = arith.constant 0 : index
    %58 = vector.load %arg6[%c0_67, %c0_68] : memref<256x128xf32, #tpu.memory_space<vmem>>, vector<256x128xf32>
    %c5 = arith.constant 5 : index
    %c0_69 = arith.constant 0 : index
    %c0_70 = arith.constant 0 : index
    %59 = vector.load %arg2[%c5, %c0_69, %c0_70] : memref<9x128x128xbf16, #tpu.memory_space<vmem>>, vector<1x128x128xbf16>
    %60 = vector.shape_cast %59 : vector<1x128x128xbf16> to vector<128x128xbf16>
    %cst_71 = arith.constant dense<0.000000e+00> : vector<256x128xf32>
    %61 = tpu.matmul %57, %60, %cst_71 {dimension_numbers = #tpu.dot_dimension_numbers<[1], [0], [0], [1], [0, 0, 1, 1], [], []>} : vector<256x128xbf16>, vector<128x128xbf16>, vector<256x128xf32> -> vector<256x128xf32>
    %62 = arith.addf %58, %61 : vector<256x128xf32>
    %c0_72 = arith.constant 0 : index
    %c0_73 = arith.constant 0 : index
    %63 = vector.load %arg6[%c0_72, %c0_73] : memref<256x128xf32, #tpu.memory_space<vmem>>, vector<256x128xf32>
    tpu.vector_store %arg6[%c0_72, %c0_73], %62 {strides = array<i32>} : memref<256x128xf32, #tpu.memory_space<vmem>>, vector<256x128xf32>,
    %c2_74 = arith.constant 2 : index
    %c0_75 = arith.constant 0 : index
    %c0_76 = arith.constant 0 : index
    %64 = vector.load %arg5[%c2_74, %c0_75, %c0_76] : memref<18x18x128xf32, #tpu.memory_space<vmem>>, vector<16x16x128xf32>
    %65 = vector.shape_cast %64 : vector<16x16x128xf32> to vector<256x128xf32>
    %66 = arith.truncf %65 : vector<256x128xf32> to vector<256x128xbf16>
    %c0_77 = arith.constant 0 : index
    %c0_78 = arith.constant 0 : index
    %67 = vector.load %arg6[%c0_77, %c0_78] : memref<256x128xf32, #tpu.memory_space<vmem>>, vector<256x128xf32>
    %c6 = arith.constant 6 : index
    %c0_79 = arith.constant 0 : index
    %c0_80 = arith.constant 0 : index
    %68 = vector.load %arg2[%c6, %c0_79, %c0_80] : memref<9x128x128xbf16, #tpu.memory_space<vmem>>, vector<1x128x128xbf16>
    %69 = vector.shape_cast %68 : vector<1x128x128xbf16> to vector<128x128xbf16>
    %cst_81 = arith.constant dense<0.000000e+00> : vector<256x128xf32>
    %70 = tpu.matmul %66, %69, %cst_81 {dimension_numbers = #tpu.dot_dimension_numbers<[1], [0], [0], [1], [0, 0, 1, 1], [], []>} : vector<256x128xbf16>, vector<128x128xbf16>, vector<256x128xf32> -> vector<256x128xf32>
    %71 = arith.addf %67, %70 : vector<256x128xf32>
    %c0_82 = arith.constant 0 : index
    %c0_83 = arith.constant 0 : index
    %72 = vector.load %arg6[%c0_82, %c0_83] : memref<256x128xf32, #tpu.memory_space<vmem>>, vector<256x128xf32>
    tpu.vector_store %arg6[%c0_82, %c0_83], %71 {strides = array<i32>} : memref<256x128xf32, #tpu.memory_space<vmem>>, vector<256x128xf32>,
    %c2_84 = arith.constant 2 : index
    %c1_85 = arith.constant 1 : index
    %c0_86 = arith.constant 0 : index
    %73 = vector.load %arg5[%c2_84, %c1_85, %c0_86] : memref<18x18x128xf32, #tpu.memory_space<vmem>>, vector<16x16x128xf32>
    %74 = vector.shape_cast %73 : vector<16x16x128xf32> to vector<256x128xf32>
    %75 = arith.truncf %74 : vector<256x128xf32> to vector<256x128xbf16>
    %c0_87 = arith.constant 0 : index
    %c0_88 = arith.constant 0 : index
    %76 = vector.load %arg6[%c0_87, %c0_88] : memref<256x128xf32, #tpu.memory_space<vmem>>, vector<256x128xf32>
    %c7 = arith.constant 7 : index
    %c0_89 = arith.constant 0 : index
    %c0_90 = arith.constant 0 : index
    %77 = vector.load %arg2[%c7, %c0_89, %c0_90] : memref<9x128x128xbf16, #tpu.memory_space<vmem>>, vector<1x128x128xbf16>
    %78 = vector.shape_cast %77 : vector<1x128x128xbf16> to vector<128x128xbf16>
    %cst_91 = arith.constant dense<0.000000e+00> : vector<256x128xf32>
    %79 = tpu.matmul %75, %78, %cst_91 {dimension_numbers = #tpu.dot_dimension_numbers<[1], [0], [0], [1], [0, 0, 1, 1], [], []>} : vector<256x128xbf16>, vector<128x128xbf16>, vector<256x128xf32> -> vector<256x128xf32>
    %80 = arith.addf %76, %79 : vector<256x128xf32>
    %c0_92 = arith.constant 0 : index
    %c0_93 = arith.constant 0 : index
    %81 = vector.load %arg6[%c0_92, %c0_93] : memref<256x128xf32, #tpu.memory_space<vmem>>, vector<256x128xf32>
    tpu.vector_store %arg6[%c0_92, %c0_93], %80 {strides = array<i32>} : memref<256x128xf32, #tpu.memory_space<vmem>>, vector<256x128xf32>,
    %c2_94 = arith.constant 2 : index
    %c2_95 = arith.constant 2 : index
    %c0_96 = arith.constant 0 : index
    %82 = vector.load %arg5[%c2_94, %c2_95, %c0_96] : memref<18x18x128xf32, #tpu.memory_space<vmem>>, vector<16x16x128xf32>
    %83 = vector.shape_cast %82 : vector<16x16x128xf32> to vector<256x128xf32>
    %84 = arith.truncf %83 : vector<256x128xf32> to vector<256x128xbf16>
    %c0_97 = arith.constant 0 : index
    %c0_98 = arith.constant 0 : index
    %85 = vector.load %arg6[%c0_97, %c0_98] : memref<256x128xf32, #tpu.memory_space<vmem>>, vector<256x128xf32>
    %c8 = arith.constant 8 : index
    %c0_99 = arith.constant 0 : index
    %c0_100 = arith.constant 0 : index
    %86 = vector.load %arg2[%c8, %c0_99, %c0_100] : memref<9x128x128xbf16, #tpu.memory_space<vmem>>, vector<1x128x128xbf16>
    %87 = vector.shape_cast %86 : vector<1x128x128xbf16> to vector<128x128xbf16>
    %cst_101 = arith.constant dense<0.000000e+00> : vector<256x128xf32>
    %88 = tpu.matmul %84, %87, %cst_101 {dimension_numbers = #tpu.dot_dimension_numbers<[1], [0], [0], [1], [0, 0, 1, 1], [], []>} : vector<256x128xbf16>, vector<128x128xbf16>, vector<256x128xf32> -> vector<256x128xf32>
    %89 = arith.addf %85, %88 : vector<256x128xf32>
    %c0_102 = arith.constant 0 : index
    %c0_103 = arith.constant 0 : index
    %90 = vector.load %arg6[%c0_102, %c0_103] : memref<256x128xf32, #tpu.memory_space<vmem>>, vector<256x128xf32>
    tpu.vector_store %arg6[%c0_102, %c0_103], %89 {strides = array<i32>} : memref<256x128xf32, #tpu.memory_space<vmem>>, vector<256x128xf32>,
    %c0_104 = arith.constant 0 : index
    %c0_105 = arith.constant 0 : index
    %91 = vector.load %arg6[%c0_104, %c0_105] : memref<256x128xf32, #tpu.memory_space<vmem>>, vector<256x128xf32>
    %cst_106 = arith.constant 0.000000e+00 : f32
    %92 = vector.broadcast %cst_106 : f32 to vector<256x128xf32>
    %93 = arith.subf %92, %91 : vector<256x128xf32>
    %94 = math.exp %93 : vector<256x128xf32>
    %cst_107 = arith.constant 1.000000e+00 : f32
    %95 = vector.broadcast %cst_107 : f32 to vector<256x128xf32>
    %96 = arith.addf %95, %94 : vector<256x128xf32>
    %97 = tpu.reciprocal %96 : vector<256x128xf32> -> vector<256x128xf32>
    %98 = arith.mulf %91, %97 : vector<256x128xf32>
    %99 = vector.shape_cast %98 : vector<256x128xf32> to vector<16x16x128xf32>
    %c0_108 = arith.constant 0 : index
    %c0_109 = arith.constant 0 : index
    %c0_110 = arith.constant 0 : index
    %c0_111 = arith.constant 0 : index
    %100 = vector.load %arg4[%c0_108, %c0_109, %c0_110, %c0_111] : memref<1x16x16x128xf32, #tpu.memory_space<vmem>>, vector<1x16x16x128xf32>
    %101 = vector.shape_cast %100 : vector<1x16x16x128xf32> to vector<16x16x128xf32>
    %102 = vector.shape_cast %99 : vector<16x16x128xf32> to vector<1x16x16x128xf32>
    tpu.vector_store %arg4[%c0_108, %c0_109, %c0_110, %c0_111], %102 {strides = array<i32>} : memref<1x16x16x128xf32, #tpu.memory_space<vmem>>, vector<1x16x16x128xf32>,
    return
  }
  func.func @transform_0(%arg0: i32) -> (i32, i32, i32, i32) {
    %c0_i32 = arith.constant 0 : i32
    %c0_i32_0 = arith.constant 0 : i32
    %c0_i32_1 = arith.constant 0 : i32
    %c0_i32_2 = arith.constant 0 : i32
    return %arg0, %c0_i32, %c0_i32_0, %c0_i32_1 : i32, i32, i32, i32
  }
  func.func @transform_1(%arg0: i32) -> (i32, i32, i32) {
    %c0_i32 = arith.constant 0 : i32
    %c0_i32_0 = arith.constant 0 : i32
    %c0_i32_1 = arith.constant 0 : i32
    %c0_i32_2 = arith.constant 0 : i32
    return %c0_i32, %c0_i32_0, %c0_i32_1 : i32, i32, i32
  }
  func.func @transform_2(%arg0: i32) -> (i32, i32) {
    %c0_i32 = arith.constant 0 : i32
    %c0_i32_0 = arith.constant 0 : i32
    %c0_i32_1 = arith.constant 0 : i32
    return %c0_i32, %c0_i32_0 : i32, i32
  }
  func.func @transform_3(%arg0: i32) -> (i32, i32, i32, i32) {
    %c0_i32 = arith.constant 0 : i32
    %c0_i32_0 = arith.constant 0 : i32
    %c0_i32_1 = arith.constant 0 : i32
    %c0_i32_2 = arith.constant 0 : i32
    return %arg0, %c0_i32, %c0_i32_0, %c0_i32_1 : i32, i32, i32, i32
  }
}

</mosaic_0001>

<bundles_post_ra>
// kernel: tile.13
= control target key start
LH: loop header
LB: loop body
LE: loop exit
PB: predicated region body
PF: predicated region fallthrough
CT: control target
= control target key end

     0   :  { %s28_s0 = inlined_call_operand.vmem [shape: f32[8], index: 0, kind: input, shape index: {}]   ;;  %s29_s1 = inlined_call_operand.vmem [shape: f32[16,8], index: 1, kind: output, shape index: {}]  }
   0x1   :  { %v4_v0 = vld [vmem:[%s28_s0] ss:$0 sm:$0xff] }
   0x2   :  { %5 = vst [vmem:[%s29_s1] sm:$0xff] %v4_v0  ;;  %8 = vst [vmem:[%s29_s1 + $0x8] sm:$0xff] %v4_v0 }

// kernel: tile.14
= control target key start
LH: loop header
LB: loop body
LE: loop exit
PB: predicated region body
PF: predicated region fallthrough
CT: control target
= control target key end

     0   :  { %s131_s10 = smov 120   ;;  %s132_s11 = smov 104   ;;  %vm3_vm0 = vcmask 64512   ;;  %vm9_vm1 = vcmask 1048512   ;;  %vm15_vm2 = vcmask 982912   ;;  %vm21_vm3 = vcmask 917312   ;;  %s207_s0 = inlined_call_operand.vmem [shape: f32[16,8], index: 0, kind: input, shape index: {}]   ;;  %s208_s1 = inlined_call_operand.vmem [shape: f32[1,128], index: 1, kind: output, shape index: {}]  }
   0x1   :  { %v101_v0 = vld [vmem:[%s207_s0 + $0xf] sm:$0x1]   ;;  %v103_v1 = vld [vmem:[%s207_s0 + $0xd] sm:$0x1]   ;;  %v102_v2 = vld [vmem:[%s207_s0 + $0xe] sm:$0x1]  }
   0x2   :  { %7 = vrot.lane.b32.xlu0 %v101_v0, %s131_s10  ;;  %19 = vrot.lane.b32.xlu1 %v103_v1, %s132_s11  ;;  %v104_v3 = vld [vmem:[%s207_s0 + $0xc] sm:$0x1]   ;;  %s133_s16 = smov 112   ;;  %s134_s17 = smov 96   ;;  %v105_v4 = vld [vmem:[%s207_s0 + $0xb] sm:$0x1]  }
   0x3   :  { %v106_v5 = vld [vmem:[%s207_s0 + $0xa] sm:$0x1]   ;;  %v2_v6 = vld [vmem:[%s207_s0] sm:$0x1]   ;;  %s135_s24 = smov 88   ;;  %s136_s25 = smov 80  }
   0x4   :  { %4 = vst.msk [vmem:[#allocation0] sm:$0x1] %vm3_vm0, %v2_v6   ;;  %v107_v7 = vld [vmem:[%s207_s0 + $0x9] sm:$0x1]   ;;  %v108_v8 = vld [vmem:[%s207_s0 + $0x8] sm:$0x1]  }
   0x5   :  { %s137_s30 = smov 72   ;;  %s138_s2 = smov 64   ;;  %v109_v9 = vld [vmem:[%s207_s0 + $0x7] sm:$0x1]   ;;  %v110_v10 = vld [vmem:[%s207_s0 + $0x6] sm:$0x1]  }
   0x6   :  { %13 = vrot.lane.b32.xlu0 %v102_v2, %s133_s16  ;;  %25 = vrot.lane.b32.xlu1 %v104_v3, %s134_s17  ;;  %s139_s7 = smov 56   ;;  %s140_s8 = smov 48   ;;  %v111_v11 = vld [vmem:[%s207_s0 + $0x5] sm:$0x1]   ;;  %v112_v12 = vld [vmem:[%s207_s0 + $0x4] sm:$0x1]  }
   0x7   :  { %s141_s13 = smov 40   ;;  %s142_s14 = smov 32   ;;  %v113_v13 = vld [vmem:[%s207_s0 + $0x3] sm:$0x1]   ;;  %v114_v14 = vld [vmem:[%s207_s0 + $0x2] sm:$0x1]  }
   0x8   :  { %s143_s19 = smov 24   ;;  %s144_s20 = smov 16   ;;  %v115_v15 = vld [vmem:[%s207_s0 + $0x1] sm:$0x1]   ;;  %vm27_vm4 = vcmask 851712   ;;  %vm33_vm5 = vcmask 786112  }
   0x9   :  { %s145_s0 = smov 8   ;;  %vm39_vm6 = vcmask 720512   ;;  %vm45_vm7 = vcmask 654912   ;;  %vm51_vm8 = vcmask 589312   ;;  %vm57_vm9 = vcmask 523712  }
   0xa   :  { %31 = vrot.lane.b32.xlu0 %v105_v4, %s135_s24  ;;  %37 = vrot.lane.b32.xlu1 %v106_v5, %s136_s25  ;;  %vm63_vm10 = vcmask 458112   ;;  %vm69_vm11 = vcmask 392512   ;;  %vm75_vm12 = vcmask 326912   ;;  %vm81_vm13 = vcmask 261312  }
   0xb   :  { %vm87_vm14 = vcmask 195712   ;;  %vm93_vm15 = vcmask 130112  }
   0xe   :  { %43 = vrot.lane.b32.xlu0 %v107_v7, %s137_s30  ;;  %49 = vrot.lane.b32.xlu1 %v108_v8, %s138_s2 }
  0x12   :  { %55 = vrot.lane.b32.xlu0 %v109_v9, %s139_s7  ;;  %61 = vrot.lane.b32.xlu1 %v110_v10, %s140_s8 }
  0x16   :  { %67 = vrot.lane.b32.xlu0 %v111_v11, %s141_s13  ;;  %73 = vrot.lane.b32.xlu1 %v112_v12, %s142_s14 }
  0x1a   :  { %79 = vrot.lane.b32.xlu0 %v113_v13, %s143_s19  ;;  %85 = vrot.lane.b32.xlu1 %v114_v14, %s144_s20 }
  0x1e   :  { %91 = vrot.lane.b32.xlu0 %v115_v15, %s145_s0 }
  0x74   :  { %v8_v16 = vpop.permute.xlu0 %7   ;;  %v20_v17 = vpop.permute.xlu1 %19  }
  0x75   :  { %10 = vst.msk [vmem:[#allocation0] sm:$0x1] %vm9_vm1, %v8_v16  }
  0x78   :  { %v14_v18 = vpop.permute.xlu0 %13   ;;  %v26_v19 = vpop.permute.xlu1 %25  }
  0x79   :  { %16 = vst.msk [vmem:[#allocation0] sm:$0x1] %vm15_vm2, %v14_v18  }
  0x7a   :  { %22 = vst.msk [vmem:[#allocation0] sm:$0x1] %vm21_vm3, %v20_v17  }
  0x7b   :  { %28 = vst.msk [vmem:[#allocation0] sm:$0x1] %vm27_vm4, %v26_v19  }
  0x7c   :  { %v32_v20 = vpop.permute.xlu0 %31   ;;  %v38_v21 = vpop.permute.xlu1 %37  }
  0x7d   :  { %34 = vst.msk [vmem:[#allocation0] sm:$0x1] %vm33_vm5, %v32_v20  }
  0x7e   :  { %40 = vst.msk [vmem:[#allocation0] sm:$0x1] %vm39_vm6, %v38_v21  }
  0x80   :  { %v44_v22 = vpop.permute.xlu0 %43   ;;  %v50_v23 = vpop.permute.xlu1 %49  }
  0x81   :  { %46 = vst.msk [vmem:[#allocation0] sm:$0x1] %vm45_vm7, %v44_v22  }
  0x82   :  { %52 = vst.msk [vmem:[#allocation0] sm:$0x1] %vm51_vm8, %v50_v23  }
  0x84   :  { %v56_v24 = vpop.permute.xlu0 %55   ;;  %v62_v25 = vpop.permute.xlu1 %61  }
  0x85   :  { %58 = vst.msk [vmem:[#allocation0] sm:$0x1] %vm57_vm9, %v56_v24  }
  0x86   :  { %64 = vst.msk [vmem:[#allocation0] sm:$0x1] %vm63_vm10, %v62_v25  }
  0x88   :  { %v68_v26 = vpop.permute.xlu0 %67   ;;  %v74_v27 = vpop.permute.xlu1 %73  }
  0x89   :  { %70 = vst.msk [vmem:[#allocation0] sm:$0x1] %vm69_vm11, %v68_v26  }
  0x8a   :  { %76 = vst.msk [vmem:[#allocation0] sm:$0x1] %vm75_vm12, %v74_v27  }
  0x8c   :  { %v80_v28 = vpop.permute.xlu0 %79   ;;  %v86_v29 = vpop.permute.xlu1 %85  }
  0x8d   :  { %82 = vst.msk [vmem:[#allocation0] sm:$0x1] %vm81_vm13, %v80_v28  }
  0x8e   :  { %88 = vst.msk [vmem:[#allocation0] sm:$0x1] %vm87_vm14, %v86_v29  }
  0x90   :  { %v92_v30 = vpop.permute.xlu0 %91  }
  0x91   :  { %94 = vst.msk [vmem:[#allocation0] sm:$0x1] %vm93_vm15, %v92_v30  }
  0x98   :  { %v98_v31 = vld [vmem:[#allocation0] sm:$0x1] }
  0x99   :  { %100 = vst [vmem:[%s208_s1] sm:$0x1] %v98_v31 }

// kernel: sparse_subdivide_block3d.2
= control target key start
LH: loop header
LB: loop body
LE: loop exit
PB: predicated region body
PF: predicated region fallthrough
CT: control target
= control target key end

     0   :  { %s2005_s12 = smov 0   ;;  %s2271_s0 = inlined_call_operand.vmem [shape: f32[2,8,8,32], index: 0, kind: input, shape index: {}]   ;;  %s2272_s1 = inlined_call_operand.vmem [shape: bf16[9,32,128], index: 1, kind: input, shape index: {}]   ;;  %s2273_s2 = inlined_call_operand.vmem [shape: f32[1,128], index: 2, kind: input, shape index: {}]   ;;  %s2274_s3 = inlined_call_operand.vmem [shape: bf16[2,8,2,8,256], index: 3, kind: output, shape index: {}]  }
   0x1 LB: > { %s1563_s13 = sadd.s32 4294967295, %s1982_s12   ;;  %p1567_p0 = scmp.ge.s32.totalorder %s1982_s12, 1  ;;  %s1982_s12 = sphi %s2005_s12, %s13_s12  }
   0x2   : > { %p137_p1 = scmp.lt.s32.totalorder %s1982_s12, 3 }
   0x4   : > { %p138_p2 = pnand %p1567_p0, %p137_p1 }
   0x5   : > { %v1926_v0 = vld [vmem:[%s2272_s1] sm:$0xff] (!%p138_p2)   ;;  %p161_p3 = scmp.lt.s32.totalorder (!%p138_p2), %s1563_s13, 1  ;;  %vm172_vm0 = vcmask (!%p138_p2), 261120   ;;  %v1928_v2 = vld [vmem:[%s2272_s1 + $0x8] sm:$0xff] (!%p138_p2)   ;;  %v1984_v4 = vmov (!%p138_p2), 0.0   ;;  %vm174_vm1 = vcmask (!%p138_p2), 254976  }
   0x6   : > { %141 = sbr.rel (%p138_p2) target bundleno = 349 (0x15d), region = 32  ;;  %v2019_v1 = vld [vmem:[%s2272_s1 + $0x40] sm:$0xff] (!%p138_p2)   ;;  %1733 = vmatprep.subr.bf16.mxu1 (!%p138_p2), %v1926_v0  ;;  %v2030_v3 = vld [vmem:[%s2272_s1 + $0x48] sm:$0xff] (!%p138_p2)   ;;  %173 = vst.msk [vmem:[#allocation2] sm:$0xff] (!%p138_p2), %vm172_vm0, %v1984_v4  ;;  %176 = vst.msk [vmem:[#allocation2 + $0x10] sm:$0xff] (!%p138_p2), %vm172_vm0, %v1984_v4 }
   0x7   : > { %1734 = vmatpush3.bf16.msra.mxu1 (!%p138_p2), %v1926_v0  ;;  %1781 = vmatprep.subr.bf16.mxu0 (!%p138_p2), %v2019_v1  ;;  %178 = vst.msk [vmem:[#allocation2 + $0x20] sm:$0xff] (!%p138_p2), %vm172_vm0, %v1984_v4  ;;  %180 = vst.msk [vmem:[#allocation2 + $0x30] sm:$0xff] (!%p138_p2), %vm172_vm0, %v1984_v4  ;;  %v1930_v5 = vld [vmem:[%s2272_s1 + $0x10] sm:$0xff] (!%p138_p2)   ;;  %v1932_v24 = vld [vmem:[%s2272_s1 + $0x18] sm:$0xff] (!%p138_p2)  }
   0x8   : > { %1782 = vmatpush3.bf16.msra.mxu0 (!%p138_p2), %v2019_v1  ;;  %1735 = vmatprep.subr.bf16.mxu1 (!%p138_p2), %v1928_v2  ;;  %182 = vst.msk [vmem:[#allocation2 + $0x40] sm:$0xff] (!%p138_p2), %vm172_vm0, %v1984_v4  ;;  %184 = vst.msk [vmem:[#allocation2 + $0x50] sm:$0xff] (!%p138_p2), %vm172_vm0, %v1984_v4  ;;  %v1931_v10 = vld [vmem:[%s2272_s1 + $0x50] sm:$0xff] (!%p138_p2)   ;;  %v1933_v31 = vld [vmem:[%s2272_s1 + $0x58] sm:$0xff] (!%p138_p2)  }
   0x9   : > { %186 = vst.msk [vmem:[#allocation2 + $0x60] sm:$0xff] (!%p138_p2), %vm172_vm0, %v1984_v4  ;;  %188 = vst.msk [vmem:[#allocation2 + $0x70] sm:$0xff] (!%p138_p2), %vm172_vm0, %v1984_v4  ;;  %1783 = vmatprep.subr.bf16.mxu0 (!%p138_p2), %v2030_v3  ;;  %v1935_v38 = vld [vmem:[%s2272_s1 + $0x20] sm:$0xff] (!%p138_p2)   ;;  %v1936_v49 = vld [vmem:[%s2272_s1 + $0x68] sm:$0xff] (!%p138_p2)  }
   0xa   : > { %190 = vst.msk [vmem:[#allocation2 + $0x80] sm:$0xff] (!%p138_p2), %vm172_vm0, %v1984_v4  ;;  %192 = vst.msk [vmem:[#allocation2 + $0x90] sm:$0xff] (!%p138_p2), %vm172_vm0, %v1984_v4  ;;  %v1934_v39 = vld [vmem:[%s2272_s1 + $0x60] sm:$0xff] (!%p138_p2)   ;;  %v1937_v54 = vld [vmem:[%s2272_s1 + $0x28] sm:$0xff] (!%p138_p2)  }
   0xb   : > { %177 = vst.msk [vmem:[#allocation2 + $0x18] sm:$0x3] (!%p138_p2), %vm174_vm1, %v1984_v4  ;;  %175 = vst.msk [vmem:[#allocation2 + $0x8] sm:$0x3] (!%p138_p2), %vm174_vm1, %v1984_v4  ;;  %1736 = vmatpush3.bf16.msra.mxu1 (!%p138_p2), %v1928_v2  ;;  %v1938_v55 = vld [vmem:[%s2272_s1 + $0x70] sm:$0xff] (!%p138_p2)   ;;  %v1940_v63 = vld [vmem:[%s2272_s1 + $0x78] sm:$0xff] (!%p138_p2)  }
   0xc   : > { %179 = vst.msk [vmem:[#allocation2 + $0x28] sm:$0x3] (!%p138_p2), %vm174_vm1, %v1984_v4  ;;  %181 = vst.msk [vmem:[#allocation2 + $0x38] sm:$0x3] (!%p138_p2), %vm174_vm1, %v1984_v4  ;;  %1784 = vmatpush3.bf16.msra.mxu0 (!%p138_p2), %v2030_v3  ;;  %1745 = vmatprep.subr.bf16.mxu1 (!%p138_p2), %v1930_v5  ;;  %v1939_v60 = vld [vmem:[%s2272_s1 + $0x30] sm:$0xff] (!%p138_p2)  }
   0xd   : > { %s2276_s13 = smov (!%p161_p3, %s1563_s13), 1  ;;  %183 = vst.msk [vmem:[#allocation2 + $0x48] sm:$0x3] %vm174_vm1, %v1984_v4  ;;  %185 = vst.msk [vmem:[#allocation2 + $0x58] sm:$0x3] %vm174_vm1, %v1984_v4  ;;  %1793 = vmatprep.subr.bf16.mxu0 %v1931_v10  ;;  %v226_v14 = vld [vmem:[#allocation2] sm:$0xff] }
   0xe   : > { %s1669_s22 = sshll.u32 %s2276_s13, 6  ;;  %187 = vst.msk [vmem:[#allocation2 + $0x68] sm:$0x3] %vm174_vm1, %v1984_v4  ;;  %189 = vst.msk [vmem:[#allocation2 + $0x78] sm:$0x3] %vm174_vm1, %v1984_v4  ;;  %s1670_s4 = sshll.u32 %s2276_s13, 7 }
   0xf   : > { %s2051_s27 = scalar_lea.vmem %s2271_s0, %s1669_s22  ;;  %191 = vst.msk [vmem:[#allocation2 + $0x88] sm:$0x3] %vm174_vm1, %v1984_v4  ;;  %193 = vst.msk [vmem:[#allocation2 + $0x98] sm:$0x3] %vm174_vm1, %v1984_v4  ;;  %s2243_s7 = scalar_lea.vmem %s2274_s3, %s1670_s4 }
  0x10   : > { %v194_v6 = vld [vmem:[%s2051_s27] sm:$0xff]  ;;  %v195_v7 = vld [vmem:[%s2051_s27 + $0x8] sm:$0xff]  ;;  %v196_v8 = vld [vmem:[%s2051_s27 + $0x10] sm:$0xff] }
  0x11   : > { %203 = vst.msk [vmem:[#allocation2 + $0x11] sm:$0xff] %vm172_vm0, %v194_v6  ;;  %204 = vst.msk [vmem:[#allocation2 + $0x21] sm:$0xff] %vm172_vm0, %v195_v7  ;;  %v197_v9 = vld [vmem:[%s2051_s27 + $0x18] sm:$0xff]  ;;  %v198_v11 = vld [vmem:[%s2051_s27 + $0x20] sm:$0xff] }
  0x12   : > { %205 = vst.msk [vmem:[#allocation2 + $0x31] sm:$0xff] %vm172_vm0, %v196_v8  ;;  %206 = vst.msk [vmem:[#allocation2 + $0x41] sm:$0xff] %vm172_vm0, %v197_v9  ;;  %v199_v12 = vld [vmem:[%s2051_s27 + $0x28] sm:$0xff]  ;;  %v200_v13 = vld [vmem:[%s2051_s27 + $0x30] sm:$0xff] }
  0x13   : > { %207 = vst.msk [vmem:[#allocation2 + $0x51] sm:$0xff] %vm172_vm0, %v198_v11  ;;  %208 = vst.msk [vmem:[#allocation2 + $0x61] sm:$0xff] %vm172_vm0, %v199_v12  ;;  %v201_v15 = vld [vmem:[%s2051_s27 + $0x38] sm:$0xff]  ;;  %v355_v37 = vld [vmem:[#allocation2 + $0x1] sm:$0xff] }
  0x14   : > { %209 = vst.msk [vmem:[#allocation2 + $0x71] sm:$0xff] %vm172_vm0, %v200_v13  ;;  %210 = vst.msk [vmem:[#allocation2 + $0x81] sm:$0xff] %vm172_vm0, %v201_v15  ;;  %v485_v59 = vld [vmem:[#allocation2 + $0x2] sm:$0xff]  ;;  %v1941_v6 = vld [vmem:[%s2272_s1 + $0x38] sm:$0xff]  }
  0x15   : > { %v1942_v7 = vld [vmem:[%s2272_s1 + $0x80] sm:$0xff]   ;;  %v1943_v11 = vld [vmem:[%s2272_s1 + $0x88] sm:$0xff]  }
  0x16   : > { %v1143_v15 = vld [vmem:[#allocation2 + $0x91] sm:$0xff] }
  0x18   : > { %v2082_v16 = vld [vmem:[#allocation2 + $0x10] sm:$0xff]  ;;  %v746_v18 = vld [vmem:[#allocation2 + $0x21] sm:$0xff] }
  0x19   : > { %v745_v17 = vld [vmem:[#allocation2 + $0x11] sm:$0xff]  ;;  %v234_v19 = vpack.c.bf16 %v2082_v16, %v226_v14  ;;  %v2086_v21 = vld [vmem:[#allocation2 + $0x20] sm:$0xff] }
  0x1a   : > { %v753_v20 = vpack.c.bf16 %v746_v18, %v745_v17  ;;  %v2088_v22 = vld [vmem:[#allocation2 + $0x30] sm:$0xff]  ;;  %v748_v26 = vld [vmem:[#allocation2 + $0x41] sm:$0xff]  ;;  %v363_v42 = vpack.c.bf16 %v745_v17, %v355_v37 }
  0x1b   : > { %v747_v23 = vld [vmem:[#allocation2 + $0x31] sm:$0xff]  ;;  %v2095_v25 = vpack.c.bf16 %v2088_v22, %v2086_v21  ;;  %v2097_v27 = vld [vmem:[#allocation2 + $0x40] sm:$0xff]  ;;  %1737 = vmatprep.mubr.msk.bf16.mxu1 %vm172_vm0, %v234_v19 }
  0x1c   : > { %v2099_v28 = vld [vmem:[#allocation2 + $0x50] sm:$0xff]  ;;  %1785 = vmatprep.mubr.msk.bf16.mxu0 %vm172_vm0, %v753_v20  ;;  %v754_v29 = vpack.c.bf16 %v748_v26, %v747_v23  ;;  %v876_v33 = vld [vmem:[#allocation2 + $0x22] sm:$0xff]  ;;  %v364_v50 = vpack.c.bf16 %v747_v23, %v746_v18  ;;  %v624_v12 = vpack.c.bf16 %v2097_v27, %v2088_v22 }
  0x1d   : > { %v2105_v30 = vpack.c.bf16 %v2099_v28, %v2097_v27  ;;  %v875_v32 = vld [vmem:[#allocation2 + $0x12] sm:$0xff]  ;;  %1738 = vmatmul.mubr.msk.bf16.vlgmr.msra.gmra.mrb[0].mxu1 %vm172_vm0, %v2095_v25  ;;  %v2113_v35 = vld [vmem:[#allocation2 + $0x60] sm:$0xff] }
  0x1e   : > { %v883_v34 = vpack.c.bf16 %v876_v33, %v875_v32  ;;  %1746 = vmatpush3.bf16.msra.mxu1 %v1930_v5  ;;  %1786 = vmatmul.mubr.msk.bf16.vlgmr.msra.gmra.mrb[0].mxu0 %vm172_vm0, %v754_v29  ;;  %v2115_v36 = vld [vmem:[#allocation2 + $0x70] sm:$0xff]  ;;  %v878_v43 = vld [vmem:[#allocation2 + $0x42] sm:$0xff]  ;;  %v493_v62 = vpack.c.bf16 %v875_v32, %v485_v59  ;;  %v625_v13 = vpack.c.bf16 %v2113_v35, %v2099_v28 }
  0x1f   : > { %1794 = vmatpush3.bf16.msra.mxu0 %v1931_v10  ;;  %1741 = vmatprep.mubr.msk.bf16.mxu1 %vm172_vm0, %v2105_v30  ;;  %v237_v40 = vpack.c.bf16 %v2115_v36, %v2113_v35  ;;  %v877_v41 = vld [vmem:[#allocation2 + $0x32] sm:$0xff]  ;;  %v880_v45 = vld [vmem:[#allocation2 + $0x62] sm:$0xff]  ;;  %v623_v10 = vpack.c.bf16 %v2086_v21, %v2082_v16 }
  0x20   : > { %1747 = vmatprep.subr.bf16.mxu1 %v1932_v24  ;;  %1795 = vmatprep.subr.bf16.mxu0 %v1933_v31  ;;  %v879_v44 = vld [vmem:[#allocation2 + $0x52] sm:$0xff]  ;;  %v884_v46 = vpack.c.bf16 %v878_v43, %v877_v41  ;;  %v2138_v53 = vld [vmem:[#allocation2 + $0x82] sm:$0xff]  ;;  %v494_v0 = vpack.c.bf16 %v877_v41, %v876_v33 }
  0x21   : > { %1797 = vmatprep.mubr.msk.bf16.mxu0 %vm172_vm0, %v883_v34  ;;  %v885_v47 = vpack.c.bf16 %v880_v45, %v879_v44  ;;  %v2130_v48 = vld [vmem:[#allocation2 + $0x51] sm:$0xff]  ;;  %v2149_v57 = vld [vmem:[#allocation2 + $0x61] sm:$0xff]  ;;  %v495_v2 = vpack.c.bf16 %v879_v44, %v878_v43 }
  0x22   : > { %1748 = vmatpush3.bf16.msra.mxu1 %v1932_v24  ;;  %v365_v51 = vpack.c.bf16 %v2130_v48, %v748_v26  ;;  %v881_v52 = vld [vmem:[#allocation2 + $0x72] sm:$0xff]  ;;  %v1012_v4 = vld [vmem:[#allocation2 + $0x80] sm:$0xff]  ;;  %v755_v18 = vpack.c.bf16 %v2149_v57, %v2130_v48 }
  0x23   : > { %1796 = vmatpush3.bf16.msra.mxu0 %v1933_v31  ;;  %1757 = vmatprep.subr.bf16.mxu1 %v1935_v38  ;;  %v886_v56 = vpack.c.bf16 %v2138_v53, %v881_v52  ;;  %v2151_v58 = vld [vmem:[#allocation2 + $0x71] sm:$0xff]  ;;  %v496_v9 = vpack.c.bf16 %v881_v52, %v880_v45  ;;  %v1142_v14 = vld [vmem:[#allocation2 + $0x81] sm:$0xff]  ;;  %v626_v17 = vpack.c.bf16 %v1012_v4, %v2115_v36  ;;  %v1572_v24 = vld [vmem:[%s2273_s2] ss:$0 sm:$0xff] }
  0x24   : > { %1805 = vmatprep.subr.bf16.mxu0 %v1934_v39  ;;  %v366_v61 = vpack.c.bf16 %v2151_v58, %v2149_v57  ;;  %v1013_v5 = vld [vmem:[#allocation2 + $0x90] sm:$0xff]  ;;  %v1147_v16 = vpack.c.bf16 %v1143_v15, %v1142_v14  ;;  %v756_v19 = vpack.c.bf16 %v1142_v14, %v2151_v58 }
  0x25   : > { %1742 = vmatmul.mubr.msk.bf16.gmra.mrb[4].mxu1 %vm172_vm0, %v237_v40  ;;  %v1017_v8 = vpack.c.bf16 %v1013_v5, %v1012_v4 }
  0x26   : > { %1749 = vmatprep.mubr.msk.bf16.mxu1 %vm172_vm0, %v363_v42 }
  0x2a   : > { %1798 = vmatmul.mubr.msk.bf16.vlgmr.msra.gmra.mrb[0].mxu0 %vm172_vm0, %v884_v46 }
  0x2b   : > { %1806 = vmatpush3.bf16.msra.mxu0 %v1934_v39  ;;  %1801 = vmatprep.mubr.msk.bf16.mxu0 %vm172_vm0, %v885_v47 }
  0x2c   : > { %1807 = vmatprep.subr.bf16.mxu0 %v1936_v49 }
  0x2d   : > { %1750 = vmatmul.mubr.msk.bf16.vlgmr.msra.gmra.mrb[0].mxu1 %vm172_vm0, %v364_v50 }
  0x2e   : > { %1758 = vmatpush3.bf16.msra.mxu1 %v1935_v38  ;;  %1753 = vmatprep.mubr.msk.bf16.mxu1 %vm172_vm0, %v365_v51 }
  0x2f   : > { %1808 = vmatpush3.bf16.msra.mxu0 %v1936_v49  ;;  %1759 = vmatprep.subr.bf16.mxu1 %v1937_v54 }
  0x30   : > { %1817 = vmatprep.subr.bf16.mxu0 %v1938_v55 }
  0x32   : > { %1802 = vmatmul.mubr.msk.bf16.gmra.mrb[4].mxu0 %vm172_vm0, %v886_v56  ;;  %1760 = vmatpush3.bf16.msra.mxu1 %v1937_v54 }
  0x33   : > { %1809 = vmatprep.mubr.msk.bf16.mxu0 %vm172_vm0, %v2095_v25  ;;  %1769 = vmatprep.subr.bf16.mxu1 %v1939_v60 }
  0x35   : > { %1754 = vmatmul.mubr.msk.bf16.gmra.mrb[4].mxu1 %vm172_vm0, %v366_v61 }
  0x36   : > { %1761 = vmatprep.mubr.msk.bf16.mxu1 %vm172_vm0, %v493_v62 }
  0x3a   : > { %1810 = vmatmul.mubr.msk.bf16.vlgmr.msra.gmra.mrb[0].mxu0 %vm172_vm0, %v2105_v30 }
  0x3b   : > { %1818 = vmatpush3.bf16.msra.mxu0 %v1938_v55  ;;  %1813 = vmatprep.mubr.msk.bf16.mxu0 %vm172_vm0, %v237_v40 }
  0x3c   : > { %1819 = vmatprep.subr.bf16.mxu0 %v1940_v63 }
  0x3d   : > { %1762 = vmatmul.mubr.msk.bf16.vlgmr.msra.gmra.mrb[0].mxu1 %vm172_vm0, %v494_v0 }
  0x3e   : > { %1770 = vmatpush3.bf16.msra.mxu1 %v1939_v60  ;;  %1765 = vmatprep.mubr.msk.bf16.mxu1 %vm172_vm0, %v495_v2 }
  0x3f   : > { %1820 = vmatpush3.bf16.msra.mxu0 %v1940_v63  ;;  %1771 = vmatprep.subr.bf16.mxu1 %v1941_v6 }
  0x40   : > { %1829 = vmatprep.subr.bf16.mxu0 %v1942_v7 }
  0x42   : > { %1814 = vmatmul.mubr.msk.bf16.gmra.mrb[4].mxu0 %vm172_vm0, %v1017_v8  ;;  %1772 = vmatpush3.bf16.msra.mxu1 %v1941_v6 }
  0x43   : > { %1821 = vmatprep.mubr.msk.bf16.mxu0 %vm172_vm0, %v364_v50  ;;  %1841 = vmatprep.subr.bf16.mxu1 %v2019_v1 }
  0x45   : > { %1766 = vmatmul.mubr.msk.bf16.gmra.mrb[4].mxu1 %vm172_vm0, %v496_v9 }
  0x46   : > { %1773 = vmatprep.mubr.msk.bf16.mxu1 %vm172_vm0, %v623_v10 }
  0x4a   : > { %1822 = vmatmul.mubr.msk.bf16.vlgmr.msra.gmra.mrb[0].mxu0 %vm172_vm0, %v365_v51 }
  0x4b   : > { %1830 = vmatpush3.bf16.msra.mxu0 %v1942_v7  ;;  %1825 = vmatprep.mubr.msk.bf16.mxu0 %vm172_vm0, %v366_v61 }
  0x4c   : > { %1831 = vmatprep.subr.bf16.mxu0 %v1943_v11 }
  0x4d   : > { %1774 = vmatmul.mubr.msk.bf16.vlgmr.msra.gmra.mrb[0].mxu1 %vm172_vm0, %v624_v12 }
  0x4e   : > { %1843 = vmatpush3.bf16.msra.mxu1 %v2019_v1  ;;  %1777 = vmatprep.mubr.msk.bf16.mxu1 %vm172_vm0, %v625_v13  ;;  %v1273_v1 = vld [vmem:[#allocation2 + $0x92] sm:$0xff] }
  0x4f   : > { %1832 = vmatpush3.bf16.msra.mxu0 %v1943_v11  ;;  %1842 = vmatprep.subr.bf16.mxu1 %v2030_v3  ;;  %v1277_v20 = vpack.c.bf16 %v1273_v1, %v2138_v53 }
  0x52   : > { %1826 = vmatmul.mubr.msk.bf16.gmra.mrb[4].mxu0 %vm172_vm0, %v1147_v16  ;;  %1844 = vmatpush3.bf16.msra.mxu1 %v2030_v3 }
  0x53   : > { %1833 = vmatprep.mubr.msk.bf16.mxu0 %vm172_vm0, %v494_v0 }
  0x55   : > { %1778 = vmatmul.mubr.msk.bf16.gmra.mrb[4].mxu1 %vm172_vm0, %v626_v17 }
  0x56   : > { %1789 = vmatprep.mubr.msk.bf16.mxu1 %vm172_vm0, %v755_v18 }
  0x5a   : > { %1834 = vmatmul.mubr.msk.bf16.vlgmr.msra.gmra.mrb[0].mxu0 %vm172_vm0, %v495_v2 }
  0x5b   : > { %1837 = vmatprep.mubr.msk.bf16.mxu0 %vm172_vm0, %v496_v9 }
  0x61   : > { %1790 = vmatmul.mubr.msk.bf16.vlgmr.msra.gmra.mrb[4].mxu1 %vm172_vm0, %v756_v19 }
  0x62   : > { %1838 = vmatmul.mubr.msk.bf16.gmra.mrb[4].mxu0 %vm172_vm0, %v1277_v20 }
 0x120   : > { %v1775_v3 = vpop.f32.mrb[0].mxu1 }
 0x121   : > { %v698_v21 = vpop.f32.mrb[1].mxu1  ;;  %v1845_v25 = vadd.f32 %v1775_v3, %v1572_v24 }
 0x122   : > { %v1776_v22 = vpop.f32.mrb[2].mxu1  ;;  %v1847_v26 = vadd.f32 %v1572_v24, %v698_v21 }
 0x123   : > { %v701_v23 = vpop.f32.mrb[3].mxu1  ;;  %v1849_v28 = vadd.f32 %v1776_v22, %v1572_v24 }
 0x124   : > { %v1851_v31 = vadd.f32 %v1572_v24, %v701_v23 }
 0x12d   : > { %v1835_v27 = vpop.f32.mrb[0].mxu0 }
 0x12e   : > { %v2214_v29 = vadd.f32 %v1845_v25, %v1835_v27  ;;  %v1349_v30 = vpop.f32.mrb[1].mxu0 }
 0x12f   : > { %v2216_v32 = vadd.f32 %v1847_v26, %v1349_v30  ;;  %v1836_v33 = vpop.f32.mrb[2].mxu0 }
 0x130   : > { %v1406_v34 = vsub.f32 0.0, %v2214_v29  ;;  %v2219_v35 = vadd.f32 %v1849_v28, %v1836_v33  ;;  %v1352_v36 = vpop.f32.mrb[3].mxu0 }
 0x131   : > { %v1404_v37 = vsub.f32 0.0, %v2216_v32  ;;  %v2222_v38 = vadd.f32 %v1851_v31, %v1352_v36 }
 0x132   : > { %v1416_v39 = vmul.f32 1.442695, %v1406_v34  ;;  %v1407_v40 = vsub.f32 0.0, %v2219_v35 }
 0x133   : > { %v1412_v41 = vmul.f32 1.442695, %v1404_v37  ;;  %v1405_v42 = vsub.f32 0.0, %v2222_v38 }
 0x134   : > { %1944 = vpow2.f32 %v1416_v39  ;;  %v1418_v43 = vmul.f32 1.442695, %v1407_v40  ;;  %v1791_v44 = vpop.f32.mrb[4].mxu1 }
 0x135   : > { %1946 = vpow2.f32 %v1412_v41  ;;  %v1414_v45 = vmul.f32 1.442695, %v1405_v42  ;;  %v1853_v46 = vadd.f32 %v1791_v44, %v1572_v24  ;;  %v1839_v47 = vpop.f32.mrb[4].mxu0  ;;  %v844_v48 = vpop.f32.mrb[5].mxu1 }
 0x136   : > { %1948 = vpow2.f32 %v1418_v43  ;;  %v1855_v49 = vadd.f32 %v1572_v24, %v844_v48  ;;  %v1365_v50 = vpop.f32.mrb[5].mxu0  ;;  %v1792_v51 = vpop.f32.mrb[6].mxu1 }
 0x137   : > { %1950 = vpow2.f32 %v1414_v45  ;;  %v2226_v52 = vadd.f32 %v1853_v46, %v1839_v47  ;;  %v1857_v53 = vadd.f32 %v1792_v51, %v1572_v24  ;;  %v1840_v54 = vpop.f32.mrb[6].mxu0  ;;  %v847_v55 = vpop.f32.mrb[7].mxu1 }
 0x138   : > { %v2228_v56 = vadd.f32 %v1855_v49, %v1365_v50  ;;  %v1859_v57 = vadd.f32 %v1572_v24, %v847_v55  ;;  %v1368_v58 = vpop.f32.mrb[7].mxu0 }
 0x139   : > { %v1410_v59 = vsub.f32 0.0, %v2226_v52  ;;  %v2231_v60 = vadd.f32 %v1857_v53, %v1840_v54 }
 0x13a   : > { %v1408_v61 = vsub.f32 0.0, %v2228_v56  ;;  %v2234_v62 = vadd.f32 %v1859_v57, %v1368_v58 }
 0x13b   : > { %v1424_v63 = vmul.f32 1.442695, %v1410_v59  ;;  %v1411_v0 = vsub.f32 0.0, %v2231_v60 }
 0x13c   : > { %v1420_v2 = vmul.f32 1.442695, %v1408_v61  ;;  %v1409_v4 = vsub.f32 0.0, %v2234_v62 }
 0x13d   : > { %1952 = vpow2.f32 %v1424_v63  ;;  %v1426_v5 = vmul.f32 1.442695, %v1411_v0 }
 0x13e   : > { %v1945_v6 = vpop.eup %1944  ;;  %1954 = vpow2.f32 %v1420_v2  ;;  %v1422_v7 = vmul.f32 1.442695, %v1409_v4 }
 0x13f   : > { %v1947_v8 = vpop.eup %1946  ;;  %v1430_v9 = vadd.f32 1.0, %v1945_v6  ;;  %1956 = vpow2.f32 %v1426_v5 }
 0x140   : > { %v1949_v10 = vpop.eup %1948  ;;  %v1428_v11 = vadd.f32 1.0, %v1947_v8  ;;  %1958 = vpow2.f32 %v1422_v7 }
 0x141   : > { %v1951_v12 = vpop.eup %1950  ;;  %1960 = vrcp.f32 %v1430_v9  ;;  %v1431_v13 = vadd.f32 1.0, %v1949_v10 }
 0x142   : > { %1962 = vrcp.f32 %v1428_v11  ;;  %v1429_v14 = vadd.f32 1.0, %v1951_v12 }
 0x143   : > { %1964 = vrcp.f32 %v1431_v13 }
 0x144   : > { %1966 = vrcp.f32 %v1429_v14 }
 0x147   : > { %v1953_v15 = vpop.eup %1952 }
 0x148   : > { %v1955_v16 = vpop.eup %1954  ;;  %v1434_v17 = vadd.f32 1.0, %v1953_v15 }
 0x149   : > { %v1957_v18 = vpop.eup %1956  ;;  %v1432_v1 = vadd.f32 1.0, %v1955_v16 }
 0x14a   : > { %v1959_v19 = vpop.eup %1958  ;;  %1968 = vrcp.f32 %v1434_v17  ;;  %v1435_v20 = vadd.f32 1.0, %v1957_v18 }
 0x14b   : > { %v1961_v3 = vpop.eup %1960  ;;  %1970 = vrcp.f32 %v1432_v1  ;;  %v1433_v21 = vadd.f32 1.0, %v1959_v19 }
 0x14c   : > { %v1963_v22 = vpop.eup %1962  ;;  %v1446_v23 = vmul.f32 %v1961_v3, %v2214_v29  ;;  %1972 = vrcp.f32 %v1435_v20 }
 0x14d   : > { %v1965_v24 = vpop.eup %1964  ;;  %v1444_v25 = vmul.f32 %v1963_v22, %v2216_v32  ;;  %1974 = vrcp.f32 %v1433_v21 }
 0x14e   : > { %v1967_v26 = vpop.eup %1966  ;;  %v1673_v27 = vpack.c.bf16 %v1446_v23, %v1446_v23  ;;  %v1447_v28 = vmul.f32 %v1965_v24, %v2219_v35 }
 0x14f   : > { %v1671_v29 = vpack.c.bf16 %v1444_v25, %v1444_v25  ;;  %v1445_v30 = vmul.f32 %v1967_v26, %v2222_v38 }
 0x150   : > { %1496 = vst [vmem:[%s2243_s7 + $0x20] sm:$0xff] %v1673_v27  ;;  %1497 = vst [vmem:[%s2243_s7 + $0x28] sm:$0xff] %v1673_v27  ;;  %v1674_v31 = vpack.c.bf16 %v1447_v28, %v1447_v28 }
 0x151   : > { %1492 = vst [vmem:[%s2243_s7] sm:$0xff] %v1671_v29  ;;  %1493 = vst [vmem:[%s2243_s7 + $0x8] sm:$0xff] %v1671_v29  ;;  %v1672_v33 = vpack.c.bf16 %v1445_v30, %v1445_v30 }
 0x152   : > { %1498 = vst [vmem:[%s2243_s7 + $0x30] sm:$0xff] %v1674_v31  ;;  %1499 = vst [vmem:[%s2243_s7 + $0x38] sm:$0xff] %v1674_v31 }
 0x153   : > { %1494 = vst [vmem:[%s2243_s7 + $0x10] sm:$0xff] %v1672_v33  ;;  %1495 = vst [vmem:[%s2243_s7 + $0x18] sm:$0xff] %v1672_v33 }
 0x154   : > { %v1969_v32 = vpop.eup %1968 }
 0x155   : > { %v1971_v34 = vpop.eup %1970  ;;  %v1450_v35 = vmul.f32 %v1969_v32, %v2226_v52 }
 0x156   : > { %v1973_v36 = vpop.eup %1972  ;;  %v1448_v37 = vmul.f32 %v1971_v34, %v2228_v56 }
 0x157   : > { %v1975_v38 = vpop.eup %1974  ;;  %v1677_v39 = vpack.c.bf16 %v1450_v35, %v1450_v35  ;;  %v1451_v40 = vmul.f32 %v1973_v36, %v2231_v60 }
 0x158   : > { %v1675_v41 = vpack.c.bf16 %v1448_v37, %v1448_v37  ;;  %v1449_v42 = vmul.f32 %v1975_v38, %v2234_v62 }
 0x159   : > { %1504 = vst [vmem:[%s2243_s7 + $0x60] sm:$0xff] %v1677_v39  ;;  %1505 = vst [vmem:[%s2243_s7 + $0x68] sm:$0xff] %v1677_v39  ;;  %v1678_v43 = vpack.c.bf16 %v1451_v40, %v1451_v40 }
 0x15a   : > { %1500 = vst [vmem:[%s2243_s7 + $0x40] sm:$0xff] %v1675_v41  ;;  %1501 = vst [vmem:[%s2243_s7 + $0x48] sm:$0xff] %v1675_v41  ;;  %v1676_v44 = vpack.c.bf16 %v1449_v42, %v1449_v42 }
 0x15b   : > { %1506 = vst [vmem:[%s2243_s7 + $0x70] sm:$0xff] %v1678_v43  ;;  %1507 = vst [vmem:[%s2243_s7 + $0x78] sm:$0xff] %v1678_v43 }
 0x15c   : > { %1502 = vst [vmem:[%s2243_s7 + $0x50] sm:$0xff] %v1676_v44  ;;  %1503 = vst [vmem:[%s2243_s7 + $0x58] sm:$0xff] %v1676_v44 }
 0x15d PF: > { %s13_s12 = sadd.s32 1, %s1982_s12  }
 0x15e   : > { %p10_p4 = scmp.ge.s32.totalorder %s13_s12, 4  }
 0x160   :  { %12 = sbr.rel (!%p10_p4) target bundleno = 1 (0x1), region = 72 }

// kernel: sparse_subdivide_block3d.3
= control target key start
LH: loop header
LB: loop body
LE: loop exit
PB: predicated region body
PF: predicated region fallthrough
CT: control target
= control target key end

     0   :  { %s5512_s12 = smov 0   ;;  %s6214_s0 = inlined_call_operand.vmem [shape: bf16[2,16,16,128], index: 0, kind: input, shape index: {}]   ;;  %s6215_s1 = inlined_call_operand.vmem [shape: bf16[9,128,128], index: 1, kind: input, shape index: {}]   ;;  %s6216_s2 = inlined_call_operand.vmem [shape: f32[1,128], index: 2, kind: input, shape index: {}]   ;;  %s6217_s3 = inlined_call_operand.vmem [shape: f32[2,16,16,128], index: 3, kind: output, shape index: {}]  }
   0x1 LB: > { %s4003_s13 = sadd.s32 4294967295, %s5488_s12   ;;  %p4007_p0 = scmp.ge.s32.totalorder %s5488_s12, 1  ;;  %s5488_s12 = sphi %s5512_s12, %s13_s12  }
   0x2   : > { %p137_p1 = scmp.lt.s32.totalorder %s5488_s12, 3 }
   0x4   : > { %p138_p2 = pnand %p4007_p0, %p137_p1 }
   0x5   : > { %v5257_v0 = vld [vmem:[%s6215_s1] sm:$0xff] (!%p138_p2)   ;;  %v5490_v2 = vmov (!%p138_p2), 0.0   ;;  %v5259_v3 = vld [vmem:[%s6215_s1 + $0x8] sm:$0xff] (!%p138_p2)   ;;  %p161_p3 = scmp.lt.s32.totalorder (!%p138_p2), %s4003_s13, 1  ;;  %v5261_v5 = vld [vmem:[%s6215_s1 + $0x10] sm:$0xff] (!%p138_p2)   ;;  %v5491_v7 = vmov (!%p138_p2), 0.0|0.0  }
   0x6   : > { %141 = sbr.rel (%p138_p2) target bundleno = 574 (0x23e), region = 32  ;;  %v5258_v1 = vld [vmem:[%s6215_s1 + $0x100] sm:$0xff] (!%p138_p2)   ;;  %172 = vst [vmem:[#allocation2] sm:$0xff] (!%p138_p2), %v5490_v2  ;;  %173 = vst [vmem:[#allocation2 + $0x8] sm:$0xff] (!%p138_p2), %v5490_v2  ;;  %4512 = vmatprep.subr.bf16.mxu1 (!%p138_p2), %v5257_v0  ;;  %v5260_v4 = vld [vmem:[%s6215_s1 + $0x108] sm:$0xff] (!%p138_p2)   ;;  %4528 = vmatprep.mubr.bf16.mxu1 (!%p138_p2), %v5491_v7 }
   0x7   : > { %174 = vst [vmem:[#allocation2 + $0x10] sm:$0x3] (!%p138_p2), %v5490_v2  ;;  %175 = vst [vmem:[#allocation2 + $0x18] sm:$0xff] (!%p138_p2), %v5490_v2  ;;  %4704 = vmatprep.subr.bf16.mxu0 (!%p138_p2), %v5258_v1  ;;  %4513 = vmatpush3.bf16.msra.mxu1 (!%p138_p2), %v5257_v0  ;;  %v5262_v6 = vld [vmem:[%s6215_s1 + $0x110] sm:$0xff] (!%p138_p2)   ;;  %v5263_v8 = vld [vmem:[%s6215_s1 + $0x18] sm:$0xff] (!%p138_p2)  }
   0x8   : > { %176 = vst [vmem:[#allocation2 + $0x20] sm:$0xff] (!%p138_p2), %v5490_v2  ;;  %177 = vst [vmem:[#allocation2 + $0x28] sm:$0x3] (!%p138_p2), %v5490_v2  ;;  %4705 = vmatpush3.bf16.msra.mxu0 (!%p138_p2), %v5258_v1  ;;  %4514 = vmatprep.subr.bf16.mxu1 (!%p138_p2), %v5259_v3  ;;  %v5264_v9 = vld [vmem:[%s6215_s1 + $0x118] sm:$0xff] (!%p138_p2)   ;;  %v5265_v10 = vld [vmem:[%s6215_s1 + $0x20] sm:$0xff] (!%p138_p2)  }
   0x9   : > { %178 = vst [vmem:[#allocation2 + $0x30] sm:$0xff] (!%p138_p2), %v5490_v2  ;;  %179 = vst [vmem:[#allocation2 + $0x38] sm:$0xff] (!%p138_p2), %v5490_v2  ;;  %4706 = vmatprep.subr.bf16.mxu0 (!%p138_p2), %v5260_v4  ;;  %v5266_v11 = vld [vmem:[%s6215_s1 + $0x120] sm:$0xff] (!%p138_p2)   ;;  %v5267_v12 = vld [vmem:[%s6215_s1 + $0x28] sm:$0xff] (!%p138_p2)  }
   0xa   : > { %180 = vst [vmem:[#allocation2 + $0x40] sm:$0x3] (!%p138_p2), %v5490_v2  ;;  %181 = vst [vmem:[#allocation2 + $0x48] sm:$0xff] (!%p138_p2), %v5490_v2  ;;  %v5268_v15 = vld [vmem:[%s6215_s1 + $0x128] sm:$0xff] (!%p138_p2)   ;;  %v5269_v21 = vld [vmem:[%s6215_s1 + $0x30] sm:$0xff] (!%p138_p2)  }
   0xb   : > { %182 = vst [vmem:[#allocation2 + $0x50] sm:$0xff] (!%p138_p2), %v5490_v2  ;;  %183 = vst [vmem:[#allocation2 + $0x58] sm:$0x3] (!%p138_p2), %v5490_v2  ;;  %4515 = vmatpush3.bf16.msra.mxu1 (!%p138_p2), %v5259_v3  ;;  %v5270_v23 = vld [vmem:[%s6215_s1 + $0x130] sm:$0xff] (!%p138_p2)   ;;  %v5271_v29 = vld [vmem:[%s6215_s1 + $0x38] sm:$0xff] (!%p138_p2)  }
   0xc   : > { %184 = vst [vmem:[#allocation2 + $0x60] sm:$0xff] (!%p138_p2), %v5490_v2  ;;  %185 = vst [vmem:[#allocation2 + $0x68] sm:$0xff] (!%p138_p2), %v5490_v2  ;;  %4707 = vmatpush3.bf16.msra.mxu0 (!%p138_p2), %v5260_v4  ;;  %4516 = vmatprep.subr.bf16.mxu1 (!%p138_p2), %v5261_v5  ;;  %v5272_v31 = vld [vmem:[%s6215_s1 + $0x138] sm:$0xff] (!%p138_p2)   ;;  %v5274_v34 = vld [vmem:[%s6215_s1 + $0x40] sm:$0xff] (!%p138_p2)  }
   0xd   : > { %186 = vst [vmem:[#allocation2 + $0x70] sm:$0x3] %v5490_v2  ;;  %187 = vst [vmem:[#allocation2 + $0x78] sm:$0xff] %v5490_v2  ;;  %s6219_s13 = smov (!%p161_p3, %s4003_s13), 1  ;;  %4708 = vmatprep.subr.bf16.mxu0 %v5262_v6  ;;  %v5276_v37 = vld [vmem:[%s6215_s1 + $0x140] sm:$0xff]   ;;  %v5277_v46 = vld [vmem:[%s6215_s1 + $0x148] sm:$0xff]  }
   0xe   : > { %188 = vst [vmem:[#allocation2 + $0x80] sm:$0xff] %v5490_v2  ;;  %189 = vst [vmem:[#allocation2 + $0x88] sm:$0x3] %v5490_v2  ;;  %s4215_s30 = sshll.u32 %s6219_s13, 7  ;;  %v5279_v51 = vld [vmem:[%s6215_s1 + $0x48] sm:$0xff]   ;;  %v5284_v54 = vld [vmem:[%s6215_s1 + $0x50] sm:$0xff]  }
   0xf   : > { %190 = vst [vmem:[#allocation2 + $0x90] sm:$0xff] %v5490_v2  ;;  %191 = vst [vmem:[#allocation2 + $0x98] sm:$0xff] %v5490_v2  ;;  %4517 = vmatpush3.bf16.msra.mxu1 %v5261_v5  ;;  %s5560_s10 = scalar_lea.vmem %s6214_s0, %s4215_s30  ;;  %v5281_v60 = vld [vmem:[%s6215_s1 + $0x150] sm:$0xff]   ;;  %v5282_v4 = vld [vmem:[%s6215_s1 + $0x158] sm:$0xff]   ;;  %s4216_s7 = sshll.u32 %s6219_s13, 8 }
  0x10   : > { %192 = vst [vmem:[#allocation2 + $0xa0] sm:$0x3] %v5490_v2  ;;  %193 = vst [vmem:[#allocation2 + $0xa8] sm:$0xff] %v5490_v2  ;;  %4709 = vmatpush3.bf16.msra.mxu0 %v5262_v6  ;;  %4518 = vmatprep.subr.bf16.mxu1 %v5263_v8  ;;  %v4218_v13 = vld [vmem:[%s5560_s10] sm:$0xff]   ;;  %v4281_v18 = vld [vmem:[%s5560_s10 + $0x8] sm:$0xff]   ;;  %s6080_s9 = scalar_lea.vmem %s6217_s3, %s4216_s7 }
  0x11   : > { %194 = vst [vmem:[#allocation2 + $0xb0] sm:$0xff] %v5490_v2  ;;  %195 = vst [vmem:[#allocation2 + $0xb8] sm:$0x3] %v5490_v2  ;;  %4710 = vmatprep.subr.bf16.mxu0 %v5264_v9  ;;  %v5567_v14 = vld [vmem:[%s5560_s10] sm:$0xff]  ;;  %v4219_v16 = vunpack.c.l.bf16 %v4218_v13  ;;  %v4220_v17 = vunpack.c.h.bf16 %v4218_v13  ;;  %v4223_v19 = vunpack.c.l.bf16 %v4281_v18  ;;  %v4224_v20 = vunpack.c.h.bf16 %v4281_v18  ;;  %v4282_v22 = vld [vmem:[%s5560_s10 + $0x10] sm:$0xff]  }
  0x12   : > { %196 = vst [vmem:[#allocation2 + $0xc0] sm:$0xff] %v5490_v2  ;;  %197 = vst [vmem:[#allocation2 + $0xc8] sm:$0xff] %v5490_v2  ;;  %4720 = vmatprep.mubr.bf16.mxu0 %v5567_v14  ;;  %v4227_v24 = vunpack.c.l.bf16 %v4282_v22  ;;  %v4228_v25 = vunpack.c.h.bf16 %v4282_v22  ;;  %v4283_v26 = vld [vmem:[%s5560_s10 + $0x18] sm:$0xff]   ;;  %v4284_v30 = vld [vmem:[%s5560_s10 + $0x20] sm:$0xff]  }
  0x13   : > { %198 = vst [vmem:[#allocation2 + $0xd0] sm:$0x3] %v5490_v2  ;;  %199 = vst [vmem:[#allocation2 + $0xd8] sm:$0xff] %v5490_v2  ;;  %4519 = vmatpush3.bf16.msra.mxu1 %v5263_v8  ;;  %v4231_v27 = vunpack.c.l.bf16 %v4283_v26  ;;  %v4232_v28 = vunpack.c.h.bf16 %v4283_v26  ;;  %v4235_v32 = vunpack.c.l.bf16 %v4284_v30  ;;  %v4236_v33 = vunpack.c.h.bf16 %v4284_v30  ;;  %v4285_v38 = vld [vmem:[%s5560_s10 + $0x28] sm:$0xff]   ;;  %v4286_v45 = vld [vmem:[%s5560_s10 + $0x30] sm:$0xff]  }
  0x14   : > { %200 = vst [vmem:[#allocation2 + $0xe0] sm:$0xff] %v5490_v2  ;;  %201 = vst [vmem:[#allocation2 + $0xe8] sm:$0x3] %v5490_v2  ;;  %4711 = vmatpush3.bf16.msra.mxu0 %v5264_v9  ;;  %4520 = vmatprep.subr.bf16.mxu1 %v5265_v10  ;;  %v4239_v40 = vunpack.c.l.bf16 %v4285_v38  ;;  %v4240_v41 = vunpack.c.h.bf16 %v4285_v38  ;;  %v5597_v44 = vld [vmem:[%s5560_s10 + $0x8] sm:$0xff]  ;;  %v4243_v48 = vunpack.c.l.bf16 %v4286_v45  ;;  %v4244_v49 = vunpack.c.h.bf16 %v4286_v45  ;;  %v5606_v50 = vld [vmem:[%s5560_s10 + $0x10] sm:$0xff] }
  0x15   : > { %202 = vst [vmem:[#allocation2 + $0xf0] sm:$0xff] %v5490_v2  ;;  %203 = vst [vmem:[#allocation2 + $0xf8] sm:$0xff] %v5490_v2  ;;  %4712 = vmatprep.subr.bf16.mxu0 %v5266_v11  ;;  %v4287_v52 = vld [vmem:[%s5560_s10 + $0x38] sm:$0xff]   ;;  %v4288_v62 = vld [vmem:[%s5560_s10 + $0x40] sm:$0xff]  }
  0x16   : > { %204 = vst [vmem:[#allocation2 + $0x100] sm:$0x3] %v5490_v2  ;;  %205 = vst [vmem:[#allocation2 + $0x108] sm:$0xff] %v5490_v2  ;;  %v4247_v55 = vunpack.c.l.bf16 %v4287_v52  ;;  %v4248_v56 = vunpack.c.h.bf16 %v4287_v52  ;;  %v5625_v63 = vld [vmem:[%s5560_s10 + $0x18] sm:$0xff]  ;;  %v4251_v1 = vunpack.c.l.bf16 %v4288_v62  ;;  %v5630_v3 = vld [vmem:[%s5560_s10 + $0x20] sm:$0xff] }
  0x17   : > { %206 = vst [vmem:[#allocation2 + $0x110] sm:$0xff] %v5490_v2  ;;  %207 = vst [vmem:[#allocation2 + $0x118] sm:$0x3] %v5490_v2  ;;  %4521 = vmatpush3.bf16.msra.mxu1 %v5265_v10  ;;  %v4289_v5 = vld [vmem:[%s5560_s10 + $0x48] sm:$0xff]   ;;  %v5289_v6 = vld [vmem:[%s6215_s1 + $0x58] sm:$0xff]  }
  0x18   : > { %208 = vst [vmem:[#allocation2 + $0x120] sm:$0xff] %v5490_v2  ;;  %209 = vst [vmem:[#allocation2 + $0x128] sm:$0xff] %v5490_v2  ;;  %4713 = vmatpush3.bf16.msra.mxu0 %v5266_v11  ;;  %4522 = vmatprep.subr.bf16.mxu1 %v5267_v12  ;;  %v4255_v7 = vunpack.c.l.bf16 %v4289_v5  ;;  %v4256_v8 = vunpack.c.h.bf16 %v4289_v5  ;;  %v4290_v9 = vld [vmem:[%s5560_s10 + $0x50] sm:$0xff]   ;;  %v5295_v30 = vld [vmem:[%s6215_s1 + $0x68] sm:$0xff]  }
  0x19   : > { %210 = vst [vmem:[#allocation2 + $0x130] sm:$0x3] %v5490_v2  ;;  %211 = vst [vmem:[#allocation2 + $0x138] sm:$0xff] %v5490_v2  ;;  %4714 = vmatprep.subr.bf16.mxu0 %v5268_v15  ;;  %v4260_v13 = vunpack.c.h.bf16 %v4290_v9  ;;  %v5660_v26 = vld [vmem:[%s5560_s10 + $0x30] sm:$0xff]  ;;  %v5292_v52 = vld [vmem:[%s6215_s1 + $0x178] sm:$0xff]  }
  0x1a   : > { %212 = vst [vmem:[#allocation2 + $0x140] sm:$0xff] %v5490_v2  ;;  %213 = vst [vmem:[#allocation2 + $0x148] sm:$0x3] %v5490_v2 }
  0x1b   : > { %214 = vst [vmem:[#allocation2 + $0x150] sm:$0xff] %v5490_v2  ;;  %215 = vst [vmem:[#allocation2 + $0x158] sm:$0xff] %v5490_v2  ;;  %4523 = vmatpush3.bf16.msra.mxu1 %v5267_v12  ;;  %v4259_v12 = vunpack.c.l.bf16 %v4290_v9 }
  0x1c   : > { %216 = vst [vmem:[#allocation2 + $0x160] sm:$0x3] %v5490_v2  ;;  %217 = vst [vmem:[#allocation2 + $0x168] sm:$0xff] %v5490_v2  ;;  %4715 = vmatpush3.bf16.msra.mxu0 %v5268_v15  ;;  %4524 = vmatprep.subr.bf16.mxu1 %v5269_v21 }
  0x1d   : > { %218 = vst [vmem:[#allocation2 + $0x170] sm:$0xff] %v5490_v2  ;;  %219 = vst [vmem:[#allocation2 + $0x178] sm:$0x3] %v5490_v2  ;;  %4716 = vmatprep.subr.bf16.mxu0 %v5270_v23 }
  0x1e   : > { %220 = vst [vmem:[#allocation2 + $0x180] sm:$0xff] %v5490_v2  ;;  %221 = vst [vmem:[#allocation2 + $0x188] sm:$0xff] %v5490_v2 }
  0x1f   : > { %222 = vst [vmem:[#allocation2 + $0x190] sm:$0x3] %v5490_v2  ;;  %223 = vst [vmem:[#allocation2 + $0x198] sm:$0xff] %v5490_v2  ;;  %4525 = vmatpush3.bf16.msra.mxu1 %v5269_v21  ;;  %v5654_v21 = vld [vmem:[%s5560_s10 + $0x28] sm:$0xff] }
  0x20   : > { %224 = vst [vmem:[#allocation2 + $0x1a0] sm:$0xff] %v5490_v2  ;;  %225 = vst [vmem:[#allocation2 + $0x1a8] sm:$0x3] %v5490_v2  ;;  %4717 = vmatpush3.bf16.msra.mxu0 %v5270_v23  ;;  %4526 = vmatprep.subr.bf16.mxu1 %v5271_v29  ;;  %v4252_v2 = vunpack.c.h.bf16 %v4288_v62 }
  0x21   : > { %291 = vst [vmem:[#allocation2 + $0x19] sm:$0xff] %v4219_v16  ;;  %292 = vst [vmem:[#allocation2 + $0x21] sm:$0xff] %v4220_v17  ;;  %4718 = vmatprep.subr.bf16.mxu0 %v5272_v31  ;;  %v5286_v17 = vld [vmem:[%s6215_s1 + $0x160] sm:$0xff]  }
  0x22   : > { %293 = vst [vmem:[#allocation2 + $0x31] sm:$0xff] %v4223_v19  ;;  %294 = vst [vmem:[#allocation2 + $0x39] sm:$0xff] %v4224_v20  ;;  %v5293_v19 = vld [vmem:[%s6215_s1 + $0x60] sm:$0xff]   ;;  %v4291_v20 = vld [vmem:[%s5560_s10 + $0x58] sm:$0xff]  }
  0x23   : > { %295 = vst [vmem:[#allocation2 + $0x49] sm:$0xff] %v4227_v24  ;;  %296 = vst [vmem:[#allocation2 + $0x51] sm:$0xff] %v4228_v25  ;;  %4527 = vmatpush3.bf16.msra.mxu1 %v5271_v29  ;;  %v4263_v23 = vunpack.c.l.bf16 %v4291_v20  ;;  %v4264_v24 = vunpack.c.h.bf16 %v4291_v20  ;;  %v4292_v25 = vld [vmem:[%s5560_s10 + $0x60] sm:$0xff]   ;;  %v5287_v29 = vld [vmem:[%s6215_s1 + $0x168] sm:$0xff]  }
  0x24   : > { %297 = vst [vmem:[#allocation2 + $0x61] sm:$0xff] %v4231_v27  ;;  %298 = vst [vmem:[#allocation2 + $0x69] sm:$0xff] %v4232_v28  ;;  %4719 = vmatpush3.bf16.msra.mxu0 %v5272_v31  ;;  %4560 = vmatprep.subr.bf16.mxu1 %v5274_v34  ;;  %v4267_v27 = vunpack.c.l.bf16 %v4292_v25  ;;  %v4268_v28 = vunpack.c.h.bf16 %v4292_v25  ;;  %v4295_v25 = vld [vmem:[%s5560_s10 + $0x78] sm:$0xff]  }
  0x25   : > { %299 = vst [vmem:[#allocation2 + $0x79] sm:$0xff] %v4235_v32  ;;  %300 = vst [vmem:[#allocation2 + $0x81] sm:$0xff] %v4236_v33  ;;  %4752 = vmatprep.subr.bf16.mxu0 %v5276_v37  ;;  %v5291_v33 = vld [vmem:[%s6215_s1 + $0x170] sm:$0xff]  }
  0x26   : > { %301 = vst [vmem:[#allocation2 + $0x91] sm:$0xff] %v4239_v40  ;;  %302 = vst [vmem:[#allocation2 + $0x99] sm:$0xff] %v4240_v41  ;;  %v4294_v41 = vld [vmem:[%s5560_s10 + $0x70] sm:$0xff]  }
  0x27   : > { %303 = vst [vmem:[#allocation2 + $0xa9] sm:$0xff] %v4243_v48  ;;  %304 = vst [vmem:[#allocation2 + $0xb1] sm:$0xff] %v4244_v49  ;;  %4721 = vmatmul.mubr.bf16.vlgmr.msra.gmra.mrb[0].mxu0 %v5597_v44  ;;  %v4275_v45 = vunpack.c.l.bf16 %v4294_v41  ;;  %v5683_v48 = vld [vmem:[%s5560_s10 + $0x38] sm:$0xff] }
  0x28   : > { %v364_v35 = vld [vmem:[#allocation2 + $0x18] sm:$0xff]  ;;  %v365_v36 = vld [vmem:[#allocation2 + $0x20] sm:$0xff]  ;;  %4753 = vmatpush3.bf16.msra.mxu0 %v5276_v37  ;;  %305 = vst [vmem:[#allocation2 + $0xc1] sm:$0xff] %v4247_v55  ;;  %306 = vst [vmem:[#allocation2 + $0xc9] sm:$0xff] %v4248_v56  ;;  %4724 = vmatprep.mubr.bf16.mxu0 %v5606_v50 }
  0x29   : > { %v366_v39 = vld [vmem:[#allocation2 + $0x30] sm:$0xff]  ;;  %v367_v42 = vld [vmem:[#allocation2 + $0x38] sm:$0xff]  ;;  %v395_v43 = vpack.c.bf16 %v365_v36, %v364_v35  ;;  %4754 = vmatprep.subr.bf16.mxu0 %v5277_v46  ;;  %307 = vst [vmem:[#allocation2 + $0xd9] sm:$0xff] %v4251_v1  ;;  %308 = vst [vmem:[#allocation2 + $0xe1] sm:$0xff] %v4252_v2 }
  0x2a   : > { %v5603_v47 = vpack.c.bf16 %v367_v42, %v366_v39  ;;  %v368_v53 = vld [vmem:[#allocation2 + $0x48] sm:$0xff]  ;;  %v369_v57 = vld [vmem:[#allocation2 + $0x50] sm:$0xff]  ;;  %309 = vst [vmem:[#allocation2 + $0xf1] sm:$0xff] %v4255_v7  ;;  %310 = vst [vmem:[#allocation2 + $0xf9] sm:$0xff] %v4256_v8 }
  0x2b   : > { %4529 = vmatmul.mubr.bf16.vlgmr.msra.gmra.mrb[0].mxu1 %v395_v43  ;;  %v370_v58 = vld [vmem:[#allocation2 + $0x60] sm:$0xff]  ;;  %v371_v59 = vld [vmem:[#allocation2 + $0x68] sm:$0xff]  ;;  %v5621_v61 = vpack.c.bf16 %v369_v57, %v368_v53  ;;  %311 = vst [vmem:[#allocation2 + $0x109] sm:$0xff] %v4259_v12  ;;  %312 = vst [vmem:[#allocation2 + $0x111] sm:$0xff] %v4260_v13 }
  0x2c   : > { %4561 = vmatpush3.bf16.msra.mxu1 %v5274_v34  ;;  %4532 = vmatprep.mubr.bf16.mxu1 %v5603_v47  ;;  %v5627_v0 = vpack.c.bf16 %v371_v59, %v370_v58  ;;  %v372_v10 = vld [vmem:[#allocation2 + $0x78] sm:$0xff]  ;;  %v373_v11 = vld [vmem:[#allocation2 + $0x80] sm:$0xff]  ;;  %313 = vst [vmem:[#allocation2 + $0x121] sm:$0xff] %v4263_v23  ;;  %314 = vst [vmem:[#allocation2 + $0x129] sm:$0xff] %v4264_v24 }
  0x2d   : > { %4562 = vmatprep.subr.bf16.mxu1 %v5279_v51  ;;  %4755 = vmatpush3.bf16.msra.mxu0 %v5277_v46  ;;  %v374_v15 = vld [vmem:[#allocation2 + $0x90] sm:$0xff]  ;;  %v375_v16 = vld [vmem:[#allocation2 + $0x98] sm:$0xff]  ;;  %v5647_v18 = vpack.c.bf16 %v373_v11, %v372_v10  ;;  %315 = vst [vmem:[#allocation2 + $0x139] sm:$0xff] %v4267_v27  ;;  %316 = vst [vmem:[#allocation2 + $0x141] sm:$0xff] %v4268_v28  ;;  %v4276_v46 = vunpack.c.h.bf16 %v4294_v41  ;;  %v4279_v28 = vunpack.c.l.bf16 %v4295_v25 }
  0x2e   : > { %4756 = vmatprep.subr.bf16.mxu0 %v5281_v60  ;;  %v5656_v22 = vpack.c.bf16 %v375_v16, %v374_v15  ;;  %v376_v31 = vld [vmem:[#allocation2 + $0xa8] sm:$0xff]  ;;  %v377_v32 = vld [vmem:[#allocation2 + $0xb0] sm:$0xff]  ;;  %v2211_v37 = vld [vmem:[#allocation2 + $0x1a] sm:$0xff]  ;;  %319 = vst [vmem:[#allocation2 + $0x169] sm:$0xff] %v4275_v45 }
  0x2f   : > { %4725 = vmatmul.mubr.bf16.gmra.mrb[4].mxu0 %v5625_v63  ;;  %v4293_v34 = vld [vmem:[%s5560_s10 + $0x68] sm:$0xff]   ;;  %v378_v35 = vld [vmem:[#allocation2 + $0xc0] sm:$0xff]  ;;  %v5677_v42 = vpack.c.bf16 %v377_v32, %v376_v31  ;;  %v5297_v43 = vld [vmem:[%s6215_s1 + $0x70] sm:$0xff]   ;;  %320 = vst [vmem:[#allocation2 + $0x171] sm:$0xff] %v4276_v46 }
  0x30   : > { %4563 = vmatpush3.bf16.msra.mxu1 %v5279_v51  ;;  %4728 = vmatprep.mubr.bf16.mxu0 %v5630_v3  ;;  %v379_v36 = vld [vmem:[#allocation2 + $0xc8] sm:$0xff]  ;;  %v4271_v38 = vunpack.c.l.bf16 %v4293_v34  ;;  %v4272_v39 = vunpack.c.h.bf16 %v4293_v34  ;;  %v380_v53 = vld [vmem:[#allocation2 + $0xd8] sm:$0xff]  ;;  %v381_v57 = vld [vmem:[#allocation2 + $0xe0] sm:$0xff]  ;;  %321 = vst [vmem:[#allocation2 + $0x181] sm:$0xff] %v4279_v28 }
  0x31   : > { %4564 = vmatprep.subr.bf16.mxu1 %v5284_v54  ;;  %4757 = vmatpush3.bf16.msra.mxu0 %v5281_v60  ;;  %v2212_v40 = vld [vmem:[#allocation2 + $0x22] sm:$0xff]  ;;  %v5685_v49 = vpack.c.bf16 %v379_v36, %v378_v35  ;;  %v2214_v55 = vld [vmem:[#allocation2 + $0x3a] sm:$0xff]  ;;  %v382_v59 = vld [vmem:[#allocation2 + $0xf0] sm:$0xff]  ;;  %v5702_v2 = vpack.c.bf16 %v381_v57, %v380_v53 }
  0x32   : > { %4758 = vmatprep.subr.bf16.mxu0 %v5282_v4  ;;  %317 = vst [vmem:[#allocation2 + $0x151] sm:$0xff] %v4271_v38  ;;  %318 = vst [vmem:[#allocation2 + $0x159] sm:$0xff] %v4272_v39  ;;  %v5687_v51 = vpack.c.bf16 %v2212_v40, %v2211_v37  ;;  %v5299_v56 = vld [vmem:[%s6215_s1 + $0x78] sm:$0xff]   ;;  %v5294_v58 = vld [vmem:[%s6215_s1 + $0x180] sm:$0xff]  }
  0x33   : > { %4533 = vmatmul.mubr.bf16.gmra.mrb[4].mxu1 %v5621_v61  ;;  %v383_v60 = vld [vmem:[#allocation2 + $0xf8] sm:$0xff]  ;;  %v2215_v62 = vld [vmem:[#allocation2 + $0x4a] sm:$0xff]  ;;  %v2217_v10 = vld [vmem:[#allocation2 + $0x62] sm:$0xff] }
  0x34   : > { %4536 = vmatprep.mubr.bf16.mxu1 %v5627_v0  ;;  %4565 = vmatpush3.bf16.msra.mxu1 %v5284_v54  ;;  %v2213_v54 = vld [vmem:[#allocation2 + $0x32] sm:$0xff]  ;;  %v5296_v8 = vld [vmem:[%s6215_s1 + $0x188] sm:$0xff]   ;;  %v2219_v13 = vld [vmem:[#allocation2 + $0x7a] sm:$0xff] }
  0x35   : > { %4566 = vmatprep.subr.bf16.mxu1 %v5289_v6  ;;  %4759 = vmatpush3.bf16.msra.mxu0 %v5282_v4  ;;  %v2216_v1 = vld [vmem:[#allocation2 + $0x52] sm:$0xff]  ;;  %v5707_v4 = vld [vmem:[%s6215_s1 + $0x80] sm:$0xff]   ;;  %v5709_v5 = vpack.c.bf16 %v2214_v55, %v2213_v54  ;;  %v384_v9 = vld [vmem:[#allocation2 + $0x108] sm:$0xff] }
  0x36   : > { %4760 = vmatprep.subr.bf16.mxu0 %v5286_v17  ;;  %v5713_v7 = vpack.c.bf16 %v2216_v1, %v2215_v62  ;;  %v2218_v11 = vld [vmem:[#allocation2 + $0x6a] sm:$0xff]  ;;  %v386_v15 = vld [vmem:[#allocation2 + $0x120] sm:$0xff]  ;;  %v388_v31 = vld [vmem:[#allocation2 + $0x138] sm:$0xff] }
  0x37   : > { %4729 = vmatmul.mubr.bf16.gmra.mrb[8].mxu0 %v5654_v21  ;;  %v385_v12 = vld [vmem:[#allocation2 + $0x110] sm:$0xff]  ;;  %v387_v16 = vld [vmem:[#allocation2 + $0x128] sm:$0xff]  ;;  %v5728_v23 = vpack.c.bf16 %v2218_v11, %v2217_v10  ;;  %v389_v34 = vld [vmem:[#allocation2 + $0x140] sm:$0xff] }
  0x38   : > { %4567 = vmatpush3.bf16.msra.mxu1 %v5289_v6  ;;  %4732 = vmatprep.mubr.bf16.mxu0 %v5660_v26  ;;  %v5711_v6 = vpack.c.bf16 %v383_v60, %v382_v59  ;;  %v5726_v20 = vpack.c.bf16 %v385_v12, %v384_v9  ;;  %v5730_v24 = vpack.c.bf16 %v387_v16, %v386_v15  ;;  %v2221_v32 = vld [vmem:[#allocation2 + $0x92] sm:$0xff]  ;;  %v2223_v36 = vld [vmem:[#allocation2 + $0xaa] sm:$0xff]  ;;  %v5302_v39 = vld [vmem:[%s6215_s1 + $0x1a0] sm:$0xff]  }
  0x39   : > { %4568 = vmatprep.subr.bf16.mxu1 %v5293_v19  ;;  %4761 = vmatpush3.bf16.msra.mxu0 %v5286_v17  ;;  %v2220_v17 = vld [vmem:[#allocation2 + $0x82] sm:$0xff]  ;;  %v390_v35 = vld [vmem:[#allocation2 + $0x150] sm:$0xff]  ;;  %v391_v37 = vld [vmem:[#allocation2 + $0x158] sm:$0xff]  ;;  %v5745_v40 = vpack.c.bf16 %v389_v34, %v388_v31 }
  0x3a   : > { %4762 = vmatprep.subr.bf16.mxu0 %v5287_v29  ;;  %v5733_v27 = vpack.c.bf16 %v2220_v17, %v2219_v13  ;;  %v2224_v38 = vld [vmem:[#allocation2 + $0xb2] sm:$0xff]  ;;  %v5304_v46 = vld [vmem:[%s6215_s1 + $0x1a8] sm:$0xff]   ;;  %v2230_v12 = vld [vmem:[#allocation2 + $0xfa] sm:$0xff] }
  0x3b   : > { %4537 = vmatmul.mubr.bf16.gmra.mrb[8].mxu1 %v5647_v18  ;;  %v5751_v45 = vpack.c.bf16 %v2224_v38, %v2223_v36  ;;  %v2226_v53 = vld [vmem:[#allocation2 + $0xca] sm:$0xff]  ;;  %v731_v54 = vld [vmem:[#allocation2 + $0x1] sm:$0xff]  ;;  %v5308_v10 = vld [vmem:[%s6215_s1 + $0x1b8] sm:$0xff]  }
  0x3c   : > { %4540 = vmatprep.mubr.bf16.mxu1 %v5656_v22  ;;  %4569 = vmatpush3.bf16.msra.mxu1 %v5293_v19  ;;  %v5298_v19 = vld [vmem:[%s6215_s1 + $0x190] sm:$0xff]   ;;  %v2228_v59 = vld [vmem:[#allocation2 + $0xe2] sm:$0xff]  ;;  %v2235_v31 = vld [vmem:[#allocation2 + $0x13a] sm:$0xff] }
  0x3d   : > { %4570 = vmatprep.subr.bf16.mxu1 %v5295_v30  ;;  %4763 = vmatpush3.bf16.msra.mxu0 %v5287_v29  ;;  %v4280_v29 = vunpack.c.h.bf16 %v4295_v25  ;;  %v732_v55 = vld [vmem:[#allocation2 + $0x9] sm:$0xff]  ;;  %v2229_v11 = vld [vmem:[#allocation2 + $0xf2] sm:$0xff]  ;;  %v5778_v16 = vld [vmem:[%s6215_s1 + $0x1c0] sm:$0xff]  }
  0x3e   : > { %4764 = vmatprep.subr.bf16.mxu0 %v5291_v33  ;;  %v393_v57 = vld [vmem:[#allocation2 + $0x170] sm:$0xff]  ;;  %v5780_v17 = vpack.c.bf16 %v2230_v12, %v2229_v11  ;;  %v5303_v25 = vld [vmem:[%s6215_s1 + $0x88] sm:$0xff]   ;;  %v2238_v34 = vld [vmem:[#allocation2 + $0x15a] sm:$0xff] }
  0x3f   : > { %4733 = vmatmul.mubr.bf16.gmra.mrb[12].mxu0 %v5683_v48  ;;  %322 = vst [vmem:[#allocation2 + $0x189] sm:$0xff] %v4280_v29  ;;  %v5306_v60 = vld [vmem:[%s6215_s1 + $0x1b0] sm:$0xff]   ;;  %v2233_v28 = vld [vmem:[#allocation2 + $0x122] sm:$0xff] }
  0x40   : > { %4571 = vmatpush3.bf16.msra.mxu1 %v5295_v30  ;;  %4768 = vmatprep.mubr.bf16.mxu0 %v5687_v51  ;;  %v5300_v30 = vld [vmem:[%s6215_s1 + $0x198] sm:$0xff]   ;;  %v2231_v13 = vld [vmem:[#allocation2 + $0x10a] sm:$0xff]  ;;  %v5473_v12 = vld [vmem:[#allocation2] sm:$0xff] }
  0x41   : > { %4572 = vmatprep.subr.bf16.mxu1 %v5297_v43  ;;  %4765 = vmatpush3.bf16.msra.mxu0 %v5291_v33  ;;  %v2222_v33 = vld [vmem:[#allocation2 + $0x9a] sm:$0xff]  ;;  %v2232_v15 = vld [vmem:[#allocation2 + $0x112] sm:$0xff]  ;;  %v2234_v29 = vld [vmem:[#allocation2 + $0x12a] sm:$0xff] }
  0x42   : > { %4766 = vmatprep.subr.bf16.mxu0 %v5292_v52  ;;  %v5747_v41 = vpack.c.bf16 %v2222_v33, %v2221_v32  ;;  %v2236_v32 = vld [vmem:[#allocation2 + $0x142] sm:$0xff]  ;;  %v5796_v33 = vpack.c.bf16 %v2234_v29, %v2233_v28  ;;  %v2240_v36 = vld [vmem:[#allocation2 + $0x172] sm:$0xff] }
  0x43   : > { %4541 = vmatmul.mubr.bf16.gmra.mrb[12].mxu1 %v5677_v42  ;;  %v5326_v11 = vld [vmem:[%s6215_s1 + $0xc8] sm:$0xff]  }
  0x44   : > { %4544 = vmatprep.mubr.bf16.mxu1 %v5685_v49  ;;  %4573 = vmatpush3.bf16.msra.mxu1 %v5297_v43  ;;  %v5749_v43 = vpack.c.bf16 %v391_v37, %v390_v35  ;;  %v2239_v35 = vld [vmem:[#allocation2 + $0x16a] sm:$0xff]  ;;  %v5310_v37 = vld [vmem:[%s6215_s1 + $0xa0] sm:$0xff]  }
  0x45   : > { %4574 = vmatprep.subr.bf16.mxu1 %v5299_v56  ;;  %4767 = vmatpush3.bf16.msra.mxu0 %v5292_v52  ;;  %v2225_v52 = vld [vmem:[#allocation2 + $0xc2] sm:$0xff] }
  0x46   : > { %4800 = vmatprep.subr.bf16.mxu0 %v5294_v58  ;;  %v5765_v1 = vpack.c.bf16 %v2226_v53, %v2225_v52  ;;  %v5318_v52 = vld [vmem:[%s6215_s1 + $0xb0] sm:$0xff]  }
  0x48   : > { %4575 = vmatpush3.bf16.msra.mxu1 %v5299_v56  ;;  %4769 = vmatmul.mubr.bf16.vlgmr.msra.gmra.mrb[0].mxu0 %v5709_v5  ;;  %v392_v56 = vld [vmem:[#allocation2 + $0x168] sm:$0xff] }
  0x49   : > { %4608 = vmatprep.subr.bf16.mxu1 %v5707_v4  ;;  %4801 = vmatpush3.bf16.msra.mxu0 %v5294_v58  ;;  %v2227_v58 = vld [vmem:[#allocation2 + $0xda] sm:$0xff]  ;;  %v5763_v62 = vpack.c.bf16 %v393_v57, %v392_v56 }
  0x4a   : > { %4772 = vmatprep.mubr.bf16.mxu0 %v5713_v7  ;;  %4802 = vmatprep.subr.bf16.mxu0 %v5296_v8  ;;  %v5767_v9 = vpack.c.bf16 %v2228_v59, %v2227_v58  ;;  %v5316_v56 = vld [vmem:[%s5560_s10 + $0x58] sm:$0xff]  ;;  %v5317_v57 = vld [vmem:[%s5560_s10 + $0x60] sm:$0xff]  ;;  %v5856_v58 = vld [vmem:[%s5560_s10 + $0x68] sm:$0xff] }
  0x4b   : > { %4545 = vmatmul.mubr.bf16.gmra.mrb[16].mxu1 %v5702_v2  ;;  %v5327_v59 = vld [vmem:[%s6215_s1 + $0x1e8] sm:$0xff]  }
  0x4c   : > { %4548 = vmatprep.mubr.bf16.mxu1 %v5711_v6 }
  0x4d   : > { %4803 = vmatpush3.bf16.msra.mxu0 %v5296_v8  ;;  %v763_v8 = vpack.c.bf16 %v732_v55, %v731_v54  ;;  %v5309_v54 = vld [vmem:[%s5560_s10 + $0x40] sm:$0xff]  ;;  %v5312_v55 = vld [vmem:[%s5560_s10 + $0x48] sm:$0xff] }
  0x4e   : > { %4804 = vmatprep.subr.bf16.mxu0 %v5298_v19 }
  0x50   : > { %4773 = vmatmul.mubr.bf16.gmra.mrb[4].mxu0 %v5728_v23 }
  0x51   : > { %4776 = vmatprep.mubr.bf16.mxu0 %v5733_v27  ;;  %4805 = vmatpush3.bf16.msra.mxu0 %v5298_v19  ;;  %v5782_v19 = vpack.c.bf16 %v2232_v15, %v2231_v13  ;;  %v2629_v13 = vpack.c.bf16 %v5473_v12, %v5473_v12  ;;  %v5476_v12 = vld [vmem:[%s6215_s1 + $0x110] sm:$0xff]  }
  0x52   : > { %4806 = vmatprep.subr.bf16.mxu0 %v5300_v30 }
  0x53   : > { %4549 = vmatmul.mubr.bf16.gmra.mrb[20].mxu1 %v5726_v20 }
  0x54   : > { %4552 = vmatprep.mubr.bf16.mxu1 %v5730_v24 }
  0x55   : > { %4807 = vmatpush3.bf16.msra.mxu0 %v5300_v30  ;;  %v5305_v30 = vld [vmem:[%s6215_s1 + $0x90] sm:$0xff]  }
  0x56   : > { %4808 = vmatprep.subr.bf16.mxu0 %v5302_v39 }
  0x58   : > { %4777 = vmatmul.mubr.bf16.gmra.mrb[8].mxu0 %v5747_v41 }
  0x59   : > { %4780 = vmatprep.mubr.bf16.mxu0 %v5751_v45  ;;  %4809 = vmatpush3.bf16.msra.mxu0 %v5302_v39  ;;  %v5812_v39 = vpack.c.bf16 %v2240_v36, %v2239_v35  ;;  %v2963_v36 = vld [vmem:[#allocation2 + $0xb1] sm:$0xff] }
  0x5a   : > { %4810 = vmatprep.subr.bf16.mxu0 %v5304_v46 }
  0x5b   : > { %4553 = vmatmul.mubr.bf16.gmra.mrb[24].mxu1 %v5745_v40 }
  0x5c   : > { %4556 = vmatprep.mubr.bf16.mxu1 %v5749_v43 }
  0x5d   : > { %4811 = vmatpush3.bf16.msra.mxu0 %v5304_v46  ;;  %v2242_v46 = vld [vmem:[#allocation2 + $0x18a] sm:$0xff] }
  0x5e   : > { %4812 = vmatprep.subr.bf16.mxu0 %v5306_v60 }
  0x60   : > { %4781 = vmatmul.mubr.bf16.gmra.mrb[12].mxu0 %v5765_v1 }
  0x61   : > { %4784 = vmatprep.mubr.bf16.mxu0 %v5767_v9  ;;  %4813 = vmatpush3.bf16.msra.mxu0 %v5306_v60  ;;  %v5329_v60 = vld [vmem:[%s6215_s1 + $0x1f0] sm:$0xff]  }
  0x62   : > { %4814 = vmatprep.subr.bf16.mxu0 %v5308_v10 }
  0x63   : > { %4557 = vmatmul.mubr.bf16.gmra.mrb[28].mxu1 %v5763_v62 }
  0x64   : > { %4576 = vmatprep.mubr.bf16.mxu1 %v763_v8  ;;  %v5868_v8 = vld [vmem:[%s5560_s10 + $0x70] sm:$0xff] }
  0x65   : > { %4815 = vmatpush3.bf16.msra.mxu0 %v5308_v10 }
  0x66   : > { %4848 = vmatprep.subr.bf16.mxu0 %v5778_v16 }
  0x68   : > { %4785 = vmatmul.mubr.bf16.gmra.mrb[16].mxu0 %v5780_v17 }
  0x69   : > { %4788 = vmatprep.mubr.bf16.mxu0 %v5782_v19 }
  0x6b   : > { %4577 = vmatmul.mubr.bf16.vlgmr.msra.gmra.mrb[0].mxu1 %v5567_v14  ;;  %v5798_v14 = vpack.c.bf16 %v2236_v32, %v2235_v31  ;;  %v2959_v31 = vld [vmem:[#allocation2 + $0x81] sm:$0xff]  ;;  %v2960_v32 = vld [vmem:[#allocation2 + $0x91] sm:$0xff] }
  0x6c   : > { %4609 = vmatpush3.bf16.msra.mxu1 %v5707_v4  ;;  %4580 = vmatprep.mubr.bf16.mxu1 %v5597_v44  ;;  %v5307_v4 = vld [vmem:[%s6215_s1 + $0x98] sm:$0xff]  }
  0x6d   : > { %4610 = vmatprep.subr.bf16.mxu1 %v5303_v25  ;;  %v2237_v44 = vld [vmem:[#allocation2 + $0x152] sm:$0xff] }
  0x6e   : > { %v5810_v38 = vpack.c.bf16 %v2238_v34, %v2237_v44  ;;  %v5337_v44 = vld [vmem:[%s6215_s1 + $0x210] sm:$0xff]  }
  0x70   : > { %4611 = vmatpush3.bf16.msra.mxu1 %v5303_v25  ;;  %4789 = vmatmul.mubr.bf16.gmra.mrb[20].mxu0 %v5796_v33  ;;  %v2957_v25 = vld [vmem:[#allocation2 + $0x69] sm:$0xff] }
  0x71   : > { %4612 = vmatprep.subr.bf16.mxu1 %v5305_v30  ;;  %4792 = vmatprep.mubr.bf16.mxu0 %v5798_v14 }
  0x73   : > { %4581 = vmatmul.mubr.bf16.gmra.mrb[4].mxu1 %v5606_v50  ;;  %v5314_v50 = vld [vmem:[%s6215_s1 + $0xa8] sm:$0xff]  }
  0x74   : > { %4584 = vmatprep.mubr.bf16.mxu1 %v5625_v63  ;;  %4613 = vmatpush3.bf16.msra.mxu1 %v5305_v30  ;;  %v2241_v63 = vld [vmem:[#allocation2 + $0x182] sm:$0xff] }
  0x75   : > { %4614 = vmatprep.subr.bf16.mxu1 %v5307_v4  ;;  %v2258_v53 = vpack.c.bf16 %v2242_v46, %v2241_v63  ;;  %v5335_v30 = vld [vmem:[%s6215_s1 + $0x208] sm:$0xff]   ;;  %v5340_v63 = vld [vmem:[%s6215_s1 + $0x220] sm:$0xff]  }
  0x78   : > { %4615 = vmatpush3.bf16.msra.mxu1 %v5307_v4  ;;  %4793 = vmatmul.mubr.bf16.gmra.mrb[24].mxu0 %v5810_v38  ;;  %v2961_v4 = vld [vmem:[#allocation2 + $0x99] sm:$0xff] }
  0x79   : > { %4616 = vmatprep.subr.bf16.mxu1 %v5310_v37  ;;  %4796 = vmatprep.mubr.bf16.mxu0 %v5812_v39  ;;  %v2988_v35 = vpack.c.bf16 %v2961_v4, %v2960_v32  ;;  %v1488_v32 = vld [vmem:[#allocation2 + $0xe0] sm:$0xff]  ;;  %v3322_v4 = vld [vmem:[#allocation2 + $0x32] sm:$0xff] }
  0x7b   : > { %4585 = vmatmul.mubr.bf16.gmra.mrb[8].mxu1 %v5630_v3  ;;  %v5322_v3 = vld [vmem:[%s6215_s1 + $0xb8] sm:$0xff]  }
  0x7c   : > { %4588 = vmatprep.mubr.bf16.mxu1 %v5654_v21  ;;  %4617 = vmatpush3.bf16.msra.mxu1 %v5310_v37  ;;  %v5324_v21 = vld [vmem:[%s6215_s1 + $0xc0] sm:$0xff]  }
  0x7d   : > { %4618 = vmatprep.subr.bf16.mxu1 %v5314_v50  ;;  %v2964_v37 = vld [vmem:[#allocation2 + $0xc1] sm:$0xff] }
  0x80   : > { %4619 = vmatpush3.bf16.msra.mxu1 %v5314_v50  ;;  %4797 = vmatmul.mubr.bf16.gmra.mrb[28].mxu0 %v2258_v53  ;;  %v2965_v50 = vld [vmem:[#allocation2 + $0xc9] sm:$0xff]  ;;  %v2967_v53 = vld [vmem:[#allocation2 + $0xe1] sm:$0xff] }
  0x81   : > { %4620 = vmatprep.subr.bf16.mxu1 %v5318_v52  ;;  %4816 = vmatprep.mubr.bf16.mxu0 %v5603_v47  ;;  %v5319_v47 = vld [vmem:[%s6215_s1 + $0x1d0] sm:$0xff]  }
  0x83   : > { %4589 = vmatmul.mubr.bf16.gmra.mrb[12].mxu1 %v5660_v26  ;;  %v5315_v26 = vld [vmem:[%s6215_s1 + $0x1c8] sm:$0xff]  }
  0x84   : > { %4592 = vmatprep.mubr.bf16.mxu1 %v5683_v48  ;;  %4621 = vmatpush3.bf16.msra.mxu1 %v5318_v52  ;;  %v5313_v48 = vld [vmem:[%s5560_s10 + $0x50] sm:$0xff]  ;;  %v2990_v52 = vpack.c.bf16 %v2965_v50, %v2964_v37  ;;  %v1490_v50 = vld [vmem:[#allocation2 + $0xf8] sm:$0xff] }
  0x85   : > { %4622 = vmatprep.subr.bf16.mxu1 %v5322_v3  ;;  %v1489_v37 = vld [vmem:[#allocation2 + $0xf0] sm:$0xff] }
  0x88   : > { %4623 = vmatpush3.bf16.msra.mxu1 %v5322_v3  ;;  %4817 = vmatmul.mubr.bf16.vlgmr.msra.gmra.mrb[0].mxu0 %v5621_v61  ;;  %v5323_v61 = vld [vmem:[%s6215_s1 + $0x1d8] sm:$0xff]  }
  0x89   : > { %4656 = vmatprep.subr.bf16.mxu1 %v5324_v21  ;;  %4849 = vmatpush3.bf16.msra.mxu0 %v5778_v16  ;;  %v2956_v16 = vld [vmem:[#allocation2 + $0x61] sm:$0xff]  ;;  %v1471_v3 = vld [vmem:[#allocation2 + $0x18] sm:$0xff] }
  0x8a   : > { %4820 = vmatprep.mubr.bf16.mxu0 %v5627_v0  ;;  %4850 = vmatprep.subr.bf16.mxu0 %v5315_v26  ;;  %v5325_v0 = vld [vmem:[%s6215_s1 + $0x1e0] sm:$0xff]   ;;  %v2986_v29 = vpack.c.bf16 %v2957_v25, %v2956_v16 }
  0x8b   : > { %4593 = vmatmul.mubr.bf16.gmra.mrb[16].mxu1 %v5309_v54  ;;  %v2968_v54 = vld [vmem:[#allocation2 + $0xf1] sm:$0xff] }
  0x8c   : > { %4596 = vmatprep.mubr.bf16.mxu1 %v5312_v55  ;;  %v2969_v55 = vld [vmem:[#allocation2 + $0xf9] sm:$0xff] }
  0x8d   : > { %4851 = vmatpush3.bf16.msra.mxu0 %v5315_v26  ;;  %v5342_v26 = vld [vmem:[%s6215_s1 + $0x230] sm:$0xff]  }
  0x8e   : > { %4852 = vmatprep.subr.bf16.mxu0 %v5319_v47 }
  0x90   : > { %4821 = vmatmul.mubr.bf16.gmra.mrb[4].mxu0 %v5647_v18  ;;  %v1101_v18 = vld [vmem:[#allocation2 + $0x2] sm:$0xff] }
  0x91   : > { %4824 = vmatprep.mubr.bf16.mxu0 %v5656_v22  ;;  %4853 = vmatpush3.bf16.msra.mxu0 %v5319_v47  ;;  %v1102_v22 = vld [vmem:[#allocation2 + $0xa] sm:$0xff] }
  0x92   : > { %4854 = vmatprep.subr.bf16.mxu0 %v5323_v61  ;;  %v1133_v10 = vpack.c.bf16 %v1102_v22, %v1101_v18  ;;  %v1476_v18 = vld [vmem:[#allocation2 + $0x50] sm:$0xff]  ;;  %v2972_v22 = vld [vmem:[#allocation2 + $0x121] sm:$0xff] }
  0x93   : > { %4597 = vmatmul.mubr.bf16.gmra.mrb[20].mxu1 %v5313_v48 }
  0x94   : > { %4600 = vmatprep.mubr.bf16.mxu1 %v5316_v56  ;;  %v1473_v56 = vld [vmem:[#allocation2 + $0x30] sm:$0xff] }
  0x95   : > { %4855 = vmatpush3.bf16.msra.mxu0 %v5323_v61  ;;  %v1474_v61 = vld [vmem:[#allocation2 + $0x38] sm:$0xff] }
  0x96   : > { %4856 = vmatprep.subr.bf16.mxu0 %v5325_v0 }
  0x98   : > { %4825 = vmatmul.mubr.bf16.gmra.mrb[8].mxu0 %v5677_v42  ;;  %v5331_v42 = vld [vmem:[%s6215_s1 + $0x1f8] sm:$0xff]  }
  0x99   : > { %4828 = vmatprep.mubr.bf16.mxu0 %v5685_v49  ;;  %4857 = vmatpush3.bf16.msra.mxu0 %v5325_v0  ;;  %v5333_v49 = vld [vmem:[%s6215_s1 + $0x200] sm:$0xff]   ;;  %v2970_v0 = vld [vmem:[#allocation2 + $0x109] sm:$0xff] }
  0x9a   : > { %4858 = vmatprep.subr.bf16.mxu0 %v5327_v59 }
  0x9b   : > { %4601 = vmatmul.mubr.bf16.gmra.mrb[24].mxu1 %v5317_v57  ;;  %v2971_v57 = vld [vmem:[#allocation2 + $0x111] sm:$0xff] }
  0x9c   : > { %4604 = vmatprep.mubr.bf16.mxu1 %v5856_v58 }
  0x9d   : > { %4859 = vmatpush3.bf16.msra.mxu0 %v5327_v59  ;;  %v1475_v59 = vld [vmem:[#allocation2 + $0x48] sm:$0xff] }
  0x9e   : > { %4860 = vmatprep.subr.bf16.mxu0 %v5329_v60 }
  0xa0   : > { %4829 = vmatmul.mubr.bf16.gmra.mrb[12].mxu0 %v5702_v2  ;;  %v5328_v2 = vld [vmem:[%s6215_s1 + $0xd0] sm:$0xff]  }
  0xa1   : > { %4832 = vmatprep.mubr.bf16.mxu0 %v5711_v6  ;;  %4861 = vmatpush3.bf16.msra.mxu0 %v5329_v60  ;;  %v5330_v6 = vld [vmem:[%s6215_s1 + $0xd8] sm:$0xff]   ;;  %v2973_v60 = vld [vmem:[#allocation2 + $0x129] sm:$0xff] }
  0xa2   : > { %4862 = vmatprep.subr.bf16.mxu0 %v5331_v42 }
  0xa3   : > { %4605 = vmatmul.mubr.bf16.gmra.mrb[28].mxu1 %v5868_v8 }
  0xa4   : > { %4624 = vmatprep.mubr.bf16.mxu1 %v1133_v10  ;;  %v1504_v10 = vpack.c.bf16 %v1474_v61, %v1473_v56  ;;  %v3328_v56 = vld [vmem:[#allocation2 + $0x7a] sm:$0xff]  ;;  %v3329_v61 = vld [vmem:[#allocation2 + $0x82] sm:$0xff] }
  0xa5   : > { %4863 = vmatpush3.bf16.msra.mxu0 %v5331_v42  ;;  %v5956_v42 = vpack.c.bf16 %v2971_v57, %v2970_v0  ;;  %v1495_v0 = vld [vmem:[#allocation2 + $0x138] sm:$0xff]  ;;  %v1496_v57 = vld [vmem:[#allocation2 + $0x140] sm:$0xff] }
  0xa6   : > { %4896 = vmatprep.subr.bf16.mxu0 %v5333_v49 }
  0xa8   : > { %4833 = vmatmul.mubr.bf16.gmra.mrb[16].mxu0 %v5726_v20  ;;  %v5332_v20 = vld [vmem:[%s6215_s1 + $0xe0] sm:$0xff]  }
  0xa9   : > { %4836 = vmatprep.mubr.bf16.mxu0 %v5730_v24 }
  0xab   : > { %4625 = vmatmul.mubr.bf16.vlgmr.msra.gmra.mrb[0].mxu1 %v5687_v51  ;;  %v2610_v51 = vld [vmem:[#allocation2 + $0x180] sm:$0xff] }
  0xac   : > { %4657 = vmatpush3.bf16.msra.mxu1 %v5324_v21  ;;  %4628 = vmatprep.mubr.bf16.mxu1 %v5709_v5  ;;  %v2611_v5 = vld [vmem:[#allocation2 + $0x188] sm:$0xff]  ;;  %v1472_v21 = vld [vmem:[#allocation2 + $0x20] sm:$0xff] }
  0xad   : > { %4658 = vmatprep.subr.bf16.mxu1 %v5326_v11  ;;  %v5899_v24 = vpack.c.bf16 %v2611_v5, %v2610_v51  ;;  %v1503_v48 = vpack.c.bf16 %v1472_v21, %v1471_v3  ;;  %v2975_v51 = vld [vmem:[#allocation2 + $0x141] sm:$0xff]  ;;  %v1479_v5 = vld [vmem:[#allocation2 + $0x78] sm:$0xff]  ;;  %v1512_v21 = vpack.c.bf16 %v1490_v50, %v1489_v37  ;;  %v3351_v37 = vld [vmem:[#allocation2 + $0x18a] sm:$0xff] }
  0xae   : > { %v5481_v3 = vld [vmem:[%s6215_s1 + $0x138] sm:$0xff]  }
  0xb0   : > { %4659 = vmatpush3.bf16.msra.mxu1 %v5326_v11  ;;  %4837 = vmatmul.mubr.bf16.gmra.mrb[20].mxu0 %v5745_v40  ;;  %v2953_v40 = vld [vmem:[#allocation2 + $0x39] sm:$0xff] }
  0xb1   : > { %4660 = vmatprep.subr.bf16.mxu1 %v5328_v2  ;;  %4840 = vmatprep.mubr.bf16.mxu0 %v5749_v43  ;;  %v5336_v43 = vld [vmem:[%s6215_s1 + $0xf0] sm:$0xff]   ;;  %v1477_v11 = vld [vmem:[#allocation2 + $0x60] sm:$0xff] }
  0xb3   : > { %4629 = vmatmul.mubr.bf16.gmra.mrb[4].mxu1 %v5713_v7  ;;  %v5334_v7 = vld [vmem:[%s6215_s1 + $0xe8] sm:$0xff]  }
  0xb4   : > { %4632 = vmatprep.mubr.bf16.mxu1 %v5728_v23  ;;  %4661 = vmatpush3.bf16.msra.mxu1 %v5328_v2  ;;  %v2952_v23 = vld [vmem:[#allocation2 + $0x31] sm:$0xff]  ;;  %v1478_v2 = vld [vmem:[#allocation2 + $0x68] sm:$0xff] }
  0xb5   : > { %4662 = vmatprep.subr.bf16.mxu1 %v5330_v6  ;;  %v2984_v15 = vpack.c.bf16 %v2953_v40, %v2952_v23  ;;  %v1506_v23 = vpack.c.bf16 %v1478_v2, %v1477_v11  ;;  %v1497_v11 = vld [vmem:[#allocation2 + $0x150] sm:$0xff]  ;;  %v1498_v2 = vld [vmem:[#allocation2 + $0x158] sm:$0xff] }
  0xb8   : > { %4663 = vmatpush3.bf16.msra.mxu1 %v5330_v6  ;;  %4841 = vmatmul.mubr.bf16.gmra.mrb[24].mxu0 %v5763_v62  ;;  %v2955_v62 = vld [vmem:[#allocation2 + $0x51] sm:$0xff]  ;;  %v2974_v6 = vld [vmem:[#allocation2 + $0x139] sm:$0xff] }
  0xb9   : > { %4664 = vmatprep.subr.bf16.mxu1 %v5332_v20  ;;  %4844 = vmatprep.mubr.bf16.mxu0 %v5899_v24  ;;  %v5966_v40 = vpack.c.bf16 %v2975_v51, %v2974_v6  ;;  %v3332_v6 = vld [vmem:[#allocation2 + $0xaa] sm:$0xff]  ;;  %v3333_v51 = vld [vmem:[#allocation2 + $0xb2] sm:$0xff] }
  0xbb   : > { %4633 = vmatmul.mubr.bf16.gmra.mrb[8].mxu1 %v5733_v27  ;;  %v5338_v27 = vld [vmem:[%s6215_s1 + $0xf8] sm:$0xff]  }
  0xbc   : > { %4636 = vmatprep.mubr.bf16.mxu1 %v5747_v41  ;;  %4665 = vmatpush3.bf16.msra.mxu1 %v5332_v20  ;;  %v2954_v41 = vld [vmem:[#allocation2 + $0x49] sm:$0xff]  ;;  %v1480_v20 = vld [vmem:[#allocation2 + $0x80] sm:$0xff] }
  0xbd   : > { %4666 = vmatprep.subr.bf16.mxu1 %v5334_v7  ;;  %v2985_v28 = vpack.c.bf16 %v2955_v62, %v2954_v41  ;;  %v1484_v41 = vld [vmem:[#allocation2 + $0xb0] sm:$0xff]  ;;  %v5477_v62 = vld [vmem:[%s6215_s1 + $0x118] sm:$0xff]  }
  0xc0   : > { %4667 = vmatpush3.bf16.msra.mxu1 %v5334_v7  ;;  %4845 = vmatmul.mubr.bf16.gmra.mrb[28].mxu0 %v2629_v13  ;;  %v5475_v7 = vld [vmem:[%s6215_s1 + $0x108] sm:$0xff]   ;;  %v1481_v13 = vld [vmem:[#allocation2 + $0x90] sm:$0xff] }
  0xc1   : > { %4668 = vmatprep.subr.bf16.mxu1 %v5336_v43  ;;  %4864 = vmatprep.mubr.bf16.mxu0 %v2984_v15  ;;  %v1482_v15 = vld [vmem:[#allocation2 + $0x98] sm:$0xff] }
  0xc2   : > { %v1508_v16 = vpack.c.bf16 %v1482_v15, %v1481_v13 }
  0xc3   : > { %4637 = vmatmul.mubr.bf16.gmra.mrb[12].mxu1 %v5751_v45  ;;  %v5922_v45 = vld [vmem:[%s6215_s1 + $0x100] sm:$0xff]  }
  0xc4   : > { %4640 = vmatprep.mubr.bf16.mxu1 %v5765_v1  ;;  %4669 = vmatpush3.bf16.msra.mxu1 %v5336_v43  ;;  %v2958_v1 = vld [vmem:[#allocation2 + $0x79] sm:$0xff]  ;;  %v1507_v43 = vpack.c.bf16 %v1480_v20, %v1479_v5  ;;  %v1499_v5 = vld [vmem:[#allocation2 + $0x168] sm:$0xff]  ;;  %v1500_v20 = vld [vmem:[#allocation2 + $0x170] sm:$0xff] }
  0xc5   : > { %4670 = vmatprep.subr.bf16.mxu1 %v5338_v27  ;;  %v2987_v34 = vpack.c.bf16 %v2959_v31, %v2958_v1  ;;  %v2983_v1 = vld [vmem:[#allocation2 + $0x1a1] sm:$0xff]  ;;  %v1487_v31 = vld [vmem:[#allocation2 + $0xd8] sm:$0xff]  ;;  %v1517_v13 = vpack.c.bf16 %v1500_v20, %v1499_v5 }
  0xc8   : > { %4671 = vmatpush3.bf16.msra.mxu1 %v5338_v27  ;;  %4865 = vmatmul.mubr.bf16.vlgmr.msra.gmra.mrb[0].mxu0 %v2985_v28  ;;  %v1483_v27 = vld [vmem:[#allocation2 + $0xa8] sm:$0xff]  ;;  %v5343_v28 = vld [vmem:[%s5560_s10 + $0x78] sm:$0xff] }
  0xc9   : > { %4944 = vmatprep.subr.bf16.mxu1 %v5922_v45  ;;  %4897 = vmatpush3.bf16.msra.mxu0 %v5333_v49  ;;  %v1505_v49 = vpack.c.bf16 %v1476_v18, %v1475_v59  ;;  %v1509_v25 = vpack.c.bf16 %v1484_v41, %v1483_v27  ;;  %v3330_v59 = vld [vmem:[#allocation2 + $0x92] sm:$0xff]  ;;  %v3331_v18 = vld [vmem:[#allocation2 + $0x9a] sm:$0xff]  ;;  %v3337_v41 = vld [vmem:[#allocation2 + $0xe2] sm:$0xff] }
  0xca   : > { %4868 = vmatprep.mubr.bf16.mxu0 %v2986_v29  ;;  %4898 = vmatprep.subr.bf16.mxu0 %v5335_v30  ;;  %v5478_v29 = vld [vmem:[%s6215_s1 + $0x120] sm:$0xff]  }
  0xcb   : > { %4641 = vmatmul.mubr.bf16.gmra.mrb[16].mxu1 %v5767_v9  ;;  %v5339_v9 = vld [vmem:[%s6215_s1 + $0x218] sm:$0xff]  }
  0xcc   : > { %4644 = vmatprep.mubr.bf16.mxu1 %v5780_v17  ;;  %v2962_v17 = vld [vmem:[#allocation2 + $0xa9] sm:$0xff]  ;;  %v3336_v27 = vld [vmem:[#allocation2 + $0xda] sm:$0xff] }
  0xcd   : > { %4899 = vmatpush3.bf16.msra.mxu0 %v5335_v30  ;;  %v2989_v46 = vpack.c.bf16 %v2963_v36, %v2962_v17  ;;  %v1486_v30 = vld [vmem:[#allocation2 + $0xc8] sm:$0xff]  ;;  %v1511_v17 = vpack.c.bf16 %v1488_v32, %v1487_v31  ;;  %v5480_v36 = vld [vmem:[%s6215_s1 + $0x130] sm:$0xff]   ;;  %v3344_v32 = vld [vmem:[#allocation2 + $0x13a] sm:$0xff] }
  0xce   : > { %4900 = vmatprep.subr.bf16.mxu0 %v5337_v44 }
  0xd0   : > { %4869 = vmatmul.mubr.bf16.gmra.mrb[4].mxu0 %v2987_v34  ;;  %v5479_v34 = vld [vmem:[%s6215_s1 + $0x128] sm:$0xff]  }
  0xd1   : > { %4872 = vmatprep.mubr.bf16.mxu0 %v2988_v35  ;;  %4901 = vmatpush3.bf16.msra.mxu0 %v5337_v44  ;;  %v3323_v44 = vld [vmem:[#allocation2 + $0x3a] sm:$0xff] }
  0xd2   : > { %4902 = vmatprep.subr.bf16.mxu0 %v5339_v9 }
  0xd3   : > { %4645 = vmatmul.mubr.bf16.gmra.mrb[20].mxu1 %v5782_v19  ;;  %v5341_v19 = vld [vmem:[%s6215_s1 + $0x228] sm:$0xff]  }
  0xd4   : > { %4648 = vmatprep.mubr.bf16.mxu1 %v5796_v33  ;;  %v2966_v33 = vld [vmem:[#allocation2 + $0xd9] sm:$0xff] }
  0xd5   : > { %4903 = vmatpush3.bf16.msra.mxu0 %v5339_v9  ;;  %v5946_v47 = vpack.c.bf16 %v2967_v53, %v2966_v33  ;;  %v3326_v33 = vld [vmem:[#allocation2 + $0x62] sm:$0xff]  ;;  %v3327_v53 = vld [vmem:[#allocation2 + $0x6a] sm:$0xff] }
  0xd6   : > { %4904 = vmatprep.subr.bf16.mxu0 %v5340_v63 }
  0xd8   : > { %4873 = vmatmul.mubr.bf16.gmra.mrb[8].mxu0 %v2989_v46  ;;  %v3325_v46 = vld [vmem:[#allocation2 + $0x52] sm:$0xff] }
  0xd9   : > { %4876 = vmatprep.mubr.bf16.mxu0 %v2990_v52  ;;  %4905 = vmatpush3.bf16.msra.mxu0 %v5340_v63  ;;  %v3324_v63 = vld [vmem:[#allocation2 + $0x4a] sm:$0xff] }
  0xda   : > { %4906 = vmatprep.subr.bf16.mxu0 %v5341_v19  ;;  %v1491_v52 = vld [vmem:[#allocation2 + $0x108] sm:$0xff] }
  0xdb   : > { %4649 = vmatmul.mubr.bf16.gmra.mrb[24].mxu1 %v5798_v14  ;;  %v5948_v14 = vpack.c.bf16 %v2969_v55, %v2968_v54  ;;  %v3355_v54 = vpack.c.bf16 %v3325_v46, %v3324_v63 }
  0xdc   : > { %4652 = vmatprep.mubr.bf16.mxu1 %v5810_v38  ;;  %v5344_v38 = vld [vmem:[%s6215_s1 + $0x238] sm:$0xff]  }
  0xdd   : > { %4907 = vmatpush3.bf16.msra.mxu0 %v5341_v19  ;;  %v1492_v19 = vld [vmem:[#allocation2 + $0x110] sm:$0xff] }
  0xde   : > { %4908 = vmatprep.subr.bf16.mxu0 %v5342_v26  ;;  %v1513_v55 = vpack.c.bf16 %v1492_v19, %v1491_v52  ;;  %v1872_v19 = vld [vmem:[#allocation2 + $0x189] sm:$0xff] }
  0xe0   : > { %4877 = vmatmul.mubr.bf16.gmra.mrb[12].mxu0 %v5946_v47 }
  0xe1   : > { %4880 = vmatprep.mubr.bf16.mxu0 %v5948_v14  ;;  %4909 = vmatpush3.bf16.msra.mxu0 %v5342_v26  ;;  %v3356_v26 = vpack.c.bf16 %v3327_v53, %v3326_v33  ;;  %v3353_v33 = vld [vmem:[#allocation2 + $0x1a2] sm:$0xff] }
  0xe2   : > { %4910 = vmatprep.subr.bf16.mxu0 %v5344_v38 }
  0xe3   : > { %4653 = vmatmul.mubr.bf16.gmra.mrb[28].mxu1 %v5812_v39  ;;  %v5958_v39 = vpack.c.bf16 %v2973_v60, %v2972_v22  ;;  %v3357_v60 = vpack.c.bf16 %v3329_v61, %v3328_v56 }
  0xe4   : > { %4672 = vmatprep.mubr.bf16.mxu1 %v1503_v48  ;;  %v1493_v48 = vld [vmem:[#allocation2 + $0x120] sm:$0xff] }
  0xe5   : > { %4911 = vmatpush3.bf16.msra.mxu0 %v5344_v38  ;;  %v1494_v38 = vld [vmem:[#allocation2 + $0x128] sm:$0xff] }
  0xe6   : > { %v1514_v22 = vpack.c.bf16 %v1494_v38, %v1493_v48 }
  0xe8   : > { %4881 = vmatmul.mubr.bf16.gmra.mrb[16].mxu0 %v5956_v42 }
  0xe9   : > { %4884 = vmatprep.mubr.bf16.mxu0 %v5958_v39 }
  0xeb   : > { %4673 = vmatmul.mubr.bf16.vlgmr.msra.gmra.mrb[0].mxu1 %v1504_v10  ;;  %v1515_v10 = vpack.c.bf16 %v1496_v57, %v1495_v0 }
  0xec   : > { %4952 = vmatpush3.bf16.msra.mxu1 %v5922_v45  ;;  %4676 = vmatprep.mubr.bf16.mxu1 %v1505_v49  ;;  %v2982_v45 = vld [vmem:[#allocation2 + $0x199] sm:$0xff]  ;;  %v3358_v49 = vpack.c.bf16 %v3331_v18, %v3330_v59 }
  0xed   : > { %4945 = vmatprep.subr.bf16.mxu1 %v5475_v7  ;;  %v2999_v9 = vpack.c.bf16 %v2983_v1, %v2982_v45  ;;  %v3343_v45 = vld [vmem:[#allocation2 + $0x12a] sm:$0xff] }
  0xf0   : > { %4953 = vmatpush3.bf16.msra.mxu1 %v5475_v7  ;;  %4885 = vmatmul.mubr.bf16.gmra.mrb[20].mxu0 %v5966_v40  ;;  %v3334_v7 = vld [vmem:[#allocation2 + $0xc2] sm:$0xff] }
  0xf1   : > { %4946 = vmatprep.subr.bf16.mxu1 %v5476_v12  ;;  %4888 = vmatprep.mubr.bf16.mxu0 %v5856_v58  ;;  %v1485_v58 = vld [vmem:[#allocation2 + $0xc0] sm:$0xff] }
  0xf2   : > { %v1510_v35 = vpack.c.bf16 %v1486_v30, %v1485_v58  ;;  %v3341_v58 = vld [vmem:[#allocation2 + $0x112] sm:$0xff]  ;;  %v3342_v30 = vld [vmem:[#allocation2 + $0x122] sm:$0xff] }
  0xf3   : > { %4677 = vmatmul.mubr.bf16.gmra.mrb[4].mxu1 %v1506_v23  ;;  %v3335_v23 = vld [vmem:[#allocation2 + $0xca] sm:$0xff]  ;;  %v3364_v31 = vpack.c.bf16 %v3343_v45, %v3342_v30 }
  0xf4   : > { %4680 = vmatprep.mubr.bf16.mxu1 %v1507_v43  ;;  %4954 = vmatpush3.bf16.msra.mxu1 %v5476_v12  ;;  %v1516_v43 = vpack.c.bf16 %v1498_v2, %v1497_v11  ;;  %v3359_v12 = vpack.c.bf16 %v3333_v51, %v3332_v6  ;;  %v3360_v15 = vpack.c.bf16 %v3335_v23, %v3334_v7  ;;  %v6007_v11 = vld [vmem:[%s6216_s2] ss:$0 sm:$0xff] }
  0xf5   : > { %4947 = vmatprep.subr.bf16.mxu1 %v5477_v62 }
  0xf8   : > { %4955 = vmatpush3.bf16.msra.mxu1 %v5477_v62  ;;  %4889 = vmatmul.mubr.bf16.gmra.mrb[24].mxu0 %v5868_v8  ;;  %v3354_v8 = vpack.c.bf16 %v3323_v44, %v3322_v4  ;;  %v3338_v62 = vld [vmem:[#allocation2 + $0xf2] sm:$0xff]  ;;  %v3345_v4 = vld [vmem:[#allocation2 + $0x142] sm:$0xff] }
  0xf9   : > { %4948 = vmatprep.subr.bf16.mxu1 %v5478_v29  ;;  %4892 = vmatprep.mubr.bf16.mxu0 %v5343_v28  ;;  %v3346_v44 = vld [vmem:[#allocation2 + $0x152] sm:$0xff] }
  0xfb   : > { %4681 = vmatmul.mubr.bf16.gmra.mrb[8].mxu1 %v1508_v16  ;;  %v3339_v16 = vld [vmem:[#allocation2 + $0xfa] sm:$0xff] }
  0xfc   : > { %4684 = vmatprep.mubr.bf16.mxu1 %v1509_v25  ;;  %4956 = vmatpush3.bf16.msra.mxu1 %v5478_v29  ;;  %v3361_v25 = vpack.c.bf16 %v3337_v41, %v3336_v27  ;;  %v3362_v28 = vpack.c.bf16 %v3339_v16, %v3338_v62  ;;  %v3340_v29 = vld [vmem:[#allocation2 + $0x10a] sm:$0xff] }
  0xfd   : > { %4949 = vmatprep.subr.bf16.mxu1 %v5479_v34  ;;  %v3363_v1 = vpack.c.bf16 %v3341_v58, %v3340_v29 }
 0x100   : > { %4957 = vmatpush3.bf16.msra.mxu1 %v5479_v34  ;;  %4893 = vmatmul.mubr.bf16.gmra.mrb[28].mxu0 %v2999_v9  ;;  %v3365_v34 = vpack.c.bf16 %v3345_v4, %v3344_v32  ;;  %v1868_v9 = vld [vmem:[#allocation2 + $0x159] sm:$0xff] }
 0x101   : > { %4950 = vmatprep.subr.bf16.mxu1 %v5480_v36  ;;  %4912 = vmatprep.mubr.bf16.mxu0 %v3354_v8  ;;  %v1869_v8 = vld [vmem:[#allocation2 + $0x169] sm:$0xff] }
 0x103   : > { %4685 = vmatmul.mubr.bf16.gmra.mrb[12].mxu1 %v1510_v35 }
 0x104   : > { %4688 = vmatprep.mubr.bf16.mxu1 %v1511_v17  ;;  %4958 = vmatpush3.bf16.msra.mxu1 %v5480_v36  ;;  %v3348_v17 = vld [vmem:[#allocation2 + $0x16a] sm:$0xff] }
 0x105   : > { %4951 = vmatprep.subr.bf16.mxu1 %v5481_v3  ;;  %v1870_v36 = vld [vmem:[#allocation2 + $0x171] sm:$0xff] }
 0x106   : > { %v1887_v46 = vpack.c.bf16 %v1870_v36, %v1869_v8 }
 0x108   : > { %4959 = vmatpush3.bf16.msra.mxu1 %v5481_v3  ;;  %4913 = vmatmul.mubr.bf16.vlgmr.msra.gmra.mrb[0].mxu0 %v3355_v54 }
 0x109   : > { %4916 = vmatprep.mubr.bf16.mxu0 %v3356_v26 }
 0x10b   : > { %4689 = vmatmul.mubr.bf16.gmra.mrb[16].mxu1 %v1512_v21 }
 0x10c   : > { %4692 = vmatprep.mubr.bf16.mxu1 %v1513_v55 }
 0x110   : > { %4917 = vmatmul.mubr.bf16.gmra.mrb[4].mxu0 %v3357_v60 }
 0x111   : > { %4920 = vmatprep.mubr.bf16.mxu0 %v3358_v49 }
 0x113   : > { %4693 = vmatmul.mubr.bf16.gmra.mrb[20].mxu1 %v1514_v22 }
 0x114   : > { %4696 = vmatprep.mubr.bf16.mxu1 %v1515_v10 }
 0x118   : > { %4921 = vmatmul.mubr.bf16.gmra.mrb[8].mxu0 %v3359_v12 }
 0x119   : > { %4924 = vmatprep.mubr.bf16.mxu0 %v3360_v15 }
 0x11b   : > { %4697 = vmatmul.mubr.bf16.gmra.mrb[24].mxu1 %v1516_v43 }
 0x11c   : > { %4700 = vmatprep.mubr.bf16.mxu1 %v1517_v13 }
 0x120   : > { %4925 = vmatmul.mubr.bf16.gmra.mrb[12].mxu0 %v3361_v25 }
 0x121   : > { %4928 = vmatprep.mubr.bf16.mxu0 %v3362_v28 }
 0x123   : > { %4701 = vmatmul.mubr.bf16.gmra.mrb[28].mxu1 %v5899_v24  ;;  %v3347_v24 = vld [vmem:[#allocation2 + $0x15a] sm:$0xff] }
 0x124   : > { %4736 = vmatprep.mubr.bf16.mxu1 %v5946_v47  ;;  %v3366_v35 = vpack.c.bf16 %v3347_v24, %v3346_v44  ;;  %v1867_v47 = vld [vmem:[#allocation2 + $0x151] sm:$0xff] }
 0x125   : > { %v1886_v50 = vpack.c.bf16 %v1868_v9, %v1867_v47 }
 0x128   : > { %4929 = vmatmul.mubr.bf16.gmra.mrb[16].mxu0 %v3363_v1 }
 0x129   : > { %4932 = vmatprep.mubr.bf16.mxu0 %v3364_v31 }
 0x12b   : > { %4737 = vmatmul.mubr.bf16.vlgmr.msra.gmra.mrb[16].mxu1 %v5948_v14  ;;  %v3349_v14 = vld [vmem:[#allocation2 + $0x172] sm:$0xff] }
 0x12c   : > { %4740 = vmatprep.mubr.bf16.mxu1 %v5956_v42  ;;  %v3350_v42 = vld [vmem:[#allocation2 + $0x182] sm:$0xff]  ;;  %v3367_v63 = vpack.c.bf16 %v3349_v14, %v3348_v17 }
 0x12d   : > { %v3368_v52 = vpack.c.bf16 %v3351_v37, %v3350_v42 }
 0x130   : > { %4933 = vmatmul.mubr.bf16.gmra.mrb[20].mxu0 %v3365_v34 }
 0x131   : > { %4936 = vmatprep.mubr.bf16.mxu0 %v3366_v35 }
 0x133   : > { %4741 = vmatmul.mubr.bf16.gmra.mrb[20].mxu1 %v5958_v39  ;;  %v1871_v39 = vld [vmem:[#allocation2 + $0x181] sm:$0xff] }
 0x134   : > { %4744 = vmatprep.mubr.bf16.mxu1 %v5966_v40  ;;  %v3352_v40 = vld [vmem:[#allocation2 + $0x19a] sm:$0xff]  ;;  %v1888_v53 = vpack.c.bf16 %v1872_v19, %v1871_v39 }
 0x135   : > { %v3369_v3 = vpack.c.bf16 %v3353_v33, %v3352_v40 }
 0x138   : > { %4937 = vmatmul.mubr.bf16.gmra.mrb[24].mxu0 %v3367_v63 }
 0x139   : > { %4940 = vmatprep.mubr.bf16.mxu0 %v3368_v52 }
 0x13b   : > { %4745 = vmatmul.mubr.bf16.gmra.mrb[24].mxu1 %v1886_v50 }
 0x13c   : > { %4748 = vmatprep.mubr.bf16.mxu1 %v1887_v46 }
 0x140   : > { %4941 = vmatmul.mubr.bf16.gmra.mrb[28].mxu0 %v3369_v3 }
 0x143   : > { %4749 = vmatmul.mubr.bf16.gmra.mrb[28].mxu1 %v1888_v53 }
 0x1be   : > { %v4674_v21 = vpop.f32.mrb[0].mxu1 }
 0x1bf   : > { %v1650_v54 = vpop.f32.mrb[1].mxu1  ;;  %v4960_v2 = vadd.f32 %v4674_v21, %v6007_v11 }
 0x1c0   : > { %v4675_v55 = vpop.f32.mrb[2].mxu1  ;;  %v4962_v6 = vadd.f32 %v6007_v11, %v1650_v54 }
 0x1c1   : > { %v1653_v26 = vpop.f32.mrb[3].mxu1  ;;  %v4964_v5 = vadd.f32 %v4675_v55, %v6007_v11 }
 0x1c2   : > { %v4966_v23 = vadd.f32 %v6007_v11, %v1653_v26 }
 0x1c6   : > { %v4678_v48 = vpop.f32.mrb[4].mxu1 }
 0x1c7   : > { %v1666_v38 = vpop.f32.mrb[5].mxu1  ;;  %v4968_v58 = vadd.f32 %v4678_v48, %v6007_v11 }
 0x1c8   : > { %v4679_v56 = vpop.f32.mrb[6].mxu1  ;;  %v4970_v45 = vadd.f32 %v6007_v11, %v1666_v38 }
 0x1c9   : > { %v1669_v61 = vpop.f32.mrb[7].mxu1  ;;  %v4972_v32 = vadd.f32 %v4679_v56, %v6007_v11 }
 0x1ca   : > { %v4974_v24 = vadd.f32 %v6007_v11, %v1669_v61 }
 0x1ce   : > { %v4682_v0 = vpop.f32.mrb[8].mxu1 }
 0x1cf   : > { %v1682_v57 = vpop.f32.mrb[9].mxu1  ;;  %v4976_v63 = vadd.f32 %v4682_v0, %v6007_v11 }
 0x1d0   : > { %v4683_v59 = vpop.f32.mrb[10].mxu1  ;;  %v4978_v52 = vadd.f32 %v6007_v11, %v1682_v57 }
 0x1d1   : > { %v1685_v18 = vpop.f32.mrb[11].mxu1  ;;  %v4980_v33 = vadd.f32 %v4683_v59, %v6007_v11 }
 0x1d2   : > { %v4982_v54 = vadd.f32 %v6007_v11, %v1685_v18 }
 0x1d6   : > { %v5996_v22 = vpop.f32.mrb[12].mxu1 }
 0x1d7   : > { %v5998_v60 = vpop.f32.mrb[13].mxu1 }
 0x1d8   : > { %v6000_v10 = vpop.f32.mrb[14].mxu1 }
 0x1d9   : > { %v6002_v49 = vpop.f32.mrb[15].mxu1 }
 0x1db   : > { %v4914_v51 = vpop.f32.mrb[0].mxu0 }
 0x1dc   : > { %v6012_v20 = vadd.f32 %v4960_v2, %v4914_v51  ;;  %v3501_v7 = vpop.f32.mrb[1].mxu0 }
 0x1dd   : > { %v6015_v43 = vadd.f32 %v4962_v6, %v3501_v7  ;;  %v4915_v12 = vpop.f32.mrb[2].mxu0 }
 0x1de   : > { %v3726_v13 = vsub.f32 0.0, %v6012_v20  ;;  %v6018_v15 = vadd.f32 %v4964_v5, %v4915_v12  ;;  %v3504_v27 = vpop.f32.mrb[3].mxu0 }
 0x1df   : > { %v3724_v41 = vsub.f32 0.0, %v6015_v43  ;;  %v6021_v62 = vadd.f32 %v4966_v23, %v3504_v27 }
 0x1e0   : > { %v3760_v16 = vmul.f32 1.442695, %v3726_v13  ;;  %v3727_v25 = vsub.f32 0.0, %v6018_v15  ;;  %v4984_v13 = vadd.f32 %v5996_v22, %v6007_v11  ;;  %v4990_v22 = vadd.f32 %v6007_v11, %v6002_v49 }
 0x1e1   : > { %v3756_v28 = vmul.f32 1.442695, %v3724_v41  ;;  %v3725_v29 = vsub.f32 0.0, %v6021_v62  ;;  %v4986_v41 = vadd.f32 %v6007_v11, %v5998_v60 }
 0x1e2   : > { %5345 = vpow2.f32 %v3760_v16  ;;  %v3762_v30 = vmul.f32 1.442695, %v3727_v25 }
 0x1e3   : > { %5347 = vpow2.f32 %v3756_v28  ;;  %v3758_v1 = vmul.f32 1.442695, %v3725_v29  ;;  %v4918_v31 = vpop.f32.mrb[4].mxu0  ;;  %v4988_v29 = vadd.f32 %v6000_v10, %v6007_v11 }
 0x1e4   : > { %5349 = vpow2.f32 %v3762_v30  ;;  %v6028_v4 = vadd.f32 %v4968_v58, %v4918_v31  ;;  %v3517_v44 = vpop.f32.mrb[5].mxu0 }
 0x1e5   : > { %5351 = vpow2.f32 %v3758_v1  ;;  %v6031_v34 = vadd.f32 %v4970_v45, %v3517_v44  ;;  %v4919_v35 = vpop.f32.mrb[6].mxu0 }
 0x1e6   : > { %v3730_v47 = vsub.f32 0.0, %v6028_v4  ;;  %v6034_v9 = vadd.f32 %v4972_v32, %v4919_v35  ;;  %v3520_v17 = vpop.f32.mrb[7].mxu0 }
 0x1e7   : > { %v3728_v14 = vsub.f32 0.0, %v6031_v34  ;;  %v6037_v8 = vadd.f32 %v4974_v24, %v3520_v17 }
 0x1e8   : > { %v3768_v36 = vmul.f32 1.442695, %v3730_v47  ;;  %v3731_v42 = vsub.f32 0.0, %v6034_v9 }
 0x1e9   : > { %v3764_v37 = vmul.f32 1.442695, %v3728_v14  ;;  %v3729_v50 = vsub.f32 0.0, %v6037_v8 }
 0x1ea   : > { %5353 = vpow2.f32 %v3768_v36  ;;  %v3770_v46 = vmul.f32 1.442695, %v3731_v42 }
 0x1eb   : > { %5355 = vpow2.f32 %v3764_v37  ;;  %v3766_v39 = vmul.f32 1.442695, %v3729_v50  ;;  %v4922_v19 = vpop.f32.mrb[8].mxu0 }
 0x1ec   : > { %v5346_v40 = vpop.eup %5345  ;;  %5357 = vpow2.f32 %v3770_v46  ;;  %v6044_v53 = vadd.f32 %v4976_v63, %v4922_v19  ;;  %v3533_v3 = vpop.f32.mrb[9].mxu0 }
 0x1ed   : > { %v5348_v21 = vpop.eup %5347  ;;  %v3822_v55 = vadd.f32 1.0, %v5346_v40  ;;  %5359 = vpow2.f32 %v3766_v39  ;;  %v6047_v26 = vadd.f32 %v4978_v52, %v3533_v3  ;;  %v4923_v48 = vpop.f32.mrb[10].mxu0 }
 0x1ee   : > { %v5350_v38 = vpop.eup %5349  ;;  %v3820_v56 = vadd.f32 1.0, %v5348_v21  ;;  %v3734_v61 = vsub.f32 0.0, %v6044_v53  ;;  %v6050_v0 = vadd.f32 %v4980_v33, %v4923_v48  ;;  %v3536_v57 = vpop.f32.mrb[11].mxu0 }
 0x1ef   : > { %v5352_v59 = vpop.eup %5351  ;;  %5361 = vrcp.f32 %v3822_v55  ;;  %v3823_v2 = vadd.f32 1.0, %v5350_v38  ;;  %v3732_v6 = vsub.f32 0.0, %v6047_v26  ;;  %v6053_v51 = vadd.f32 %v4982_v54, %v3536_v57 }
 0x1f0   : > { %5363 = vrcp.f32 %v3820_v56  ;;  %v3821_v18 = vadd.f32 1.0, %v5352_v59  ;;  %v3776_v5 = vmul.f32 1.442695, %v3734_v61  ;;  %v3735_v7 = vsub.f32 0.0, %v6050_v0 }
 0x1f1   : > { %5365 = vrcp.f32 %v3823_v2  ;;  %v3772_v23 = vmul.f32 1.442695, %v3732_v6  ;;  %v3733_v12 = vsub.f32 0.0, %v6053_v51 }
 0x1f2   : > { %5367 = vrcp.f32 %v3821_v18  ;;  %v3778_v27 = vmul.f32 1.442695, %v3735_v7 }
 0x1f3   : > { %5369 = vpow2.f32 %v3776_v5  ;;  %v3774_v16 = vmul.f32 1.442695, %v3733_v12  ;;  %v4926_v25 = vpop.f32.mrb[12].mxu0 }
 0x1f4   : > { %v5354_v28 = vpop.eup %5353  ;;  %5371 = vpow2.f32 %v3772_v23  ;;  %v6063_v58 = vadd.f32 %v4984_v13, %v4926_v25  ;;  %v3549_v30 = vpop.f32.mrb[13].mxu0 }
 0x1f5   : > { %v5356_v45 = vpop.eup %5355  ;;  %v3826_v1 = vadd.f32 1.0, %v5354_v28  ;;  %5373 = vpow2.f32 %v3778_v27  ;;  %v6067_v31 = vadd.f32 %v4986_v41, %v3549_v30  ;;  %v4927_v60 = vpop.f32.mrb[14].mxu0 }
 0x1f6   : > { %v5358_v32 = vpop.eup %5357  ;;  %v3824_v44 = vadd.f32 1.0, %v5356_v45  ;;  %5375 = vpow2.f32 %v3774_v16  ;;  %v3738_v24 = vsub.f32 0.0, %v6063_v58  ;;  %v6071_v10 = vadd.f32 %v4988_v29, %v4927_v60  ;;  %v3552_v35 = vpop.f32.mrb[15].mxu0 }
 0x1f7   : > { %v5360_v47 = vpop.eup %5359  ;;  %5377 = vrcp.f32 %v3826_v1  ;;  %v3827_v17 = vadd.f32 1.0, %v5358_v32  ;;  %v3736_v14 = vsub.f32 0.0, %v6067_v31  ;;  %v6074_v49 = vadd.f32 %v4990_v22, %v3552_v35 }
 0x1f8   : > { %5379 = vrcp.f32 %v3824_v44  ;;  %v3825_v36 = vadd.f32 1.0, %v5360_v47  ;;  %v3784_v42 = vmul.f32 1.442695, %v3738_v24  ;;  %v3739_v37 = vsub.f32 0.0, %v6071_v10 }
 0x1f9   : > { %v5362_v50 = vpop.eup %5361  ;;  %5381 = vrcp.f32 %v3827_v17  ;;  %v3780_v63 = vmul.f32 1.442695, %v3736_v14  ;;  %v3737_v46 = vsub.f32 0.0, %v6074_v49 }
 0x1fa   : > { %v5364_v52 = vpop.eup %5363  ;;  %v3886_v39 = vmul.f32 %v5362_v50, %v6012_v20  ;;  %5383 = vrcp.f32 %v3825_v36  ;;  %v3786_v19 = vmul.f32 1.442695, %v3739_v37 }
 0x1fb   : > { %v5366_v33 = vpop.eup %5365  ;;  %v3884_v3 = vmul.f32 %v5364_v52, %v6015_v43  ;;  %5385 = vpow2.f32 %v3784_v42  ;;  %v3782_v21 = vmul.f32 1.442695, %v3737_v46  ;;  %v4930_v55 = vpop.f32.mrb[16].mxu0 }
 0x1fc   : > { %v5368_v38 = vpop.eup %5367  ;;  %3918 = vst [vmem:[%s6080_s9 + $0x10] sm:$0xff] %v3886_v39  ;;  %v3887_v56 = vmul.f32 %v5366_v33, %v6018_v15  ;;  %5387 = vpow2.f32 %v3780_v63  ;;  %v3565_v61 = vpop.f32.mrb[17].mxu0 }
 0x1fd   : > { %v5370_v59 = vpop.eup %5369  ;;  %3916 = vst [vmem:[%s6080_s9] sm:$0xff] %v3884_v3  ;;  %v3885_v43 = vmul.f32 %v5368_v38, %v6021_v62  ;;  %5389 = vpow2.f32 %v3786_v19  ;;  %v4931_v18 = vpop.f32.mrb[18].mxu0 }
 0x1fe   : > { %v4738_v40 = vpop.f32.mrb[16].mxu1  ;;  %v5372_v7 = vpop.eup %5371  ;;  %3919 = vst [vmem:[%s6080_s9 + $0x18] sm:$0xff] %v3887_v56  ;;  %v3830_v15 = vadd.f32 1.0, %v5370_v59  ;;  %5391 = vpow2.f32 %v3782_v21 }
 0x1ff   : > { %v4992_v54 = vadd.f32 %v4738_v40, %v6007_v11  ;;  %v2084_v48 = vpop.f32.mrb[17].mxu1  ;;  %v3568_v13 = vpop.f32.mrb[19].mxu0  ;;  %3917 = vst [vmem:[%s6080_s9 + $0x8] sm:$0xff] %v3885_v43  ;;  %v3828_v41 = vadd.f32 1.0, %v5372_v7 }
 0x200   : > { %v4994_v20 = vadd.f32 %v6007_v11, %v2084_v48  ;;  %v4739_v57 = vpop.f32.mrb[18].mxu1  ;;  %v5374_v27 = vpop.eup %5373  ;;  %5393 = vrcp.f32 %v3830_v15 }
 0x201   : > { %v6091_v2 = vadd.f32 %v4992_v54, %v4930_v55  ;;  %v4996_v6 = vadd.f32 %v4739_v57, %v6007_v11  ;;  %v2087_v5 = vpop.f32.mrb[19].mxu1  ;;  %v5376_v25 = vpop.eup %5375  ;;  %v3831_v28 = vadd.f32 1.0, %v5374_v27  ;;  %5395 = vrcp.f32 %v3828_v41 }
 0x202   : > { %v6095_v23 = vadd.f32 %v4994_v20, %v3565_v61  ;;  %v4998_v12 = vadd.f32 %v6007_v11, %v2087_v5  ;;  %v5378_v45 = vpop.eup %5377  ;;  %v3829_v22 = vadd.f32 1.0, %v5376_v25 }
 0x203   : > { %v3742_v62 = vsub.f32 0.0, %v6091_v2  ;;  %v6100_v16 = vadd.f32 %v4996_v6, %v4931_v18  ;;  %v5380_v32 = vpop.eup %5379  ;;  %v3890_v44 = vmul.f32 %v5378_v45, %v6028_v4  ;;  %5397 = vrcp.f32 %v3831_v28  ;;  %v4934_v37 = vpop.f32.mrb[20].mxu0 }
 0x204   : > { %v3740_v29 = vsub.f32 0.0, %v6095_v23  ;;  %v6103_v30 = vadd.f32 %v4998_v12, %v3568_v13  ;;  %v5382_v17 = vpop.eup %5381  ;;  %v3888_v14 = vmul.f32 %v5380_v32, %v6031_v34  ;;  %5399 = vrcp.f32 %v3829_v22  ;;  %v3581_v39 = vpop.f32.mrb[21].mxu0 }
 0x205   : > { %v3792_v1 = vmul.f32 1.442695, %v3742_v62  ;;  %v3743_v60 = vsub.f32 0.0, %v6100_v16  ;;  %v5384_v63 = vpop.eup %5383  ;;  %3922 = vst [vmem:[%s6080_s9 + $0x30] sm:$0xff] %v3890_v44  ;;  %v3891_v4 = vmul.f32 %v5382_v17, %v6034_v9  ;;  %v4935_v21 = vpop.f32.mrb[22].mxu0 }
 0x206   : > { %v3788_v24 = vmul.f32 1.442695, %v3740_v29  ;;  %v3741_v35 = vsub.f32 0.0, %v6103_v30  ;;  %v4742_v47 = vpop.f32.mrb[20].mxu1  ;;  %v5386_v40 = vpop.eup %5385  ;;  %3920 = vst [vmem:[%s6080_s9 + $0x20] sm:$0xff] %v3888_v14  ;;  %v3889_v34 = vmul.f32 %v5384_v63, %v6037_v8 }
 0x207   : > { %v3794_v36 = vmul.f32 1.442695, %v3743_v60  ;;  %v5000_v42 = vadd.f32 %v4742_v47, %v6007_v11  ;;  %v2100_v50 = vpop.f32.mrb[21].mxu1  ;;  %5401 = vpow2.f32 %v3792_v1  ;;  %v5388_v55 = vpop.eup %5387  ;;  %3923 = vst [vmem:[%s6080_s9 + $0x38] sm:$0xff] %v3891_v4  ;;  %v3834_v9 = vadd.f32 1.0, %v5386_v40 }
 0x208   : > { %v3790_v46 = vmul.f32 1.442695, %v3741_v35  ;;  %v5002_v52 = vadd.f32 %v6007_v11, %v2100_v50  ;;  %v4743_v19 = vpop.f32.mrb[22].mxu1  ;;  %5403 = vpow2.f32 %v3788_v24  ;;  %v3584_v56 = vpop.f32.mrb[23].mxu0  ;;  %3921 = vst [vmem:[%s6080_s9 + $0x28] sm:$0xff] %v3889_v34  ;;  %v3832_v61 = vadd.f32 1.0, %v5388_v55 }
 0x209   : > { %v6115_v33 = vadd.f32 %v5000_v42, %v4934_v37  ;;  %v5004_v3 = vadd.f32 %v4743_v19, %v6007_v11  ;;  %v2103_v54 = vpop.f32.mrb[23].mxu1  ;;  %5405 = vpow2.f32 %v3794_v36  ;;  %v5390_v20 = vpop.eup %5389 }
 0x20a   : > { %v6119_v48 = vadd.f32 %v5002_v52, %v3581_v39  ;;  %v5006_v38 = vadd.f32 %v6007_v11, %v2103_v54  ;;  %5407 = vpow2.f32 %v3790_v46  ;;  %v5392_v59 = vpop.eup %5391  ;;  %v3835_v43 = vadd.f32 1.0, %v5390_v20 }
 0x20b   : > { %v3746_v8 = vsub.f32 0.0, %v6115_v33  ;;  %v6124_v57 = vadd.f32 %v5004_v3, %v4935_v21  ;;  %5409 = vrcp.f32 %v3834_v9  ;;  %v3833_v5 = vadd.f32 1.0, %v5392_v59  ;;  %v5394_v12 = vpop.eup %5393  ;;  %v4938_v45 = vpop.f32.mrb[24].mxu0 }
 0x20c   : > { %v3744_v6 = vsub.f32 0.0, %v6119_v48  ;;  %v6127_v18 = vadd.f32 %v5006_v38, %v3584_v56  ;;  %5411 = vrcp.f32 %v3832_v61  ;;  %v5396_v62 = vpop.eup %5395  ;;  %v3894_v25 = vmul.f32 %v5394_v12, %v6044_v53  ;;  %v3597_v24 = vpop.f32.mrb[25].mxu0 }
 0x20d   : > { %v3800_v7 = vmul.f32 1.442695, %v3746_v8  ;;  %v3747_v15 = vsub.f32 0.0, %v6124_v57  ;;  %5413 = vrcp.f32 %v3835_v43  ;;  %v5398_v1 = vpop.eup %5397  ;;  %v3892_v60 = vmul.f32 %v5396_v62, %v6047_v26  ;;  %v4939_v36 = vpop.f32.mrb[26].mxu0 }
 0x20e   : > { %v3796_v13 = vmul.f32 1.442695, %v3744_v6  ;;  %v3745_v27 = vsub.f32 0.0, %v6127_v18  ;;  %v4746_v41 = vpop.f32.mrb[24].mxu1  ;;  %5415 = vrcp.f32 %v3833_v5  ;;  %v5400_v47 = vpop.eup %5399  ;;  %3926 = vst [vmem:[%s6080_s9 + $0x50] sm:$0xff] %v3894_v25  ;;  %v3895_v53 = vmul.f32 %v5398_v1, %v6050_v0 }
 0x20f   : > { %v3802_v28 = vmul.f32 1.442695, %v3747_v15  ;;  %v5008_v29 = vadd.f32 %v4746_v41, %v6007_v11  ;;  %v2116_v22 = vpop.f32.mrb[25].mxu1  ;;  %5417 = vpow2.f32 %v3800_v7  ;;  %3924 = vst [vmem:[%s6080_s9 + $0x40] sm:$0xff] %v3892_v60  ;;  %v3893_v37 = vmul.f32 %v5400_v47, %v6053_v51  ;;  %v3600_v4 = vpop.f32.mrb[27].mxu0 }
 0x210   : > { %v3798_v32 = vmul.f32 1.442695, %v3745_v27  ;;  %v5010_v44 = vadd.f32 %v6007_v11, %v2116_v22  ;;  %v4747_v35 = vpop.f32.mrb[26].mxu1  ;;  %5419 = vpow2.f32 %v3796_v13  ;;  %3927 = vst [vmem:[%s6080_s9 + $0x58] sm:$0xff] %v3895_v53 }
 0x211   : > { %v6137_v17 = vadd.f32 %v5008_v29, %v4938_v45  ;;  %v5012_v14 = vadd.f32 %v4747_v35, %v6007_v11  ;;  %v2119_v42 = vpop.f32.mrb[27].mxu1  ;;  %v5402_v26 = vpop.eup %5401  ;;  %5421 = vpow2.f32 %v3802_v28  ;;  %3925 = vst [vmem:[%s6080_s9 + $0x48] sm:$0xff] %v3893_v37 }
 0x212   : > { %v6142_v50 = vadd.f32 %v5010_v44, %v3597_v24  ;;  %v5014_v63 = vadd.f32 %v6007_v11, %v2119_v42  ;;  %v5404_v46 = vpop.eup %5403  ;;  %v3838_v0 = vadd.f32 1.0, %v5402_v26  ;;  %5423 = vpow2.f32 %v3798_v32 }
 0x213   : > { %v3750_v52 = vsub.f32 0.0, %v6137_v17  ;;  %v6147_v39 = vadd.f32 %v5012_v14, %v4939_v36  ;;  %v5406_v19 = vpop.eup %5405  ;;  %v3836_v40 = vadd.f32 1.0, %v5404_v46  ;;  %v4942_v5 = vpop.f32.mrb[28].mxu0 }
 0x214   : > { %v3748_v34 = vsub.f32 0.0, %v6142_v50  ;;  %v6151_v51 = vadd.f32 %v5014_v63, %v3600_v4  ;;  %v5408_v3 = vpop.eup %5407  ;;  %5425 = vrcp.f32 %v3838_v0  ;;  %v3839_v21 = vadd.f32 1.0, %v5406_v19  ;;  %v3613_v41 = vpop.f32.mrb[29].mxu0 }
 0x215   : > { %v3808_v54 = vmul.f32 1.442695, %v3750_v52  ;;  %v3751_v55 = vsub.f32 0.0, %v6147_v39  ;;  %v5410_v9 = vpop.eup %5409  ;;  %5427 = vrcp.f32 %v3836_v40  ;;  %v3837_v38 = vadd.f32 1.0, %v5408_v3  ;;  %v4943_v45 = vpop.f32.mrb[30].mxu0 }
 0x216   : > { %v3804_v56 = vmul.f32 1.442695, %v3748_v34  ;;  %v3749_v20 = vsub.f32 0.0, %v6151_v51  ;;  %v4750_v61 = vpop.f32.mrb[28].mxu1  ;;  %v5412_v8 = vpop.eup %5411  ;;  %v3898_v59 = vmul.f32 %v5410_v9, %v6063_v58  ;;  %5429 = vrcp.f32 %v3839_v21 }
 0x217   : > { %v3810_v43 = vmul.f32 1.442695, %v3751_v55  ;;  %v5016_v6 = vadd.f32 %v4750_v61, %v6007_v11  ;;  %v2132_v7 = vpop.f32.mrb[29].mxu1  ;;  %v5414_v15 = vpop.eup %5413  ;;  %v3896_v12 = vmul.f32 %v5412_v8, %v6067_v31  ;;  %5431 = vrcp.f32 %v3837_v38 }
 0x218   : > { %v3806_v13 = vmul.f32 1.442695, %v3749_v20  ;;  %v5018_v27 = vadd.f32 %v6007_v11, %v2132_v7  ;;  %v4751_v62 = vpop.f32.mrb[30].mxu1  ;;  %v5416_v25 = vpop.eup %5415  ;;  %3930 = vst [vmem:[%s6080_s9 + $0x70] sm:$0xff] %v3898_v59  ;;  %v3899_v58 = vmul.f32 %v5414_v15, %v6071_v10  ;;  %5433 = vpow2.f32 %v3808_v54 }
 0x219   : > { %v6161_v28 = vadd.f32 %v5016_v6, %v4942_v5  ;;  %v5020_v29 = vadd.f32 %v4751_v62, %v6007_v11  ;;  %v2135_v22 = vpop.f32.mrb[31].mxu1  ;;  %v5418_v31 = vpop.eup %5417  ;;  %3928 = vst [vmem:[%s6080_s9 + $0x60] sm:$0xff] %v3896_v12  ;;  %v3897_v1 = vmul.f32 %v5416_v25, %v6074_v49  ;;  %5435 = vpow2.f32 %v3804_v56 }
 0x21a   : > { %v6166_v60 = vadd.f32 %v5018_v27, %v3613_v41  ;;  %v5022_v32 = vadd.f32 %v6007_v11, %v2135_v22  ;;  %v3616_v44 = vpop.f32.mrb[31].mxu0  ;;  %v5420_v24 = vpop.eup %5419  ;;  %3931 = vst [vmem:[%s6080_s9 + $0x78] sm:$0xff] %v3899_v58  ;;  %v3842_v10 = vadd.f32 1.0, %v5418_v31  ;;  %5437 = vpow2.f32 %v3810_v43 }
 0x21b   : > { %v3754_v35 = vsub.f32 0.0, %v6161_v28  ;;  %v6171_v47 = vadd.f32 %v5020_v29, %v4943_v45  ;;  %v5422_v53 = vpop.eup %5421  ;;  %3929 = vst [vmem:[%s6080_s9 + $0x68] sm:$0xff] %v3897_v1  ;;  %v3840_v14 = vadd.f32 1.0, %v5420_v24  ;;  %5439 = vpow2.f32 %v3806_v13 }
 0x21c   : > { %v3752_v49 = vsub.f32 0.0, %v6166_v60  ;;  %v6175_v36 = vadd.f32 %v5022_v32, %v3616_v44  ;;  %v5424_v42 = vpop.eup %5423  ;;  %5441 = vrcp.f32 %v3842_v10  ;;  %v3843_v11 = vadd.f32 1.0, %v5422_v53 }
 0x21d   : > { %v3816_v26 = vmul.f32 1.442695, %v3754_v35  ;;  %v3755_v37 = vsub.f32 0.0, %v6171_v47  ;;  %5443 = vrcp.f32 %v3840_v14  ;;  %v3841_v63 = vadd.f32 1.0, %v5424_v42 }
 0x21e   : > { %v3812_v4 = vmul.f32 1.442695, %v3752_v49  ;;  %v3753_v46 = vsub.f32 0.0, %v6175_v36  ;;  %v5426_v0 = vpop.eup %5425  ;;  %5445 = vrcp.f32 %v3843_v11 }
 0x21f   : > { %v3818_v52 = vmul.f32 1.442695, %v3755_v37  ;;  %v5428_v19 = vpop.eup %5427  ;;  %v3902_v40 = vmul.f32 %v5426_v0, %v6091_v2  ;;  %5447 = vrcp.f32 %v3841_v63 }
 0x220   : > { %v3814_v34 = vmul.f32 1.442695, %v3753_v46  ;;  %v5430_v3 = vpop.eup %5429  ;;  %v3900_v21 = vmul.f32 %v5428_v19, %v6095_v23  ;;  %5449 = vpow2.f32 %v3816_v26 }
 0x221   : > { %v5432_v54 = vpop.eup %5431  ;;  %3934 = vst [vmem:[%s6080_s9 + $0x90] sm:$0xff] %v3902_v40  ;;  %v3903_v55 = vmul.f32 %v5430_v3, %v6100_v16  ;;  %5451 = vpow2.f32 %v3812_v4 }
 0x222   : > { %v5434_v9 = vpop.eup %5433  ;;  %3932 = vst [vmem:[%s6080_s9 + $0x80] sm:$0xff] %v3900_v21  ;;  %v3901_v38 = vmul.f32 %v5432_v54, %v6103_v30  ;;  %5453 = vpow2.f32 %v3818_v52 }
 0x223   : > { %v5436_v56 = vpop.eup %5435  ;;  %3935 = vst [vmem:[%s6080_s9 + $0x98] sm:$0xff] %v3903_v55  ;;  %v3846_v2 = vadd.f32 1.0, %v5434_v9  ;;  %5455 = vpow2.f32 %v3814_v34 }
 0x224   : > { %v5438_v20 = vpop.eup %5437  ;;  %3933 = vst [vmem:[%s6080_s9 + $0x88] sm:$0xff] %v3901_v38  ;;  %v3844_v61 = vadd.f32 1.0, %v5436_v56 }
 0x225   : > { %v5440_v23 = vpop.eup %5439  ;;  %5457 = vrcp.f32 %v3846_v2  ;;  %v3847_v8 = vadd.f32 1.0, %v5438_v20 }
 0x226   : > { %v5442_v59 = vpop.eup %5441  ;;  %5459 = vrcp.f32 %v3844_v61  ;;  %v3845_v16 = vadd.f32 1.0, %v5440_v23 }
 0x227   : > { %v5444_v43 = vpop.eup %5443  ;;  %v3906_v30 = vmul.f32 %v5442_v59, %v6115_v33  ;;  %5461 = vrcp.f32 %v3847_v8 }
 0x228   : > { %v5446_v6 = vpop.eup %5445  ;;  %v3904_v5 = vmul.f32 %v5444_v43, %v6119_v48  ;;  %5463 = vrcp.f32 %v3845_v16 }
 0x229   : > { %v5448_v7 = vpop.eup %5447  ;;  %3938 = vst [vmem:[%s6080_s9 + $0xb0] sm:$0xff] %v3906_v30  ;;  %v3907_v15 = vmul.f32 %v5446_v6, %v6124_v57 }
 0x22a   : > { %v5450_v12 = vpop.eup %5449  ;;  %3936 = vst [vmem:[%s6080_s9 + $0xa0] sm:$0xff] %v3904_v5  ;;  %v3905_v13 = vmul.f32 %v5448_v7, %v6127_v18 }
 0x22b   : > { %v5452_v27 = vpop.eup %5451  ;;  %3939 = vst [vmem:[%s6080_s9 + $0xb8] sm:$0xff] %v3907_v15  ;;  %v3850_v41 = vadd.f32 1.0, %v5450_v12 }
 0x22c   : > { %v5454_v62 = vpop.eup %5453  ;;  %3937 = vst [vmem:[%s6080_s9 + $0xa8] sm:$0xff] %v3905_v13  ;;  %v3848_v33 = vadd.f32 1.0, %v5452_v27 }
 0x22d   : > { %v5456_v25 = vpop.eup %5455  ;;  %5465 = vrcp.f32 %v3850_v41  ;;  %v3851_v48 = vadd.f32 1.0, %v5454_v62 }
 0x22e   : > { %5467 = vrcp.f32 %v3848_v33  ;;  %v3849_v58 = vadd.f32 1.0, %v5456_v25 }
 0x22f   : > { %v5458_v57 = vpop.eup %5457  ;;  %5469 = vrcp.f32 %v3851_v48 }
 0x230   : > { %v5460_v29 = vpop.eup %5459  ;;  %v3910_v18 = vmul.f32 %v5458_v57, %v6137_v17  ;;  %5471 = vrcp.f32 %v3849_v58 }
 0x231   : > { %v5462_v45 = vpop.eup %5461  ;;  %v3908_v22 = vmul.f32 %v5460_v29, %v6142_v50 }
 0x232   : > { %v5464_v31 = vpop.eup %5463  ;;  %3942 = vst [vmem:[%s6080_s9 + $0xd0] sm:$0xff] %v3910_v18  ;;  %v3911_v1 = vmul.f32 %v5462_v45, %v6147_v39 }
 0x233   : > { %3940 = vst [vmem:[%s6080_s9 + $0xc0] sm:$0xff] %v3908_v22  ;;  %v3909_v32 = vmul.f32 %v5464_v31, %v6151_v51 }
 0x234   : > { %3943 = vst [vmem:[%s6080_s9 + $0xd8] sm:$0xff] %v3911_v1 }
 0x235   : > { %3941 = vst [vmem:[%s6080_s9 + $0xc8] sm:$0xff] %v3909_v32 }
 0x237   : > { %v5466_v44 = vpop.eup %5465 }
 0x238   : > { %v5468_v24 = vpop.eup %5467  ;;  %v3914_v17 = vmul.f32 %v5466_v44, %v6161_v28 }
 0x239   : > { %v5470_v10 = vpop.eup %5469  ;;  %v3912_v35 = vmul.f32 %v5468_v24, %v6166_v60 }
 0x23a   : > { %v5472_v50 = vpop.eup %5471  ;;  %3946 = vst [vmem:[%s6080_s9 + $0xf0] sm:$0xff] %v3914_v17  ;;  %v3915_v53 = vmul.f32 %v5470_v10, %v6171_v47 }
 0x23b   : > { %3944 = vst [vmem:[%s6080_s9 + $0xe0] sm:$0xff] %v3912_v35  ;;  %v3913_v39 = vmul.f32 %v5472_v50, %v6175_v36 }
 0x23c   : > { %3947 = vst [vmem:[%s6080_s9 + $0xf8] sm:$0xff] %v3915_v53 }
 0x23d   : > { %3945 = vst [vmem:[%s6080_s9 + $0xe8] sm:$0xff] %v3913_v39 }
 0x23e PF: > { %s13_s12 = sadd.s32 1, %s5488_s12  }
 0x23f   : > { %p10_p4 = scmp.ge.s32.totalorder %s13_s12, 4  }
 0x241   :  { %12 = sbr.rel (!%p10_p4) target bundleno = 1 (0x1), region = 72 }

</bundles_post_ra>
